<compile_context>
chip_gen: v7x
topology: tpu7x:2x2x1
jax: 0.10.0
libtpu: 0.0.40
codegen_flags: <defaults>
</compile_context>

<pallas_src>
import jax
import jax.numpy as jnp
from jax.experimental import pallas as pl
from jax.experimental.pallas import tpu as pltpu


def ae_kernel(x_ref,
              w1_ref, b1_ref,
              w2_ref, b2_ref,
              w3_ref, b3_ref,
              w4_ref, b4_ref,
              recon_ref, z_ref):
    x = x_ref[...]                                             # bf16 [tile, dim]

    # encode: h1 = relu(x @ W1 + b1) ; z = relu(h1 @ W2 + b2)
    h1 = jnp.dot(x, w1_ref[...], preferred_element_type=jnp.float32) + b1_ref[...]
    h1 = jnp.maximum(h1, 0.0).astype(jnp.bfloat16)
    z = jnp.dot(h1, w2_ref[...], preferred_element_type=jnp.float32) + b2_ref[...]
    z = jnp.maximum(z, 0.0)                                    # f32 bottleneck
    z_ref[...] = z.astype(z_ref.dtype)

    # decode: h3 = relu(z @ W3 + b3) ; recon = relu(h3 @ W4 + b4)
    h3 = jnp.dot(z.astype(jnp.bfloat16), w3_ref[...],
                 preferred_element_type=jnp.float32) + b3_ref[...]
    h3 = jnp.maximum(h3, 0.0).astype(jnp.bfloat16)
    recon = jnp.dot(h3, w4_ref[...], preferred_element_type=jnp.float32) + b4_ref[...]
    recon_ref[...] = jnp.maximum(recon, 0.0).astype(recon_ref.dtype)


def ae_forward(x, params, *, dim, batch_tile=256):
    """Matches AE.forward: returns (decode(encode(x.view(-1, dim))), z).

    batch_tile: 256 is the MXU-filling sweet spot on v6e/v7x; 128 also fully
    feeds v5e's 128-wide MXU if VMEM is ever tight there.
    """
    x2d = x.reshape(-1, dim)                       # x.view(-1, self.dim)
    B = x2d.shape[0]

    # Pad the batch up to a whole number of tiles (ragged-batch handling).
    tiles = pl.cdiv(B, batch_tile)
    if tiles > 1:
        tiles = ((tiles + 1) // 2) * 2             # even grid -> both v7x TCs busy
    B_pad = tiles * batch_tile
    if B_pad != B:
        x2d = jnp.pad(x2d, ((0, B_pad - B), (0, 0)))

    w1, b1, w2, b2, w3, b3, w4, b4 = params
    # bf16 inputs to the MXU (f32 accumulation inside the kernel).
    x_bf = x2d.astype(jnp.bfloat16)
    w1b, w2b, w3b, w4b = (w.astype(jnp.bfloat16) for w in (w1, w2, w3, w4))

    def batch_map(i):
        return (i, 0)

    def full_map(i):
        return (0, 0)

    recon, z = pl.pallas_call(
        ae_kernel,
        out_shape=(
            jax.ShapeDtypeStruct((B_pad, dim), jnp.float32),
            jax.ShapeDtypeStruct((B_pad, 256), jnp.float32),
        ),
        grid_spec=pltpu.PrefetchScalarGridSpec(
            num_scalar_prefetch=0,
            grid=(tiles,),
            in_specs=[
                pl.BlockSpec((batch_tile, dim), batch_map),   # x tile (bf16)
                pl.BlockSpec((dim, 512), full_map),           # W1 (bf16)
                pl.BlockSpec((1, 512), full_map),             # b1 (f32)
                pl.BlockSpec((512, 256), full_map),           # W2
                pl.BlockSpec((1, 256), full_map),             # b2
                pl.BlockSpec((256, 512), full_map),           # W3
                pl.BlockSpec((1, 512), full_map),             # b3
                pl.BlockSpec((512, dim), full_map),           # W4
                pl.BlockSpec((1, dim), full_map),              # b4
            ],
            out_specs=[
                pl.BlockSpec((batch_tile, dim), batch_map),   # reconstruction
                pl.BlockSpec((batch_tile, 256), batch_map),   # z (bottleneck)
            ],
        ),
        compiler_params=pltpu.CompilerParams(
            dimension_semantics=("parallel",)),
    )(x_bf, w1b, b1, w2b, b2, w3b, b3, w4b, b4)

    # Drop the padded rows.
    return recon[:B], z[:B]


def init_params(key, dim):
    """Deterministic synthetic init. Weights stored as [in, out], f32."""
    ks = jax.random.split(key, 8)

    def lin(kw, kb, fan_in, fan_out):
        scale = 1.0 / jnp.sqrt(fan_in)
        w = jax.random.uniform(kw, (fan_in, fan_out), jnp.float32, -scale, scale)
        b = jax.random.uniform(kb, (1, fan_out), jnp.float32, -scale, scale)
        return w, b

    w1, b1 = lin(ks[0], ks[1], dim, 512)
    w2, b2 = lin(ks[2], ks[3], 512, 256)
    w3, b3 = lin(ks[4], ks[5], 256, 512)
    w4, b4 = lin(ks[6], ks[7], 512, dim)
    return (w1, b1, w2, b2, w3, b3, w4, b4)


def ae_reference(x, params, dim):
    """Pure-JAX reference mirroring the kernel's bf16-input / f32-accum math."""
    w1, b1, w2, b2, w3, b3, w4, b4 = params
    x2d = x.reshape(-1, dim)

    def layer(a, w, b):
        y = jnp.dot(a.astype(jnp.bfloat16), w.astype(jnp.bfloat16),
                    preferred_element_type=jnp.float32) + b
        return jnp.maximum(y, 0.0)

    h1 = layer(x2d, w1, b1)
    z = layer(h1, w2, b2)
    h3 = layer(z, w3, b3)
    recon = layer(h3, w4, b4)
    return recon, z


if __name__ == "__main__":
    DIM = 256          # AE(dim=256)
    key = jax.random.PRNGKey(0)
    k_x, k_p = jax.random.split(key)

    # Input: any leading shape; forward flattens via x.view(-1, dim).
    x = jax.random.normal(k_x, (2, 8, DIM), dtype=jnp.float32)
    params = init_params(k_p, DIM)

    recon, z = jax.jit(lambda xx: ae_forward(xx, params, dim=DIM))(x)
    recon = jax.block_until_ready(recon)
    z = jax.block_until_ready(z)

    # Sanity check against the pure-JAX reference (same bf16/f32 mixed math).
    recon_ref, z_ref = ae_reference(x, params, DIM)
    assert recon.shape == (16, DIM) and z.shape == (16, 256)
    assert jnp.allclose(recon, recon_ref, atol=1e-2, rtol=1e-2)
    assert jnp.allclose(z, z_ref, atol=1e-2, rtol=1e-2)

    print("KERNEL_OK")
</pallas_src>

<mosaic_0001>
module attributes {stable_mosaic.version = 11 : i64} {
  func.func @ae_kernel(%arg0: i32, %arg1: memref<256x256xbf16, #tpu.memory_space<vmem>>, %arg2: memref<256x512xbf16, #tpu.memory_space<vmem>>, %arg3: memref<1x512xf32, #tpu.memory_space<vmem>>, %arg4: memref<512x256xbf16, #tpu.memory_space<vmem>>, %arg5: memref<1x256xf32, #tpu.memory_space<vmem>>, %arg6: memref<256x512xbf16, #tpu.memory_space<vmem>>, %arg7: memref<1x512xf32, #tpu.memory_space<vmem>>, %arg8: memref<512x256xbf16, #tpu.memory_space<vmem>>, %arg9: memref<1x256xf32, #tpu.memory_space<vmem>>, %arg10: memref<256x256xf32, #tpu.memory_space<vmem>>, %arg11: memref<256x256xf32, #tpu.memory_space<vmem>>) attributes {dimension_semantics = [#tpu.dimension_semantics<parallel>], iteration_bounds = array<i64: 1>, scalar_prefetch = 0 : i64, scratch_operands = 0 : i64, tpu.core_type = #tpu.core_type<tc>, window_params = [{transform_indices = @transform_0, window_bounds = array<i64: 256, 256>}, {pipeline_mode = #tpu.pipeline_mode<synchronous>, transform_indices = @transform_1, window_bounds = array<i64: 256, 512>}, {pipeline_mode = #tpu.pipeline_mode<synchronous>, transform_indices = @transform_2, window_bounds = array<i64: 1, 512>}, {pipeline_mode = #tpu.pipeline_mode<synchronous>, transform_indices = @transform_3, window_bounds = array<i64: 512, 256>}, {pipeline_mode = #tpu.pipeline_mode<synchronous>, transform_indices = @transform_4, window_bounds = array<i64: 1, 256>}, {pipeline_mode = #tpu.pipeline_mode<synchronous>, transform_indices = @transform_5, window_bounds = array<i64: 256, 512>}, {pipeline_mode = #tpu.pipeline_mode<synchronous>, transform_indices = @transform_6, window_bounds = array<i64: 1, 512>}, {pipeline_mode = #tpu.pipeline_mode<synchronous>, transform_indices = @transform_7, window_bounds = array<i64: 512, 256>}, {pipeline_mode = #tpu.pipeline_mode<synchronous>, transform_indices = @transform_8, window_bounds = array<i64: 1, 256>}, {transform_indices = @transform_9, window_bounds = array<i64: 256, 256>}, {transform_indices = @transform_10, window_bounds = array<i64: 256, 256>}]} {
    %c0 = arith.constant 0 : index
    %c0_0 = arith.constant 0 : index
    %0 = vector.load %arg1[%c0, %c0_0] : memref<256x256xbf16, #tpu.memory_space<vmem>>, vector<256x256xbf16>
    %c0_1 = arith.constant 0 : index
    %c0_2 = arith.constant 0 : index
    %1 = vector.load %arg2[%c0_1, %c0_2] : memref<256x512xbf16, #tpu.memory_space<vmem>>, vector<256x512xbf16>
    %cst = arith.constant dense<0.000000e+00> : vector<256x512xf32>
    %2 = tpu.matmul %0, %1, %cst {dimension_numbers = #tpu.dot_dimension_numbers<[1], [0], [0], [1], [0, 0, 1, 1], [], []>} : vector<256x256xbf16>, vector<256x512xbf16>, vector<256x512xf32> -> vector<256x512xf32>
    %c0_3 = arith.constant 0 : index
    %c0_4 = arith.constant 0 : index
    %3 = vector.load %arg3[%c0_3, %c0_4] : memref<1x512xf32, #tpu.memory_space<vmem>>, vector<1x512xf32>
    %4 = vector.broadcast %3 : vector<1x512xf32> to vector<256x512xf32>
    %5 = arith.addf %2, %4 : vector<256x512xf32>
    %cst_5 = arith.constant 0.000000e+00 : f32
    %6 = vector.broadcast %cst_5 : f32 to vector<256x512xf32>
    %7 = arith.maximumf %5, %6 : vector<256x512xf32>
    %8 = arith.truncf %7 : vector<256x512xf32> to vector<256x512xbf16>
    %c0_6 = arith.constant 0 : index
    %c0_7 = arith.constant 0 : index
    %9 = vector.load %arg4[%c0_6, %c0_7] : memref<512x256xbf16, #tpu.memory_space<vmem>>, vector<512x256xbf16>
    %cst_8 = arith.constant dense<0.000000e+00> : vector<256x256xf32>
    %10 = tpu.matmul %8, %9, %cst_8 {dimension_numbers = #tpu.dot_dimension_numbers<[1], [0], [0], [1], [0, 0, 1, 1], [], []>} : vector<256x512xbf16>, vector<512x256xbf16>, vector<256x256xf32> -> vector<256x256xf32>
    %c0_9 = arith.constant 0 : index
    %c0_10 = arith.constant 0 : index
    %11 = vector.load %arg5[%c0_9, %c0_10] : memref<1x256xf32, #tpu.memory_space<vmem>>, vector<1x256xf32>
    %12 = vector.broadcast %11 : vector<1x256xf32> to vector<256x256xf32>
    %13 = arith.addf %10, %12 : vector<256x256xf32>
    %cst_11 = arith.constant 0.000000e+00 : f32
    %14 = vector.broadcast %cst_11 : f32 to vector<256x256xf32>
    %15 = arith.maximumf %13, %14 : vector<256x256xf32>
    %c0_12 = arith.constant 0 : index
    %c0_13 = arith.constant 0 : index
    %16 = vector.load %arg11[%c0_12, %c0_13] : memref<256x256xf32, #tpu.memory_space<vmem>>, vector<256x256xf32>
    tpu.vector_store %arg11[%c0_12, %c0_13], %15 {strides = array<i32>} : memref<256x256xf32, #tpu.memory_space<vmem>>, vector<256x256xf32>,
    %17 = arith.truncf %15 : vector<256x256xf32> to vector<256x256xbf16>
    %c0_14 = arith.constant 0 : index
    %c0_15 = arith.constant 0 : index
    %18 = vector.load %arg6[%c0_14, %c0_15] : memref<256x512xbf16, #tpu.memory_space<vmem>>, vector<256x512xbf16>
    %cst_16 = arith.constant dense<0.000000e+00> : vector<256x512xf32>
    %19 = tpu.matmul %17, %18, %cst_16 {dimension_numbers = #tpu.dot_dimension_numbers<[1], [0], [0], [1], [0, 0, 1, 1], [], []>} : vector<256x256xbf16>, vector<256x512xbf16>, vector<256x512xf32> -> vector<256x512xf32>
    %c0_17 = arith.constant 0 : index
    %c0_18 = arith.constant 0 : index
    %20 = vector.load %arg7[%c0_17, %c0_18] : memref<1x512xf32, #tpu.memory_space<vmem>>, vector<1x512xf32>
    %21 = vector.broadcast %20 : vector<1x512xf32> to vector<256x512xf32>
    %22 = arith.addf %19, %21 : vector<256x512xf32>
    %cst_19 = arith.constant 0.000000e+00 : f32
    %23 = vector.broadcast %cst_19 : f32 to vector<256x512xf32>
    %24 = arith.maximumf %22, %23 : vector<256x512xf32>
    %25 = arith.truncf %24 : vector<256x512xf32> to vector<256x512xbf16>
    %c0_20 = arith.constant 0 : index
    %c0_21 = arith.constant 0 : index
    %26 = vector.load %arg8[%c0_20, %c0_21] : memref<512x256xbf16, #tpu.memory_space<vmem>>, vector<512x256xbf16>
    %cst_22 = arith.constant dense<0.000000e+00> : vector<256x256xf32>
    %27 = tpu.matmul %25, %26, %cst_22 {dimension_numbers = #tpu.dot_dimension_numbers<[1], [0], [0], [1], [0, 0, 1, 1], [], []>} : vector<256x512xbf16>, vector<512x256xbf16>, vector<256x256xf32> -> vector<256x256xf32>
    %c0_23 = arith.constant 0 : index
    %c0_24 = arith.constant 0 : index
    %28 = vector.load %arg9[%c0_23, %c0_24] : memref<1x256xf32, #tpu.memory_space<vmem>>, vector<1x256xf32>
    %29 = vector.broadcast %28 : vector<1x256xf32> to vector<256x256xf32>
    %30 = arith.addf %27, %29 : vector<256x256xf32>
    %cst_25 = arith.constant 0.000000e+00 : f32
    %31 = vector.broadcast %cst_25 : f32 to vector<256x256xf32>
    %32 = arith.maximumf %30, %31 : vector<256x256xf32>
    %c0_26 = arith.constant 0 : index
    %c0_27 = arith.constant 0 : index
    %33 = vector.load %arg10[%c0_26, %c0_27] : memref<256x256xf32, #tpu.memory_space<vmem>>, vector<256x256xf32>
    tpu.vector_store %arg10[%c0_26, %c0_27], %32 {strides = array<i32>} : memref<256x256xf32, #tpu.memory_space<vmem>>, vector<256x256xf32>,
    return
  }
  func.func @transform_0(%arg0: i32) -> (i32, i32) {
    %c0_i32 = arith.constant 0 : i32
    %c0_i32_0 = arith.constant 0 : i32
    return %arg0, %c0_i32 : i32, i32
  }
  func.func @transform_1(%arg0: i32) -> (i32, i32) {
    %c0_i32 = arith.constant 0 : i32
    %c0_i32_0 = arith.constant 0 : i32
    %c0_i32_1 = arith.constant 0 : i32
    return %c0_i32, %c0_i32_0 : i32, i32
  }
  func.func @transform_2(%arg0: i32) -> (i32, i32) {
    %c0_i32 = arith.constant 0 : i32
    %c0_i32_0 = arith.constant 0 : i32
    %c0_i32_1 = arith.constant 0 : i32
    return %c0_i32, %c0_i32_0 : i32, i32
  }
  func.func @transform_3(%arg0: i32) -> (i32, i32) {
    %c0_i32 = arith.constant 0 : i32
    %c0_i32_0 = arith.constant 0 : i32
    %c0_i32_1 = arith.constant 0 : i32
    return %c0_i32, %c0_i32_0 : i32, i32
  }
  func.func @transform_4(%arg0: i32) -> (i32, i32) {
    %c0_i32 = arith.constant 0 : i32
    %c0_i32_0 = arith.constant 0 : i32
    %c0_i32_1 = arith.constant 0 : i32
    return %c0_i32, %c0_i32_0 : i32, i32
  }
  func.func @transform_5(%arg0: i32) -> (i32, i32) {
    %c0_i32 = arith.constant 0 : i32
    %c0_i32_0 = arith.constant 0 : i32
    %c0_i32_1 = arith.constant 0 : i32
    return %c0_i32, %c0_i32_0 : i32, i32
  }
  func.func @transform_6(%arg0: i32) -> (i32, i32) {
    %c0_i32 = arith.constant 0 : i32
    %c0_i32_0 = arith.constant 0 : i32
    %c0_i32_1 = arith.constant 0 : i32
    return %c0_i32, %c0_i32_0 : i32, i32
  }
  func.func @transform_7(%arg0: i32) -> (i32, i32) {
    %c0_i32 = arith.constant 0 : i32
    %c0_i32_0 = arith.constant 0 : i32
    %c0_i32_1 = arith.constant 0 : i32
    return %c0_i32, %c0_i32_0 : i32, i32
  }
  func.func @transform_8(%arg0: i32) -> (i32, i32) {
    %c0_i32 = arith.constant 0 : i32
    %c0_i32_0 = arith.constant 0 : i32
    %c0_i32_1 = arith.constant 0 : i32
    return %c0_i32, %c0_i32_0 : i32, i32
  }
  func.func @transform_9(%arg0: i32) -> (i32, i32) {
    %c0_i32 = arith.constant 0 : i32
    %c0_i32_0 = arith.constant 0 : i32
    return %arg0, %c0_i32 : i32, i32
  }
  func.func @transform_10(%arg0: i32) -> (i32, i32) {
    %c0_i32 = arith.constant 0 : i32
    %c0_i32_0 = arith.constant 0 : i32
    return %arg0, %c0_i32 : i32, i32
  }
}

</mosaic_0001>

<bundles_post_ra>
// kernel: _lambda_.1
= control target key start
LH: loop header
LB: loop body
LE: loop exit
PB: predicated region body
PF: predicated region fallthrough
CT: control target
= control target key end

     0   :  { %s7047_s1 = inlined_call_operand.vmem [shape: bf16[256,512], index: 1, kind: input, shape index: {}]   ;;  %s7048_s0 = inlined_call_operand.vmem [shape: bf16[256,256], index: 0, kind: input, shape index: {}]   ;;  %s7049_s3 = inlined_call_operand.vmem [shape: bf16[512,256], index: 3, kind: input, shape index: {}]   ;;  %s7050_s2 = inlined_call_operand.vmem [shape: f32[1,512], index: 2, kind: input, shape index: {}]   ;;  %s7051_s5 = inlined_call_operand.vmem [shape: bf16[256,512], index: 5, kind: input, shape index: {}]   ;;  %s7052_s7 = inlined_call_operand.vmem [shape: bf16[512,256], index: 7, kind: input, shape index: {}]   ;;  %s7053_s4 = inlined_call_operand.vmem [shape: f32[1,256], index: 4, kind: input, shape index: {}]   ;;  %s7054_s10 = inlined_call_operand.vmem [shape: f32[256,256], index: 10, kind: output, shape index: {1}]   ;;  %s7055_s6 = inlined_call_operand.vmem [shape: f32[1,512], index: 6, kind: input, shape index: {}]   ;;  %s7056_s8 = inlined_call_operand.vmem [shape: f32[1,256], index: 8, kind: input, shape index: {}]   ;;  %s7057_s9 = inlined_call_operand.vmem [shape: f32[256,256], index: 9, kind: output, shape index: {0}]  }
   0x1   :  { %v4598_v0 = vld [vmem:[%s7047_s1 + $0x4] ss:$16 sps:$4 sm:$0xff]   ;;  %v4600_v1 = vld [vmem:[%s7047_s1] ss:$16 sps:$4 sm:$0xff]   ;;  %v4651_v33 = vld [vmem:[%s7047_s1 + $0xc] ss:$16 sps:$4 sm:$0xff]  }
   0x2   :  { %632 = vmatprep.subr.bf16.mxu1 %v4598_v0  ;;  %v4601_v2 = vld [vmem:[%s7047_s1 + $0x24] ss:$16 sps:$4 sm:$0xff]   ;;  %v4603_v3 = vld [vmem:[%s7047_s1 + $0x20] ss:$16 sps:$4 sm:$0xff]   ;;  %v4649_v35 = vld [vmem:[%s7047_s1 + $0x8] ss:$16 sps:$4 sm:$0xff]  }
   0x3   :  { %633 = vmatpush1.bf16.msra.mxu1 %v4600_v1  ;;  %v4604_v4 = vld [vmem:[%s7047_s1 + $0x44] ss:$16 sps:$4 sm:$0xff]   ;;  %v4606_v5 = vld [vmem:[%s7047_s1 + $0x40] ss:$16 sps:$4 sm:$0xff]   ;;  %v4657_v37 = vld [vmem:[%s7047_s1 + $0x2c] ss:$16 sps:$4 sm:$0xff]  }
   0x4   :  { %634 = vmatprep.subr.bf16.mxu1 %v4601_v2  ;;  %v4607_v6 = vld [vmem:[%s7047_s1 + $0x64] ss:$16 sps:$4 sm:$0xff]   ;;  %v4609_v7 = vld [vmem:[%s7047_s1 + $0x60] ss:$16 sps:$4 sm:$0xff]   ;;  %v4655_v38 = vld [vmem:[%s7047_s1 + $0x28] ss:$16 sps:$4 sm:$0xff]  }
   0x5   :  { %v4610_v8 = vld [vmem:[%s7047_s1 + $0x84] ss:$16 sps:$4 sm:$0xff]   ;;  %v4612_v9 = vld [vmem:[%s7047_s1 + $0x80] ss:$16 sps:$4 sm:$0xff]   ;;  %v4663_v39 = vld [vmem:[%s7047_s1 + $0x4c] ss:$16 sps:$4 sm:$0xff]  }
   0x6   :  { %v4613_v10 = vld [vmem:[%s7047_s1 + $0xa4] ss:$16 sps:$4 sm:$0xff]   ;;  %v4615_v11 = vld [vmem:[%s7047_s1 + $0xa0] ss:$16 sps:$4 sm:$0xff]   ;;  %v4661_v42 = vld [vmem:[%s7047_s1 + $0x48] ss:$16 sps:$4 sm:$0xff]  }
   0x7   :  { %635 = vmatpush1.bf16.msra.mxu1 %v4603_v3  ;;  %v4616_v12 = vld [vmem:[%s7047_s1 + $0xc4] ss:$16 sps:$4 sm:$0xff]   ;;  %v4618_v14 = vld [vmem:[%s7047_s1 + $0xc0] ss:$16 sps:$4 sm:$0xff]   ;;  %v4669_v43 = vld [vmem:[%s7047_s1 + $0x6c] ss:$16 sps:$4 sm:$0xff]  }
   0x8   :  { %636 = vmatprep.subr.bf16.mxu1 %v4604_v4  ;;  %v5127_v13 = vld [vmem:[%s7048_s0 + $0x4] ss:$8 sps:$4 sm:$0xff]   ;;  %v4621_v16 = vld [vmem:[%s7047_s1 + $0xe0] ss:$16 sps:$4 sm:$0xff]   ;;  %v5201_v36 = vld [vmem:[%s7048_s0 + $0x14] ss:$8 sps:$4 sm:$0xff]  }
   0x9   :  { %v4619_v15 = vld [vmem:[%s7047_s1 + $0xe4] ss:$16 sps:$4 sm:$0xff]   ;;  %664 = vmatprep.mubr.bf16.mxu1 %v5127_v13  ;;  %v4624_v18 = vld [vmem:[%s7047_s1 + $0x100] ss:$16 sps:$4 sm:$0xff]   ;;  %v4667_v44 = vld [vmem:[%s7047_s1 + $0x68] ss:$16 sps:$4 sm:$0xff]  }
   0xa   :  { %v4622_v17 = vld [vmem:[%s7047_s1 + $0x104] ss:$16 sps:$4 sm:$0xff]   ;;  %v4627_v20 = vld [vmem:[%s7047_s1 + $0x120] ss:$16 sps:$4 sm:$0xff]   ;;  %v4675_v45 = vld [vmem:[%s7047_s1 + $0x8c] ss:$16 sps:$4 sm:$0xff]  }
   0xb   :  { %637 = vmatpush1.bf16.msra.mxu1 %v4606_v5  ;;  %v4625_v19 = vld [vmem:[%s7047_s1 + $0x124] ss:$16 sps:$4 sm:$0xff]   ;;  %v4630_v22 = vld [vmem:[%s7047_s1 + $0x140] ss:$16 sps:$4 sm:$0xff]   ;;  %v4673_v48 = vld [vmem:[%s7047_s1 + $0x88] ss:$16 sps:$4 sm:$0xff]  }
   0xc   :  { %638 = vmatprep.subr.bf16.mxu1 %v4607_v6  ;;  %v4628_v21 = vld [vmem:[%s7047_s1 + $0x144] ss:$16 sps:$4 sm:$0xff]   ;;  %v4633_v24 = vld [vmem:[%s7047_s1 + $0x160] ss:$16 sps:$4 sm:$0xff]   ;;  %v4681_v49 = vld [vmem:[%s7047_s1 + $0xac] ss:$16 sps:$4 sm:$0xff]  }
   0xd   :  { %v4631_v23 = vld [vmem:[%s7047_s1 + $0x164] ss:$16 sps:$4 sm:$0xff]   ;;  %v4636_v26 = vld [vmem:[%s7047_s1 + $0x180] ss:$16 sps:$4 sm:$0xff]   ;;  %v4679_v50 = vld [vmem:[%s7047_s1 + $0xa8] ss:$16 sps:$4 sm:$0xff]  }
   0xe   :  { %v4634_v25 = vld [vmem:[%s7047_s1 + $0x184] ss:$16 sps:$4 sm:$0xff]   ;;  %v4639_v28 = vld [vmem:[%s7047_s1 + $0x1a0] ss:$16 sps:$4 sm:$0xff]   ;;  %v4687_v51 = vld [vmem:[%s7047_s1 + $0xcc] ss:$16 sps:$4 sm:$0xff]  }
   0xf   :  { %639 = vmatpush1.bf16.msra.mxu1 %v4609_v7  ;;  %v4637_v27 = vld [vmem:[%s7047_s1 + $0x1a4] ss:$16 sps:$4 sm:$0xff]   ;;  %v4642_v30 = vld [vmem:[%s7047_s1 + $0x1c0] ss:$16 sps:$4 sm:$0xff]   ;;  %v4685_v54 = vld [vmem:[%s7047_s1 + $0xc8] ss:$16 sps:$4 sm:$0xff]  }
  0x10   :  { %640 = vmatprep.subr.bf16.mxu1 %v4610_v8  ;;  %v4640_v29 = vld [vmem:[%s7047_s1 + $0x1c4] ss:$16 sps:$4 sm:$0xff]   ;;  %v4645_v32 = vld [vmem:[%s7047_s1 + $0x1e0] ss:$16 sps:$4 sm:$0xff]   ;;  %v4693_v55 = vld [vmem:[%s7047_s1 + $0xec] ss:$16 sps:$4 sm:$0xff]  }
  0x11   :  { %v4643_v31 = vld [vmem:[%s7047_s1 + $0x1e4] ss:$16 sps:$4 sm:$0xff]   ;;  %v5193_v34 = vld [vmem:[%s7048_s0] ss:$8 sps:$4 sm:$0xff]   ;;  %v5217_v40 = vld [vmem:[%s7048_s0 + $0x10] ss:$8 sps:$4 sm:$0xff]  }
  0x12   :  { %v5222_v41 = vld [vmem:[%s7048_s0 + $0x24] ss:$8 sps:$4 sm:$0xff]   ;;  %v5241_v46 = vld [vmem:[%s7048_s0 + $0x20] ss:$8 sps:$4 sm:$0xff]   ;;  %v5246_v47 = vld [vmem:[%s7048_s0 + $0x34] ss:$8 sps:$4 sm:$0xff]  }
  0x13   :  { %641 = vmatpush1.bf16.msra.mxu1 %v4612_v9  ;;  %v5265_v52 = vld [vmem:[%s7048_s0 + $0x30] ss:$8 sps:$4 sm:$0xff]   ;;  %v5270_v53 = vld [vmem:[%s7048_s0 + $0x44] ss:$8 sps:$4 sm:$0xff]   ;;  %v5292_v59 = vld [vmem:[%s7048_s0 + $0x40] ss:$8 sps:$4 sm:$0xff]  }
  0x14   :  { %642 = vmatprep.subr.bf16.mxu1 %v4613_v10  ;;  %v4691_v56 = vld [vmem:[%s7047_s1 + $0xe8] ss:$16 sps:$4 sm:$0xff]   ;;  %v4699_v57 = vld [vmem:[%s7047_s1 + $0x10c] ss:$16 sps:$4 sm:$0xff]  }
  0x15   :  { %v4742_v58 = vld [vmem:[%s7049_s3 + $0x4] ss:$8 sps:$4 sm:$0xff]   ;;  %v4744_v60 = vld [vmem:[%s7049_s3] ss:$8 sps:$4 sm:$0xff]   ;;  %v5300_v61 = vld [vmem:[%s7048_s0 + $0x54] ss:$8 sps:$4 sm:$0xff]  }
  0x16   :  { %v4697_v62 = vld [vmem:[%s7047_s1 + $0x108] ss:$16 sps:$4 sm:$0xff]   ;;  %1606 = vmatprep.subr.bf16.mxu0 %v4742_v58  ;;  %v4705_v63 = vld [vmem:[%s7047_s1 + $0x12c] ss:$16 sps:$4 sm:$0xff]  }
  0x17   :  { %643 = vmatpush1.bf16.msra.mxu1 %v4615_v11  ;;  %1607 = vmatpush1.bf16.msra.mxu0 %v4744_v60  ;;  %v4703_v0 = vld [vmem:[%s7047_s1 + $0x128] ss:$16 sps:$4 sm:$0xff]   ;;  %v4711_v1 = vld [vmem:[%s7047_s1 + $0x14c] ss:$16 sps:$4 sm:$0xff]  }
  0x18   :  { %644 = vmatprep.subr.bf16.mxu1 %v4616_v12  ;;  %v4745_v2 = vld [vmem:[%s7049_s3 + $0x14] ss:$8 sps:$4 sm:$0xff]   ;;  %v4747_v3 = vld [vmem:[%s7049_s3 + $0x10] ss:$8 sps:$4 sm:$0xff]   ;;  %v4748_v4 = vld [vmem:[%s7049_s3 + $0x24] ss:$8 sps:$4 sm:$0xff]  }
  0x19   :  { %v4750_v5 = vld [vmem:[%s7049_s3 + $0x20] ss:$8 sps:$4 sm:$0xff]   ;;  %v5331_v6 = vld [vmem:[%s7048_s0 + $0x50] ss:$8 sps:$4 sm:$0xff]   ;;  %1608 = vmatprep.subr.bf16.mxu0 %v4745_v2  ;;  %v5336_v7 = vld [vmem:[%s7048_s0 + $0x64] ss:$8 sps:$4 sm:$0xff]  }
  0x1a   :  { %v4709_v8 = vld [vmem:[%s7047_s1 + $0x148] ss:$16 sps:$4 sm:$0xff]   ;;  %v4717_v9 = vld [vmem:[%s7047_s1 + $0x16c] ss:$16 sps:$4 sm:$0xff]  }
  0x1b   :  { %645 = vmatpush1.bf16.msra.mxu1 %v4618_v14  ;;  %1609 = vmatpush1.bf16.msra.mxu0 %v4747_v3  ;;  %v4715_v10 = vld [vmem:[%s7047_s1 + $0x168] ss:$16 sps:$4 sm:$0xff]   ;;  %v4723_v11 = vld [vmem:[%s7047_s1 + $0x18c] ss:$16 sps:$4 sm:$0xff]  }
  0x1c   :  { %646 = vmatprep.subr.bf16.mxu1 %v4619_v15  ;;  %1610 = vmatprep.subr.bf16.mxu0 %v4748_v4  ;;  %v4751_v12 = vld [vmem:[%s7049_s3 + $0x34] ss:$8 sps:$4 sm:$0xff]   ;;  %v4753_v14 = vld [vmem:[%s7049_s3 + $0x30] ss:$8 sps:$4 sm:$0xff]   ;;  %v4754_v15 = vld [vmem:[%s7049_s3 + $0x44] ss:$8 sps:$4 sm:$0xff]  }
  0x1d   :  { %v4781_v58 = vld [vmem:[%s7049_s3 + $0xd4] ss:$8 sps:$4 sm:$0xff]   ;;  %v4783_v60 = vld [vmem:[%s7049_s3 + $0xd0] ss:$8 sps:$4 sm:$0xff]   ;;  %v5526_v4 = vld [vmem:[%s7048_s0 + $0xc0] ss:$8 sps:$4 sm:$0xff]  }
  0x1e   :  { %v4787_v2 = vld [vmem:[%s7049_s3 + $0xf4] ss:$8 sps:$4 sm:$0xff]   ;;  %v4789_v3 = vld [vmem:[%s7049_s3 + $0xf0] ss:$8 sps:$4 sm:$0xff]  }
  0x1f   :  { %647 = vmatpush1.bf16.msra.mxu1 %v4621_v16  ;;  %1611 = vmatpush1.bf16.msra.mxu0 %v4750_v5  ;;  %v4756_v16 = vld [vmem:[%s7049_s3 + $0x40] ss:$8 sps:$4 sm:$0xff]   ;;  %v5531_v5 = vld [vmem:[%s7048_s0 + $0xd4] ss:$8 sps:$4 sm:$0xff]  }
  0x20   :  { %648 = vmatprep.subr.bf16.mxu1 %v4622_v17  ;;  %v5367_v17 = vld [vmem:[%s7048_s0 + $0x60] ss:$8 sps:$4 sm:$0xff]   ;;  %1612 = vmatprep.subr.bf16.mxu0 %v4751_v12  ;;  %v5558_v12 = vld [vmem:[%s7048_s0 + $0xf4] ss:$8 sps:$4 sm:$0xff]  }
  0x23   :  { %649 = vmatpush1.bf16.msra.mxu1 %v4624_v18  ;;  %v5372_v18 = vld [vmem:[%s7048_s0 + $0x74] ss:$8 sps:$4 sm:$0xff]   ;;  %1613 = vmatpush1.bf16.msra.mxu0 %v4753_v14  ;;  %v5565_v14 = vld [vmem:[%s7048_s0 + $0xf0] ss:$8 sps:$4 sm:$0xff]  }
  0x24   :  { %650 = vmatprep.subr.bf16.mxu1 %v4625_v19  ;;  %v4721_v19 = vld [vmem:[%s7047_s1 + $0x188] ss:$16 sps:$4 sm:$0xff]   ;;  %1614 = vmatprep.subr.bf16.mxu0 %v4754_v15 }
  0x27   :  { %651 = vmatpush1.bf16.msra.mxu1 %v4627_v20  ;;  %v4729_v20 = vld [vmem:[%s7047_s1 + $0x1ac] ss:$16 sps:$4 sm:$0xff]   ;;  %1615 = vmatpush1.bf16.msra.mxu0 %v4756_v16 }
  0x28   :  { %652 = vmatprep.subr.bf16.mxu1 %v4628_v21  ;;  %v4727_v21 = vld [vmem:[%s7047_s1 + $0x1a8] ss:$16 sps:$4 sm:$0xff]  }
  0x2b   :  { %653 = vmatpush1.bf16.msra.mxu1 %v4630_v22  ;;  %v4757_v22 = vld [vmem:[%s7049_s3 + $0x54] ss:$8 sps:$4 sm:$0xff]  }
  0x2c   :  { %654 = vmatprep.subr.bf16.mxu1 %v4631_v23  ;;  %v4759_v23 = vld [vmem:[%s7049_s3 + $0x50] ss:$8 sps:$4 sm:$0xff]   ;;  %1616 = vmatprep.subr.bf16.mxu0 %v4757_v22 }
  0x2d   :  { %1617 = vmatpush1.bf16.msra.mxu0 %v4759_v23 }
  0x2f   :  { %655 = vmatpush1.bf16.msra.mxu1 %v4633_v24  ;;  %v4760_v24 = vld [vmem:[%s7049_s3 + $0x64] ss:$8 sps:$4 sm:$0xff]  }
  0x30   :  { %656 = vmatprep.subr.bf16.mxu1 %v4634_v25  ;;  %v4735_v25 = vld [vmem:[%s7047_s1 + $0x1cc] ss:$16 sps:$4 sm:$0xff]   ;;  %1618 = vmatprep.subr.bf16.mxu0 %v4760_v24  ;;  %v4790_v24 = vld [vmem:[%s7049_s3 + $0x100] ss:$8 sps:$4 sm:$0xff]  }
  0x33   :  { %657 = vmatpush1.bf16.msra.mxu1 %v4636_v26  ;;  %v4762_v26 = vld [vmem:[%s7049_s3 + $0x60] ss:$8 sps:$4 sm:$0xff]  }
  0x34   :  { %658 = vmatprep.subr.bf16.mxu1 %v4637_v27  ;;  %v5403_v27 = vld [vmem:[%s7048_s0 + $0x70] ss:$8 sps:$4 sm:$0xff]   ;;  %1619 = vmatpush1.bf16.msra.mxu0 %v4762_v26 }
  0x37   :  { %659 = vmatpush1.bf16.msra.mxu1 %v4639_v28  ;;  %v5408_v28 = vld [vmem:[%s7048_s0 + $0x84] ss:$8 sps:$4 sm:$0xff]  }
  0x38   :  { %660 = vmatprep.subr.bf16.mxu1 %v4640_v29  ;;  %v4733_v29 = vld [vmem:[%s7047_s1 + $0x1c8] ss:$16 sps:$4 sm:$0xff]  }
  0x3b   :  { %661 = vmatpush1.bf16.msra.mxu1 %v4642_v30  ;;  %v4741_v30 = vld [vmem:[%s7047_s1 + $0x1ec] ss:$16 sps:$4 sm:$0xff]  }
  0x3c   :  { %662 = vmatprep.subr.bf16.mxu1 %v4643_v31  ;;  %v4763_v31 = vld [vmem:[%s7049_s3 + $0x74] ss:$8 sps:$4 sm:$0xff]  }
  0x3d   :  { %1620 = vmatprep.subr.bf16.mxu0 %v4763_v31 }
  0x3f   :  { %663 = vmatpush1.bf16.msra.mxu1 %v4645_v32  ;;  %v4765_v32 = vld [vmem:[%s7049_s3 + $0x70] ss:$8 sps:$4 sm:$0xff]  }
  0x40   :  { %825 = vmatprep.subr.bf16.mxu1 %v4651_v33  ;;  %v4766_v33 = vld [vmem:[%s7049_s3 + $0x84] ss:$8 sps:$4 sm:$0xff]   ;;  %1621 = vmatpush1.bf16.msra.mxu0 %v4765_v32 }
  0x41   :  { %1622 = vmatprep.subr.bf16.mxu0 %v4766_v33  ;;  %v4793_v33 = vld [vmem:[%s7049_s3 + $0x110] ss:$8 sps:$4 sm:$0xff]  }
  0x42   :  { %665 = vmatmul.mubr.bf16.vlgmr.msra.gmra.mrb[0].mxu1 %v5193_v34 }
  0x43   :  { %826 = vmatpush1.bf16.msra.mxu1 %v4649_v35  ;;  %674 = vmatprep.mubr.bf16.mxu1 %v5201_v36  ;;  %v4739_v35 = vld [vmem:[%s7047_s1 + $0x1e8] ss:$16 sps:$4 sm:$0xff]  }
  0x44   :  { %827 = vmatprep.subr.bf16.mxu1 %v4657_v37  ;;  %v4768_v37 = vld [vmem:[%s7049_s3 + $0x80] ss:$8 sps:$4 sm:$0xff]  }
  0x45   :  { %1623 = vmatpush1.bf16.msra.mxu0 %v4768_v37 }
  0x47   :  { %828 = vmatpush1.bf16.msra.mxu1 %v4655_v38  ;;  %v5436_v38 = vld [vmem:[%s7048_s0 + $0x80] ss:$8 sps:$4 sm:$0xff]  }
  0x48   :  { %829 = vmatprep.subr.bf16.mxu1 %v4663_v39  ;;  %v5441_v39 = vld [vmem:[%s7048_s0 + $0x94] ss:$8 sps:$4 sm:$0xff]  }
  0x4a   :  { %675 = vmatmul.mubr.bf16.gmra.mrb[4].mxu1 %v5217_v40 }
  0x4b   :  { %684 = vmatprep.mubr.bf16.mxu1 %v5222_v41  ;;  %830 = vmatpush1.bf16.msra.mxu1 %v4661_v42  ;;  %v4769_v42 = vld [vmem:[%s7049_s3 + $0x94] ss:$8 sps:$4 sm:$0xff]  }
  0x4c   :  { %831 = vmatprep.subr.bf16.mxu1 %v4669_v43  ;;  %v4771_v43 = vld [vmem:[%s7049_s3 + $0x90] ss:$8 sps:$4 sm:$0xff]   ;;  %1624 = vmatprep.subr.bf16.mxu0 %v4769_v42 }
  0x4d   :  { %1625 = vmatpush1.bf16.msra.mxu0 %v4771_v43 }
  0x4f   :  { %832 = vmatpush1.bf16.msra.mxu1 %v4667_v44  ;;  %v4772_v44 = vld [vmem:[%s7049_s3 + $0xa4] ss:$8 sps:$4 sm:$0xff]  }
  0x50   :  { %833 = vmatprep.subr.bf16.mxu1 %v4675_v45  ;;  %v4774_v45 = vld [vmem:[%s7049_s3 + $0xa0] ss:$8 sps:$4 sm:$0xff]   ;;  %1626 = vmatprep.subr.bf16.mxu0 %v4772_v44 }
  0x51   :  { %1627 = vmatpush1.bf16.msra.mxu0 %v4774_v45 }
  0x52   :  { %685 = vmatmul.mubr.bf16.gmra.mrb[8].mxu1 %v5241_v46 }
  0x53   :  { %694 = vmatprep.mubr.bf16.mxu1 %v5246_v47  ;;  %834 = vmatpush1.bf16.msra.mxu1 %v4673_v48  ;;  %v5460_v48 = vld [vmem:[%s7048_s0 + $0x90] ss:$8 sps:$4 sm:$0xff]  }
  0x54   :  { %835 = vmatprep.subr.bf16.mxu1 %v4681_v49  ;;  %v5465_v49 = vld [vmem:[%s7048_s0 + $0xa4] ss:$8 sps:$4 sm:$0xff]  }
  0x57   :  { %836 = vmatpush1.bf16.msra.mxu1 %v4679_v50  ;;  %v4775_v50 = vld [vmem:[%s7049_s3 + $0xb4] ss:$8 sps:$4 sm:$0xff]  }
  0x58   :  { %837 = vmatprep.subr.bf16.mxu1 %v4687_v51  ;;  %v4777_v51 = vld [vmem:[%s7049_s3 + $0xb0] ss:$8 sps:$4 sm:$0xff]   ;;  %1628 = vmatprep.subr.bf16.mxu0 %v4775_v50 }
  0x59   :  { %1629 = vmatpush1.bf16.msra.mxu0 %v4777_v51  ;;  %v4801_v51 = vld [vmem:[%s7049_s3 + $0x134] ss:$8 sps:$4 sm:$0xff]  }
  0x5a   :  { %695 = vmatmul.mubr.bf16.gmra.mrb[12].mxu1 %v5265_v52 }
  0x5b   :  { %704 = vmatprep.mubr.bf16.mxu1 %v5270_v53  ;;  %838 = vmatpush1.bf16.msra.mxu1 %v4685_v54  ;;  %v4778_v54 = vld [vmem:[%s7049_s3 + $0xc4] ss:$8 sps:$4 sm:$0xff]  }
  0x5c   :  { %839 = vmatprep.subr.bf16.mxu1 %v4693_v55  ;;  %v4780_v55 = vld [vmem:[%s7049_s3 + $0xc0] ss:$8 sps:$4 sm:$0xff]   ;;  %1630 = vmatprep.subr.bf16.mxu0 %v4778_v54 }
  0x5d   :  { %1631 = vmatpush1.bf16.msra.mxu0 %v4780_v55 }
  0x5e   :  { %1632 = vmatprep.subr.bf16.mxu0 %v4781_v58 }
  0x5f   :  { %840 = vmatpush1.bf16.msra.mxu1 %v4691_v56  ;;  %v5484_v56 = vld [vmem:[%s7048_s0 + $0xa0] ss:$8 sps:$4 sm:$0xff]  }
  0x60   :  { %841 = vmatprep.subr.bf16.mxu1 %v4699_v57  ;;  %v5489_v57 = vld [vmem:[%s7048_s0 + $0xb4] ss:$8 sps:$4 sm:$0xff]  }
  0x61   :  { %1633 = vmatpush1.bf16.msra.mxu0 %v4783_v60  ;;  %v4799_v60 = vld [vmem:[%s7049_s3 + $0x130] ss:$8 sps:$4 sm:$0xff]  }
  0x62   :  { %705 = vmatmul.mubr.bf16.gmra.mrb[16].mxu1 %v5292_v59 }
  0x63   :  { %714 = vmatprep.mubr.bf16.mxu1 %v5300_v61  ;;  %842 = vmatpush1.bf16.msra.mxu1 %v4697_v62  ;;  %v5502_v62 = vld [vmem:[%s7048_s0 + $0xb0] ss:$8 sps:$4 sm:$0xff]  }
  0x64   :  { %843 = vmatprep.subr.bf16.mxu1 %v4705_v63  ;;  %v4784_v63 = vld [vmem:[%s7049_s3 + $0xe4] ss:$8 sps:$4 sm:$0xff]  }
  0x65   :  { %1634 = vmatprep.subr.bf16.mxu0 %v4784_v63 }
  0x67   :  { %844 = vmatpush1.bf16.msra.mxu1 %v4703_v0  ;;  %v5510_v0 = vld [vmem:[%s7048_s0 + $0xc4] ss:$8 sps:$4 sm:$0xff]  }
  0x68   :  { %845 = vmatprep.subr.bf16.mxu1 %v4711_v1  ;;  %v4786_v1 = vld [vmem:[%s7049_s3 + $0xe0] ss:$8 sps:$4 sm:$0xff]  }
  0x69   :  { %1635 = vmatpush1.bf16.msra.mxu0 %v4786_v1 }
  0x6a   :  { %715 = vmatmul.mubr.bf16.gmra.mrb[20].mxu1 %v5331_v6  ;;  %1636 = vmatprep.subr.bf16.mxu0 %v4787_v2 }
  0x6b   :  { %724 = vmatprep.mubr.bf16.mxu1 %v5336_v7  ;;  %846 = vmatpush1.bf16.msra.mxu1 %v4709_v8  ;;  %v4792_v8 = vld [vmem:[%s7049_s3 + $0x104] ss:$8 sps:$4 sm:$0xff]  }
  0x6c   :  { %847 = vmatprep.subr.bf16.mxu1 %v4717_v9  ;;  %v5541_v9 = vld [vmem:[%s7048_s0 + $0xd0] ss:$8 sps:$4 sm:$0xff]  }
  0x6d   :  { %1637 = vmatpush1.bf16.msra.mxu0 %v4789_v3 }
  0x6e   :  { %1799 = vmatprep.subr.bf16.mxu0 %v4792_v8  ;;  %v4802_v8 = vld [vmem:[%s7049_s3 + $0x140] ss:$8 sps:$4 sm:$0xff]  }
  0x6f   :  { %848 = vmatpush1.bf16.msra.mxu1 %v4715_v10  ;;  %v5546_v10 = vld [vmem:[%s7048_s0 + $0xe4] ss:$8 sps:$4 sm:$0xff]  }
  0x70   :  { %849 = vmatprep.subr.bf16.mxu1 %v4723_v11  ;;  %v5553_v11 = vld [vmem:[%s7048_s0 + $0xe0] ss:$8 sps:$4 sm:$0xff]  }
  0x72   :  { %725 = vmatmul.mubr.bf16.gmra.mrb[24].mxu1 %v5367_v17 }
  0x73   :  { %734 = vmatprep.mubr.bf16.mxu1 %v5372_v18  ;;  %850 = vmatpush1.bf16.msra.mxu1 %v4721_v19 }
  0x74   :  { %851 = vmatprep.subr.bf16.mxu1 %v4729_v20 }
  0x77   :  { %852 = vmatpush1.bf16.msra.mxu1 %v4727_v21 }
  0x78   :  { %853 = vmatprep.subr.bf16.mxu1 %v4735_v25 }
  0x7a   :  { %735 = vmatmul.mubr.bf16.gmra.mrb[28].mxu1 %v5403_v27 }
  0x7b   :  { %744 = vmatprep.mubr.bf16.mxu1 %v5408_v28  ;;  %854 = vmatpush1.bf16.msra.mxu1 %v4733_v29 }
  0x7c   :  { %855 = vmatprep.subr.bf16.mxu1 %v4741_v30 }
  0x7f   :  { %856 = vmatpush1.bf16.msra.mxu1 %v4739_v35 }
  0x82   :  { %745 = vmatmul.mubr.bf16.gmra.mrb[32].mxu1 %v5436_v38 }
  0x83   :  { %754 = vmatprep.mubr.bf16.mxu1 %v5441_v39 }
  0x8a   :  { %755 = vmatmul.mubr.bf16.gmra.mrb[36].mxu1 %v5460_v48 }
  0x8b   :  { %764 = vmatprep.mubr.bf16.mxu1 %v5465_v49 }
  0x92   :  { %765 = vmatmul.mubr.bf16.gmra.mrb[40].mxu1 %v5484_v56 }
  0x93   :  { %774 = vmatprep.mubr.bf16.mxu1 %v5489_v57 }
  0x9a   :  { %775 = vmatmul.mubr.bf16.gmra.mrb[44].mxu1 %v5502_v62 }
  0x9b   :  { %784 = vmatprep.mubr.bf16.mxu1 %v5510_v0 }
  0xa2   :  { %785 = vmatmul.mubr.bf16.gmra.mrb[48].mxu1 %v5526_v4 }
  0xa3   :  { %794 = vmatprep.mubr.bf16.mxu1 %v5531_v5 }
  0xaa   :  { %795 = vmatmul.mubr.bf16.gmra.mrb[52].mxu1 %v5541_v9 }
  0xab   :  { %804 = vmatprep.mubr.bf16.mxu1 %v5546_v10 }
  0xb2   :  { %805 = vmatmul.mubr.bf16.gmra.mrb[56].mxu1 %v5553_v11 }
  0xb3   :  { %814 = vmatprep.mubr.bf16.mxu1 %v5558_v12 }
  0xba   :  { %815 = vmatmul.mubr.bf16.gmra.mrb[60].mxu1 %v5565_v14 }
  0xbb   :  { %857 = vmatprep.mubr.bf16.mxu1 %v5127_v13  ;;  %v132_v13 = vlaneseq }
  0xc2   :  { %858 = vmatmul.mubr.bf16.vlgmr.msra.gmra.mrb[64].mxu1 %v5193_v34  ;;  %v5588_v34 = vshrl.u32 %v132_v13, 7 }
  0xc3   :  { %867 = vmatprep.mubr.bf16.mxu1 %v5201_v36 }
  0xc4   :  { %v5592_v36 = vsub.s32 0, %v5588_v34 }
  0xca   :  { %868 = vmatmul.mubr.bf16.gmra.mrb[68].mxu1 %v5217_v40  ;;  %v5597_v40 = vld [vmem:[%s7050_s2] sm:$0xf] }
  0xcb   :  { %877 = vmatprep.mubr.bf16.mxu1 %v5222_v41  ;;  %v5600_v41 = vsub.s32 1, %v5588_v34 }
  0xd2   :  { %878 = vmatmul.mubr.bf16.gmra.mrb[72].mxu1 %v5241_v46  ;;  %v5605_v46 = vrot.slane %v5597_v40, %v5592_v36 }
  0xd3   :  { %887 = vmatprep.mubr.bf16.mxu1 %v5246_v47  ;;  %v5609_v47 = vrot.slane %v5597_v40, %v5600_v41 }
  0xda   :  { %888 = vmatmul.mubr.bf16.gmra.mrb[76].mxu1 %v5265_v52 }
  0xdb   :  { %897 = vmatprep.mubr.bf16.mxu1 %v5270_v53 }
  0xe2   :  { %898 = vmatmul.mubr.bf16.gmra.mrb[80].mxu1 %v5292_v59 }
  0xe3   :  { %907 = vmatprep.mubr.bf16.mxu1 %v5300_v61 }
  0xea   :  { %908 = vmatmul.mubr.bf16.gmra.mrb[84].mxu1 %v5331_v6 }
  0xeb   :  { %917 = vmatprep.mubr.bf16.mxu1 %v5336_v7 }
  0xf2   :  { %918 = vmatmul.mubr.bf16.gmra.mrb[88].mxu1 %v5367_v17 }
  0xf3   :  { %927 = vmatprep.mubr.bf16.mxu1 %v5372_v18 }
  0xfa   :  { %928 = vmatmul.mubr.bf16.gmra.mrb[92].mxu1 %v5403_v27  ;;  %v4795_v27 = vld [vmem:[%s7049_s3 + $0x114] ss:$8 sps:$4 sm:$0xff]  }
  0xfb   :  { %937 = vmatprep.mubr.bf16.mxu1 %v5408_v28 }
 0x102   :  { %938 = vmatmul.mubr.bf16.gmra.mrb[96].mxu1 %v5436_v38  ;;  %v4798_v38 = vld [vmem:[%s7049_s3 + $0x124] ss:$8 sps:$4 sm:$0xff]  }
 0x103   :  { %947 = vmatprep.mubr.bf16.mxu1 %v5441_v39 }
 0x10a   :  { %948 = vmatmul.mubr.bf16.gmra.mrb[100].mxu1 %v5460_v48  ;;  %v4796_v48 = vld [vmem:[%s7049_s3 + $0x120] ss:$8 sps:$4 sm:$0xff]  }
 0x10b   :  { %957 = vmatprep.mubr.bf16.mxu1 %v5465_v49 }
 0x112   :  { %958 = vmatmul.mubr.bf16.gmra.mrb[104].mxu1 %v5484_v56 }
 0x113   :  { %967 = vmatprep.mubr.bf16.mxu1 %v5489_v57 }
 0x115   :  { %v666_v52 = vpop.f32.mrb[0].mxu1 }
 0x116   :  { %v667_v53 = vadd.f32 %v666_v52, %v5605_v46  ;;  %v668_v59 = vpop.f32.mrb[1].mxu1  ;;  %v4807_v52 = vld [vmem:[%s7049_s3 + $0x154] ss:$8 sps:$4 sm:$0xff]  }
 0x117   :  { %v669_v61 = vadd.f32 %v668_v59, %v5609_v47  ;;  %v670_v6 = vpop.f32.mrb[2].mxu1 }
 0x118   :  { %v671_v7 = vadd.f32 %v670_v6, %v5605_v46  ;;  %v672_v15 = vpop.f32.mrb[3].mxu1  ;;  %v1018_v17 = vmax.f32 %v667_v53, 0.0 }
 0x119   :  { %v673_v16 = vadd.f32 %v672_v15, %v5609_v47  ;;  %v1019_v19 = vmax.f32 %v669_v61, 0.0 }
 0x11a   :  { %v1022_v18 = vmax.f32 %v671_v7, 0.0  ;;  %968 = vmatmul.mubr.bf16.gmra.mrb[108].mxu1 %v5502_v62  ;;  %v4805_v7 = vld [vmem:[%s7049_s3 + $0x150] ss:$8 sps:$4 sm:$0xff]  }
 0x11b   :  { %v1023_v20 = vmax.f32 %v673_v16, 0.0  ;;  %977 = vmatprep.mubr.bf16.mxu1 %v5510_v0  ;;  %v4804_v0 = vld [vmem:[%s7049_s3 + $0x144] ss:$8 sps:$4 sm:$0xff]  }
 0x11c   :  { %v1146_v21 = vpack.c.bf16 %v1022_v18, %v1018_v17  ;;  %v4810_v17 = vld [vmem:[%s7049_s3 + $0x164] ss:$8 sps:$4 sm:$0xff]  }
 0x11d   :  { %v676_v22 = vpop.f32.mrb[4].mxu1  ;;  %v1147_v23 = vpack.c.bf16 %v1023_v20, %v1019_v19 }
 0x11e   :  { %v677_v25 = vadd.f32 %v676_v22, %v5605_v46  ;;  %v678_v26 = vpop.f32.mrb[5].mxu1 }
 0x11f   :  { %v679_v28 = vadd.f32 %v678_v26, %v5609_v47  ;;  %v680_v29 = vpop.f32.mrb[6].mxu1  ;;  %1638 = vmatprep.mubr.bf16.mxu0 %v1147_v23  ;;  %v4808_v23 = vld [vmem:[%s7049_s3 + $0x160] ss:$8 sps:$4 sm:$0xff]  }
 0x120   :  { %v681_v30 = vadd.f32 %v680_v29, %v5605_v46  ;;  %v682_v31 = vpop.f32.mrb[7].mxu1  ;;  %1639 = vmatmul.mubr.bf16.vlgmr.msra.gmra.mrb[0].mxu0 %v1146_v21  ;;  %v1026_v35 = vmax.f32 %v677_v25, 0.0  ;;  %v4813_v25 = vld [vmem:[%s7049_s3 + $0x174] ss:$8 sps:$4 sm:$0xff]  }
 0x121   :  { %v683_v32 = vadd.f32 %v682_v31, %v5609_v47  ;;  %1800 = vmatpush1.bf16.msra.mxu0 %v4790_v24  ;;  %v1027_v39 = vmax.f32 %v679_v28, 0.0 }
 0x122   :  { %v1030_v37 = vmax.f32 %v681_v30, 0.0  ;;  %978 = vmatmul.mubr.bf16.gmra.mrb[112].mxu1 %v5526_v4  ;;  %1801 = vmatprep.subr.bf16.mxu0 %v4795_v27  ;;  %v4811_v30 = vld [vmem:[%s7049_s3 + $0x170] ss:$8 sps:$4 sm:$0xff]  }
 0x123   :  { %v1031_v42 = vmax.f32 %v683_v32, 0.0  ;;  %987 = vmatprep.mubr.bf16.mxu1 %v5531_v5 }
 0x124   :  { %v1150_v43 = vpack.c.bf16 %v1030_v37, %v1026_v35 }
 0x125   :  { %v1151_v44 = vpack.c.bf16 %v1031_v42, %v1027_v39  ;;  %v686_v45 = vpop.f32.mrb[8].mxu1  ;;  %1802 = vmatpush1.bf16.msra.mxu0 %v4793_v33  ;;  %v4816_v33 = vld [vmem:[%s7049_s3 + $0x184] ss:$8 sps:$4 sm:$0xff]  }
 0x126   :  { %v687_v49 = vadd.f32 %v686_v45, %v5605_v46  ;;  %v688_v50 = vpop.f32.mrb[9].mxu1  ;;  %1803 = vmatprep.subr.bf16.mxu0 %v4798_v38 }
 0x127   :  { %v689_v54 = vadd.f32 %v688_v50, %v5609_v47  ;;  %v690_v55 = vpop.f32.mrb[10].mxu1  ;;  %1648 = vmatprep.mubr.bf16.mxu0 %v1151_v44 }
 0x128   :  { %v691_v56 = vadd.f32 %v690_v55, %v5605_v46  ;;  %v692_v57 = vpop.f32.mrb[11].mxu1  ;;  %1649 = vmatmul.mubr.bf16.gmra.mrb[4].mxu0 %v1150_v43  ;;  %v1034_v62 = vmax.f32 %v687_v49, 0.0  ;;  %v4814_v43 = vld [vmem:[%s7049_s3 + $0x180] ss:$8 sps:$4 sm:$0xff]   ;;  %v4817_v55 = vld [vmem:[%s7049_s3 + $0x190] ss:$8 sps:$4 sm:$0xff]  }
 0x129   :  { %v693_v58 = vadd.f32 %v692_v57, %v5609_v47  ;;  %1804 = vmatpush1.bf16.msra.mxu0 %v4796_v48  ;;  %v1035_v1 = vmax.f32 %v689_v54, 0.0 }
 0x12a   :  { %v1038_v63 = vmax.f32 %v691_v56, 0.0  ;;  %988 = vmatmul.mubr.bf16.gmra.mrb[116].mxu1 %v5541_v9  ;;  %1805 = vmatprep.subr.bf16.mxu0 %v4801_v51 }
 0x12b   :  { %v1039_v2 = vmax.f32 %v693_v58, 0.0  ;;  %997 = vmatprep.mubr.bf16.mxu1 %v5546_v10  ;;  %v4822_v58 = vld [vmem:[%s7049_s3 + $0x1a4] ss:$8 sps:$4 sm:$0xff]  }
 0x12c   :  { %v1154_v3 = vpack.c.bf16 %v1038_v63, %v1034_v62 }
 0x12d   :  { %v1155_v4 = vpack.c.bf16 %v1039_v2, %v1035_v1  ;;  %v696_v5 = vpop.f32.mrb[12].mxu1  ;;  %1806 = vmatpush1.bf16.msra.mxu0 %v4799_v60  ;;  %v4820_v2 = vld [vmem:[%s7049_s3 + $0x1a0] ss:$8 sps:$4 sm:$0xff]  }
 0x12e   :  { %v697_v13 = vadd.f32 %v696_v5, %v5605_v46  ;;  %v698_v9 = vpop.f32.mrb[13].mxu1  ;;  %1807 = vmatprep.subr.bf16.mxu0 %v4804_v0  ;;  %v4825_v5 = vld [vmem:[%s7049_s3 + $0x1b4] ss:$8 sps:$4 sm:$0xff]  }
 0x12f   :  { %v699_v53 = vadd.f32 %v698_v9, %v5609_v47  ;;  %v700_v59 = vpop.f32.mrb[14].mxu1  ;;  %1658 = vmatprep.mubr.bf16.mxu0 %v1155_v4 }
 0x130   :  { %v701_v10 = vadd.f32 %v700_v59, %v5605_v46  ;;  %v702_v61 = vpop.f32.mrb[15].mxu1  ;;  %1659 = vmatmul.mubr.bf16.gmra.mrb[8].mxu0 %v1154_v3  ;;  %v1042_v15 = vmax.f32 %v697_v13, 0.0  ;;  %v4823_v59 = vld [vmem:[%s7049_s3 + $0x1b0] ss:$8 sps:$4 sm:$0xff]  }
 0x131   :  { %v703_v6 = vadd.f32 %v702_v61, %v5609_v47  ;;  %1808 = vmatpush1.bf16.msra.mxu0 %v4802_v8  ;;  %v1043_v18 = vmax.f32 %v699_v53, 0.0 }
 0x132   :  { %v1046_v16 = vmax.f32 %v701_v10, 0.0  ;;  %998 = vmatmul.mubr.bf16.gmra.mrb[120].mxu1 %v5553_v11  ;;  %1809 = vmatprep.subr.bf16.mxu0 %v4807_v52 }
 0x133   :  { %v1047_v19 = vmax.f32 %v703_v6, 0.0  ;;  %1007 = vmatprep.mubr.bf16.mxu1 %v5558_v12  ;;  %v4828_v6 = vld [vmem:[%s7049_s3 + $0x1c4] ss:$8 sps:$4 sm:$0xff]  }
 0x134   :  { %v1158_v20 = vpack.c.bf16 %v1046_v16, %v1042_v15 }
 0x135   :  { %v1159_v21 = vpack.c.bf16 %v1047_v19, %v1043_v18  ;;  %v706_v22 = vpop.f32.mrb[16].mxu1  ;;  %1810 = vmatpush1.bf16.msra.mxu0 %v4805_v7  ;;  %v4826_v19 = vld [vmem:[%s7049_s3 + $0x1c0] ss:$8 sps:$4 sm:$0xff]  }
 0x136   :  { %v707_v24 = vadd.f32 %v706_v22, %v5605_v46  ;;  %v708_v11 = vpop.f32.mrb[17].mxu1  ;;  %1811 = vmatprep.subr.bf16.mxu0 %v4810_v17  ;;  %v4831_v22 = vld [vmem:[%s7049_s3 + $0x1d4] ss:$8 sps:$4 sm:$0xff]  }
 0x137   :  { %v709_v26 = vadd.f32 %v708_v11, %v5609_v47  ;;  %v710_v27 = vpop.f32.mrb[18].mxu1  ;;  %1668 = vmatprep.mubr.bf16.mxu0 %v1159_v21 }
 0x138   :  { %v711_v12 = vadd.f32 %v710_v27, %v5605_v46  ;;  %v712_v28 = vpop.f32.mrb[19].mxu1  ;;  %1669 = vmatmul.mubr.bf16.gmra.mrb[12].mxu0 %v1158_v20  ;;  %v1050_v31 = vmax.f32 %v707_v24, 0.0  ;;  %v4829_v27 = vld [vmem:[%s7049_s3 + $0x1d0] ss:$8 sps:$4 sm:$0xff]  }
 0x139   :  { %v713_v29 = vadd.f32 %v712_v28, %v5609_v47  ;;  %1812 = vmatpush1.bf16.msra.mxu0 %v4808_v23  ;;  %v1051_v35 = vmax.f32 %v709_v26, 0.0 }
 0x13a   :  { %v1054_v32 = vmax.f32 %v711_v12, 0.0  ;;  %1008 = vmatmul.mubr.bf16.gmra.mrb[124].mxu1 %v5565_v14  ;;  %1813 = vmatprep.subr.bf16.mxu0 %v4813_v25  ;;  %v4819_v14 = vld [vmem:[%s7049_s3 + $0x194] ss:$8 sps:$4 sm:$0xff]  }
 0x13b   :  { %v1055_v37 = vmax.f32 %v713_v29, 0.0  ;;  %v4834_v29 = vld [vmem:[%s7049_s3 + $0x1e4] ss:$8 sps:$4 sm:$0xff]  }
 0x13c   :  { %v1162_v38 = vpack.c.bf16 %v1054_v32, %v1050_v31 }
 0x13d   :  { %v1163_v39 = vpack.c.bf16 %v1055_v37, %v1051_v35  ;;  %v716_v42 = vpop.f32.mrb[20].mxu1  ;;  %1814 = vmatpush1.bf16.msra.mxu0 %v4811_v30  ;;  %v4832_v37 = vld [vmem:[%s7049_s3 + $0x1e0] ss:$8 sps:$4 sm:$0xff]  }
 0x13e   :  { %v717_v44 = vadd.f32 %v716_v42, %v5605_v46  ;;  %v718_v45 = vpop.f32.mrb[21].mxu1  ;;  %1815 = vmatprep.subr.bf16.mxu0 %v4816_v33  ;;  %v4837_v42 = vld [vmem:[%s7049_s3 + $0x1f4] ss:$8 sps:$4 sm:$0xff]  }
 0x13f   :  { %v719_v48 = vadd.f32 %v718_v45, %v5609_v47  ;;  %v720_v49 = vpop.f32.mrb[22].mxu1  ;;  %1678 = vmatprep.mubr.bf16.mxu0 %v1163_v39 }
 0x140   :  { %v721_v50 = vadd.f32 %v720_v49, %v5605_v46  ;;  %v722_v51 = vpop.f32.mrb[23].mxu1  ;;  %1679 = vmatmul.mubr.bf16.gmra.mrb[16].mxu0 %v1162_v38  ;;  %v1058_v56 = vmax.f32 %v717_v44, 0.0  ;;  %v4835_v49 = vld [vmem:[%s7049_s3 + $0x1f0] ss:$8 sps:$4 sm:$0xff]  }
 0x141   :  { %v723_v54 = vadd.f32 %v722_v51, %v5609_v47  ;;  %1816 = vmatpush1.bf16.msra.mxu0 %v4814_v43  ;;  %v1059_v60 = vmax.f32 %v719_v48, 0.0 }
 0x142   :  { %v1062_v57 = vmax.f32 %v721_v50, 0.0  ;;  %1817 = vmatprep.subr.bf16.mxu0 %v4819_v14 }
 0x143   :  { %v1063_v62 = vmax.f32 %v723_v54, 0.0 }
 0x144   :  { %v1166_v63 = vpack.c.bf16 %v1062_v57, %v1058_v56 }
 0x145   :  { %v1167_v0 = vpack.c.bf16 %v1063_v62, %v1059_v60  ;;  %v726_v1 = vpop.f32.mrb[24].mxu1  ;;  %1818 = vmatpush1.bf16.msra.mxu0 %v4817_v55 }
 0x146   :  { %v727_v3 = vadd.f32 %v726_v1, %v5605_v46  ;;  %v728_v4 = vpop.f32.mrb[25].mxu1  ;;  %1819 = vmatprep.subr.bf16.mxu0 %v4822_v58 }
 0x147   :  { %v729_v8 = vadd.f32 %v728_v4, %v5609_v47  ;;  %v730_v13 = vpop.f32.mrb[26].mxu1  ;;  %1688 = vmatprep.mubr.bf16.mxu0 %v1167_v0 }
 0x148   :  { %v731_v9 = vadd.f32 %v730_v13, %v5605_v46  ;;  %v732_v52 = vpop.f32.mrb[27].mxu1  ;;  %1689 = vmatmul.mubr.bf16.gmra.mrb[20].mxu0 %v1166_v63  ;;  %v1066_v10 = vmax.f32 %v727_v3, 0.0 }
 0x149   :  { %v733_v53 = vadd.f32 %v732_v52, %v5609_v47  ;;  %1820 = vmatpush1.bf16.msra.mxu0 %v4820_v2  ;;  %v1067_v7 = vmax.f32 %v729_v8, 0.0 }
 0x14a   :  { %v1070_v61 = vmax.f32 %v731_v9, 0.0  ;;  %1821 = vmatprep.subr.bf16.mxu0 %v4825_v5 }
 0x14b   :  { %v1071_v15 = vmax.f32 %v733_v53, 0.0 }
 0x14c   :  { %v1170_v16 = vpack.c.bf16 %v1070_v61, %v1066_v10 }
 0x14d   :  { %v1171_v17 = vpack.c.bf16 %v1071_v15, %v1067_v7  ;;  %v736_v18 = vpop.f32.mrb[28].mxu1  ;;  %1822 = vmatpush1.bf16.msra.mxu0 %v4823_v59 }
 0x14e   :  { %v737_v20 = vadd.f32 %v736_v18, %v5605_v46  ;;  %v738_v21 = vpop.f32.mrb[29].mxu1  ;;  %1823 = vmatprep.subr.bf16.mxu0 %v4828_v6 }
 0x14f   :  { %v739_v23 = vadd.f32 %v738_v21, %v5609_v47  ;;  %v740_v24 = vpop.f32.mrb[30].mxu1  ;;  %1698 = vmatprep.mubr.bf16.mxu0 %v1171_v17 }
 0x150   :  { %v741_v11 = vadd.f32 %v740_v24, %v5605_v46  ;;  %v742_v25 = vpop.f32.mrb[31].mxu1  ;;  %1699 = vmatmul.mubr.bf16.gmra.mrb[24].mxu0 %v1170_v16  ;;  %v1074_v12 = vmax.f32 %v737_v20, 0.0 }
 0x151   :  { %v743_v26 = vadd.f32 %v742_v25, %v5609_v47  ;;  %1824 = vmatpush1.bf16.msra.mxu0 %v4826_v19  ;;  %v1075_v30 = vmax.f32 %v739_v23, 0.0 }
 0x152   :  { %v1078_v28 = vmax.f32 %v741_v11, 0.0  ;;  %1825 = vmatprep.subr.bf16.mxu0 %v4831_v22 }
 0x153   :  { %v1079_v31 = vmax.f32 %v743_v26, 0.0 }
 0x154   :  { %v1174_v32 = vpack.c.bf16 %v1078_v28, %v1074_v12 }
 0x155   :  { %v1175_v33 = vpack.c.bf16 %v1079_v31, %v1075_v30  ;;  %v746_v35 = vpop.f32.mrb[32].mxu1  ;;  %1826 = vmatpush1.bf16.msra.mxu0 %v4829_v27 }
 0x156   :  { %v747_v38 = vadd.f32 %v746_v35, %v5605_v46  ;;  %v748_v39 = vpop.f32.mrb[33].mxu1  ;;  %1827 = vmatprep.subr.bf16.mxu0 %v4834_v29 }
 0x157   :  { %v749_v43 = vadd.f32 %v748_v39, %v5609_v47  ;;  %v750_v44 = vpop.f32.mrb[34].mxu1  ;;  %1708 = vmatprep.mubr.bf16.mxu0 %v1175_v33 }
 0x158   :  { %v751_v45 = vadd.f32 %v750_v44, %v5605_v46  ;;  %v752_v14 = vpop.f32.mrb[35].mxu1  ;;  %1709 = vmatmul.mubr.bf16.gmra.mrb[28].mxu0 %v1174_v32  ;;  %v1082_v50 = vmax.f32 %v747_v38, 0.0 }
 0x159   :  { %v753_v48 = vadd.f32 %v752_v14, %v5609_v47  ;;  %1828 = vmatpush1.bf16.msra.mxu0 %v4832_v37  ;;  %v1083_v54 = vmax.f32 %v749_v43, 0.0 }
 0x15a   :  { %v1086_v51 = vmax.f32 %v751_v45, 0.0  ;;  %1829 = vmatprep.subr.bf16.mxu0 %v4837_v42 }
 0x15b   :  { %v1087_v55 = vmax.f32 %v753_v48, 0.0 }
 0x15c   :  { %v1178_v56 = vpack.c.bf16 %v1086_v51, %v1082_v50 }
 0x15d   :  { %v1179_v57 = vpack.c.bf16 %v1087_v55, %v1083_v54  ;;  %v756_v58 = vpop.f32.mrb[36].mxu1  ;;  %1830 = vmatpush1.bf16.msra.mxu0 %v4835_v49 }
 0x15e   :  { %v757_v60 = vadd.f32 %v756_v58, %v5605_v46  ;;  %v758_v62 = vpop.f32.mrb[37].mxu1 }
 0x15f   :  { %v759_v63 = vadd.f32 %v758_v62, %v5609_v47  ;;  %v760_v0 = vpop.f32.mrb[38].mxu1  ;;  %1718 = vmatprep.mubr.bf16.mxu0 %v1179_v57 }
 0x160   :  { %v761_v1 = vadd.f32 %v760_v0, %v5605_v46  ;;  %v762_v2 = vpop.f32.mrb[39].mxu1  ;;  %1719 = vmatmul.mubr.bf16.gmra.mrb[32].mxu0 %v1178_v56  ;;  %v1090_v4 = vmax.f32 %v757_v60, 0.0 }
 0x161   :  { %v763_v3 = vadd.f32 %v762_v2, %v5609_v47  ;;  %v1091_v8 = vmax.f32 %v759_v63, 0.0 }
 0x162   :  { %v1094_v5 = vmax.f32 %v761_v1, 0.0 }
 0x163   :  { %v1095_v13 = vmax.f32 %v763_v3, 0.0 }
 0x164   :  { %v1182_v9 = vpack.c.bf16 %v1094_v5, %v1090_v4  ;;  %v4838_v4 = vld [vmem:[%s7051_s5] ss:$16 sps:$4 sm:$0xff]  }
 0x165   :  { %v1183_v52 = vpack.c.bf16 %v1095_v13, %v1091_v8  ;;  %v766_v53 = vpop.f32.mrb[40].mxu1  ;;  %v4840_v13 = vld [vmem:[%s7051_s5 + $0x4] ss:$16 sps:$4 sm:$0xff]  }
 0x166   :  { %v767_v59 = vadd.f32 %v766_v53, %v5605_v46  ;;  %v768_v10 = vpop.f32.mrb[41].mxu1  ;;  %2558 = vmatprep.subr.bf16.mxu1 %v4840_v13 }
 0x167   :  { %v769_v61 = vadd.f32 %v768_v10, %v5609_v47  ;;  %v770_v6 = vpop.f32.mrb[42].mxu1  ;;  %1728 = vmatprep.mubr.bf16.mxu0 %v1183_v52  ;;  %2559 = vmatpush1.bf16.msra.mxu1 %v4838_v4 }
 0x168   :  { %v771_v7 = vadd.f32 %v770_v6, %v5605_v46  ;;  %v772_v15 = vpop.f32.mrb[43].mxu1  ;;  %1729 = vmatmul.mubr.bf16.gmra.mrb[36].mxu0 %v1182_v9  ;;  %v1098_v17 = vmax.f32 %v767_v59, 0.0 }
 0x169   :  { %v773_v16 = vadd.f32 %v772_v15, %v5609_v47  ;;  %v1099_v19 = vmax.f32 %v769_v61, 0.0 }
 0x16a   :  { %v1102_v18 = vmax.f32 %v771_v7, 0.0 }
 0x16b   :  { %v1103_v20 = vmax.f32 %v773_v16, 0.0 }
 0x16c   :  { %v1186_v21 = vpack.c.bf16 %v1102_v18, %v1098_v17  ;;  %v4841_v17 = vld [vmem:[%s7051_s5 + $0x20] ss:$16 sps:$4 sm:$0xff]   ;;  %v4843_v18 = vld [vmem:[%s7051_s5 + $0x24] ss:$16 sps:$4 sm:$0xff]  }
 0x16d   :  { %v1187_v22 = vpack.c.bf16 %v1103_v20, %v1099_v19  ;;  %v776_v23 = vpop.f32.mrb[44].mxu1  ;;  %2560 = vmatprep.subr.bf16.mxu1 %v4843_v18 }
 0x16e   :  { %v777_v24 = vadd.f32 %v776_v23, %v5605_v46  ;;  %v778_v11 = vpop.f32.mrb[45].mxu1  ;;  %2561 = vmatpush1.bf16.msra.mxu1 %v4841_v17 }
 0x16f   :  { %v779_v25 = vadd.f32 %v778_v11, %v5609_v47  ;;  %v780_v26 = vpop.f32.mrb[46].mxu1  ;;  %1738 = vmatprep.mubr.bf16.mxu0 %v1187_v22 }
 0x170   :  { %v781_v27 = vadd.f32 %v780_v26, %v5605_v46  ;;  %v782_v12 = vpop.f32.mrb[47].mxu1  ;;  %1739 = vmatmul.mubr.bf16.gmra.mrb[40].mxu0 %v1186_v21  ;;  %v1106_v29 = vmax.f32 %v777_v24, 0.0 }
 0x171   :  { %v783_v28 = vadd.f32 %v782_v12, %v5609_v47  ;;  %v1107_v31 = vmax.f32 %v779_v25, 0.0 }
 0x172   :  { %v1110_v30 = vmax.f32 %v781_v27, 0.0  ;;  %v142_v27 = vsub.s32 2, %v5588_v34 }
 0x173   :  { %v1111_v32 = vmax.f32 %v783_v28, 0.0 }
 0x174   :  { %v1190_v33 = vpack.c.bf16 %v1110_v30, %v1106_v29  ;;  %v146_v29 = vsub.s32 3, %v5588_v34 }
 0x175   :  { %v1191_v35 = vpack.c.bf16 %v1111_v32, %v1107_v31  ;;  %v786_v37 = vpop.f32.mrb[48].mxu1 }
 0x176   :  { %v787_v38 = vadd.f32 %v786_v37, %v5605_v46  ;;  %v788_v39 = vpop.f32.mrb[49].mxu1 }
 0x177   :  { %v789_v42 = vadd.f32 %v788_v39, %v5609_v47  ;;  %v790_v43 = vpop.f32.mrb[50].mxu1  ;;  %1748 = vmatprep.mubr.bf16.mxu0 %v1191_v35  ;;  %v4846_v35 = vld [vmem:[%s7051_s5 + $0x44] ss:$16 sps:$4 sm:$0xff]   ;;  %v5801_v39 = vrot.slane %v5597_v40, %v142_v27 }
 0x178   :  { %v791_v44 = vadd.f32 %v790_v43, %v5605_v46  ;;  %v792_v45 = vpop.f32.mrb[51].mxu1  ;;  %1749 = vmatmul.mubr.bf16.gmra.mrb[44].mxu0 %v1190_v33  ;;  %v1114_v48 = vmax.f32 %v787_v38, 0.0  ;;  %v4844_v33 = vld [vmem:[%s7051_s5 + $0x40] ss:$16 sps:$4 sm:$0xff]   ;;  %2562 = vmatprep.subr.bf16.mxu1 %v4846_v35 }
 0x179   :  { %v793_v14 = vadd.f32 %v792_v45, %v5609_v47  ;;  %v1115_v50 = vmax.f32 %v789_v42, 0.0  ;;  %2563 = vmatpush1.bf16.msra.mxu1 %v4844_v33 }
 0x17a   :  { %v1118_v49 = vmax.f32 %v791_v44, 0.0 }
 0x17b   :  { %v1119_v51 = vmax.f32 %v793_v14, 0.0  ;;  %v4847_v14 = vld [vmem:[%s7051_s5 + $0x60] ss:$16 sps:$4 sm:$0xff]  }
 0x17c   :  { %v1194_v54 = vpack.c.bf16 %v1118_v49, %v1114_v48  ;;  %v4849_v48 = vld [vmem:[%s7051_s5 + $0x64] ss:$16 sps:$4 sm:$0xff]  }
 0x17d   :  { %v1195_v55 = vpack.c.bf16 %v1119_v51, %v1115_v50  ;;  %v796_v56 = vpop.f32.mrb[52].mxu1  ;;  %2564 = vmatprep.subr.bf16.mxu1 %v4849_v48 }
 0x17e   :  { %v797_v57 = vadd.f32 %v796_v56, %v5605_v46  ;;  %v798_v58 = vpop.f32.mrb[53].mxu1  ;;  %2565 = vmatpush1.bf16.msra.mxu1 %v4847_v14  ;;  %v4850_v56 = vld [vmem:[%s7051_s5 + $0x80] ss:$16 sps:$4 sm:$0xff]  }
 0x17f   :  { %v799_v60 = vadd.f32 %v798_v58, %v5609_v47  ;;  %v800_v62 = vpop.f32.mrb[54].mxu1  ;;  %1758 = vmatprep.mubr.bf16.mxu0 %v1195_v55 }
 0x180   :  { %v801_v63 = vadd.f32 %v800_v62, %v5605_v46  ;;  %v802_v0 = vpop.f32.mrb[55].mxu1  ;;  %1759 = vmatmul.mubr.bf16.gmra.mrb[48].mxu0 %v1194_v54  ;;  %v1122_v2 = vmax.f32 %v797_v57, 0.0  ;;  %v4852_v57 = vld [vmem:[%s7051_s5 + $0x84] ss:$16 sps:$4 sm:$0xff]  }
 0x181   :  { %v803_v1 = vadd.f32 %v802_v0, %v5609_v47  ;;  %v1123_v5 = vmax.f32 %v799_v60, 0.0  ;;  %v4855_v60 = vld [vmem:[%s7051_s5 + $0xa4] ss:$16 sps:$4 sm:$0xff]   ;;  %2566 = vmatprep.subr.bf16.mxu1 %v4852_v57 }
 0x182   :  { %v1126_v3 = vmax.f32 %v801_v63, 0.0  ;;  %2567 = vmatpush1.bf16.msra.mxu1 %v4850_v56  ;;  %v4873_v56 = vld [vmem:[%s7051_s5 + $0x164] ss:$16 sps:$4 sm:$0xff]  }
 0x183   :  { %v1127_v8 = vmax.f32 %v803_v1, 0.0  ;;  %2568 = vmatprep.subr.bf16.mxu1 %v4855_v60 }
 0x184   :  { %v1198_v9 = vpack.c.bf16 %v1126_v3, %v1122_v2  ;;  %v4853_v3 = vld [vmem:[%s7051_s5 + $0xa0] ss:$16 sps:$4 sm:$0xff]  }
 0x185   :  { %v1199_v52 = vpack.c.bf16 %v1127_v8, %v1123_v5  ;;  %v806_v53 = vpop.f32.mrb[56].mxu1  ;;  %v4858_v8 = vld [vmem:[%s7051_s5 + $0xc4] ss:$16 sps:$4 sm:$0xff]  }
 0x186   :  { %v807_v59 = vadd.f32 %v806_v53, %v5605_v46  ;;  %v808_v10 = vpop.f32.mrb[57].mxu1  ;;  %2569 = vmatpush1.bf16.msra.mxu1 %v4853_v3  ;;  %v4876_v3 = vld [vmem:[%s7051_s5 + $0x184] ss:$16 sps:$4 sm:$0xff]  }
 0x187   :  { %v809_v61 = vadd.f32 %v808_v10, %v5609_v47  ;;  %v810_v6 = vpop.f32.mrb[58].mxu1  ;;  %1768 = vmatprep.mubr.bf16.mxu0 %v1199_v52  ;;  %2570 = vmatprep.subr.bf16.mxu1 %v4858_v8 }
 0x188   :  { %v811_v7 = vadd.f32 %v810_v6, %v5605_v46  ;;  %v812_v15 = vpop.f32.mrb[59].mxu1  ;;  %1769 = vmatmul.mubr.bf16.gmra.mrb[52].mxu0 %v1198_v9  ;;  %v1130_v19 = vmax.f32 %v807_v59, 0.0 }
 0x189   :  { %v813_v16 = vadd.f32 %v812_v15, %v5609_v47  ;;  %v1131_v21 = vmax.f32 %v809_v61, 0.0  ;;  %v4856_v61 = vld [vmem:[%s7051_s5 + $0xc0] ss:$16 sps:$4 sm:$0xff]  }
 0x18a   :  { %v1134_v20 = vmax.f32 %v811_v7, 0.0  ;;  %v4861_v7 = vld [vmem:[%s7051_s5 + $0xe4] ss:$16 sps:$4 sm:$0xff]   ;;  %2571 = vmatpush1.bf16.msra.mxu1 %v4856_v61 }
 0x18b   :  { %v1135_v22 = vmax.f32 %v813_v16, 0.0  ;;  %2572 = vmatprep.subr.bf16.mxu1 %v4861_v7 }
 0x18c   :  { %v1202_v23 = vpack.c.bf16 %v1134_v20, %v1130_v19  ;;  %v4859_v20 = vld [vmem:[%s7051_s5 + $0xe0] ss:$16 sps:$4 sm:$0xff]  }
 0x18d   :  { %v1203_v24 = vpack.c.bf16 %v1135_v22, %v1131_v21  ;;  %v816_v11 = vpop.f32.mrb[60].mxu1 }
 0x18e   :  { %v817_v25 = vadd.f32 %v816_v11, %v5605_v46  ;;  %v818_v26 = vpop.f32.mrb[61].mxu1  ;;  %2573 = vmatpush1.bf16.msra.mxu1 %v4859_v20  ;;  %v4882_v20 = vld [vmem:[%s7051_s5 + $0x1c4] ss:$16 sps:$4 sm:$0xff]  }
 0x18f   :  { %v819_v12 = vadd.f32 %v818_v26, %v5609_v47  ;;  %v820_v28 = vpop.f32.mrb[62].mxu1  ;;  %1778 = vmatprep.mubr.bf16.mxu0 %v1203_v24 }
 0x190   :  { %v821_v30 = vadd.f32 %v820_v28, %v5605_v46  ;;  %v822_v31 = vpop.f32.mrb[63].mxu1  ;;  %1779 = vmatmul.mubr.bf16.gmra.mrb[56].mxu0 %v1202_v23  ;;  %v1138_v37 = vmax.f32 %v817_v25, 0.0  ;;  %v4864_v23 = vld [vmem:[%s7051_s5 + $0x104] ss:$16 sps:$4 sm:$0xff]  }
 0x191   :  { %v823_v32 = vadd.f32 %v822_v31, %v5609_v47  ;;  %v1139_v46 = vmax.f32 %v819_v12, 0.0  ;;  %v5806_v47 = vrot.slane %v5597_v40, %v146_v29  ;;  %2574 = vmatprep.subr.bf16.mxu1 %v4864_v23 }
 0x192   :  { %v1142_v38 = vmax.f32 %v821_v30, 0.0  ;;  %v4862_v30 = vld [vmem:[%s7051_s5 + $0x100] ss:$16 sps:$4 sm:$0xff]  }
 0x193   :  { %v1143_v42 = vmax.f32 %v823_v32, 0.0  ;;  %v4867_v32 = vld [vmem:[%s7051_s5 + $0x124] ss:$16 sps:$4 sm:$0xff]   ;;  %2575 = vmatpush1.bf16.msra.mxu1 %v4862_v30 }
 0x194   :  { %v1206_v43 = vpack.c.bf16 %v1142_v38, %v1138_v37  ;;  %2576 = vmatprep.subr.bf16.mxu1 %v4867_v32 }
 0x195   :  { %v1207_v44 = vpack.c.bf16 %v1143_v42, %v1139_v46  ;;  %v859_v45 = vpop.f32.mrb[64].mxu1  ;;  %v4865_v42 = vld [vmem:[%s7051_s5 + $0x120] ss:$16 sps:$4 sm:$0xff]  }
 0x196   :  { %v860_v49 = vadd.f32 %v859_v45, %v5801_v39  ;;  %v861_v50 = vpop.f32.mrb[65].mxu1  ;;  %v4870_v45 = vld [vmem:[%s7051_s5 + $0x144] ss:$16 sps:$4 sm:$0xff]  }
 0x197   :  { %v862_v51 = vadd.f32 %v861_v50, %v5806_v47  ;;  %v863_v40 = vpop.f32.mrb[66].mxu1  ;;  %1788 = vmatprep.mubr.bf16.mxu0 %v1207_v44  ;;  %2577 = vmatpush1.bf16.msra.mxu1 %v4865_v42 }
 0x198   :  { %v864_v54 = vadd.f32 %v863_v40, %v5801_v39  ;;  %v865_v55 = vpop.f32.mrb[67].mxu1  ;;  %1789 = vmatmul.mubr.bf16.gmra.mrb[60].mxu0 %v1206_v43  ;;  %v1020_v62 = vmax.f32 %v860_v49, 0.0  ;;  %2578 = vmatprep.subr.bf16.mxu1 %v4870_v45 }
 0x199   :  { %v866_v58 = vadd.f32 %v865_v55, %v5806_v47  ;;  %v1021_v0 = vmax.f32 %v862_v51, 0.0 }
 0x19a   :  { %v1024_v63 = vmax.f32 %v864_v54, 0.0  ;;  %v4868_v54 = vld [vmem:[%s7051_s5 + $0x140] ss:$16 sps:$4 sm:$0xff]  }
 0x19b   :  { %v1025_v1 = vmax.f32 %v866_v58, 0.0  ;;  %2579 = vmatpush1.bf16.msra.mxu1 %v4868_v54 }
 0x19c   :  { %v1148_v2 = vpack.c.bf16 %v1024_v63, %v1020_v62  ;;  %2580 = vmatprep.subr.bf16.mxu1 %v4873_v56 }
 0x19d   :  { %v1149_v4 = vpack.c.bf16 %v1025_v1, %v1021_v0  ;;  %v869_v5 = vpop.f32.mrb[68].mxu1  ;;  %v4871_v0 = vld [vmem:[%s7051_s5 + $0x160] ss:$16 sps:$4 sm:$0xff]  }
 0x19e   :  { %v870_v13 = vadd.f32 %v869_v5, %v5801_v39  ;;  %v871_v9 = vpop.f32.mrb[69].mxu1 }
 0x19f   :  { %v872_v52 = vadd.f32 %v871_v9, %v5806_v47  ;;  %v873_v53 = vpop.f32.mrb[70].mxu1  ;;  %1831 = vmatprep.mubr.bf16.mxu0 %v1149_v4  ;;  %2581 = vmatpush1.bf16.msra.mxu1 %v4871_v0 }
 0x1a0   :  { %v874_v59 = vadd.f32 %v873_v53, %v5801_v39  ;;  %v875_v10 = vpop.f32.mrb[71].mxu1  ;;  %1832 = vmatmul.mubr.bf16.vlgmr.msra.gmra.mrb[0].mxu0 %v1148_v2  ;;  %v1028_v15 = vmax.f32 %v870_v13, 0.0  ;;  %v4874_v53 = vld [vmem:[%s7051_s5 + $0x180] ss:$16 sps:$4 sm:$0xff]   ;;  %2582 = vmatprep.subr.bf16.mxu1 %v4876_v3 }
 0x1a1   :  { %v876_v6 = vadd.f32 %v875_v10, %v5806_v47  ;;  %v1029_v17 = vmax.f32 %v872_v52, 0.0  ;;  %v4879_v10 = vld [vmem:[%s7051_s5 + $0x1a4] ss:$16 sps:$4 sm:$0xff]  }
 0x1a2   :  { %v1032_v16 = vmax.f32 %v874_v59, 0.0 }
 0x1a3   :  { %v1033_v18 = vmax.f32 %v876_v6, 0.0  ;;  %2583 = vmatpush1.bf16.msra.mxu1 %v4874_v53 }
 0x1a4   :  { %v1152_v19 = vpack.c.bf16 %v1032_v16, %v1028_v15  ;;  %2584 = vmatprep.subr.bf16.mxu1 %v4879_v10 }
 0x1a5   :  { %v1153_v21 = vpack.c.bf16 %v1033_v18, %v1029_v17  ;;  %v879_v22 = vpop.f32.mrb[72].mxu1  ;;  %v4877_v17 = vld [vmem:[%s7051_s5 + $0x1a0] ss:$16 sps:$4 sm:$0xff]  }
 0x1a6   :  { %v880_v24 = vadd.f32 %v879_v22, %v5801_v39  ;;  %v881_v11 = vpop.f32.mrb[73].mxu1 }
 0x1a7   :  { %v882_v25 = vadd.f32 %v881_v11, %v5806_v47  ;;  %v883_v26 = vpop.f32.mrb[74].mxu1  ;;  %1841 = vmatprep.mubr.bf16.mxu0 %v1153_v21  ;;  %2585 = vmatpush1.bf16.msra.mxu1 %v4877_v17 }
 0x1a8   :  { %v884_v12 = vadd.f32 %v883_v26, %v5801_v39  ;;  %v885_v28 = vpop.f32.mrb[75].mxu1  ;;  %1842 = vmatmul.mubr.bf16.gmra.mrb[4].mxu0 %v1152_v19  ;;  %v1036_v33 = vmax.f32 %v880_v24, 0.0  ;;  %v4880_v26 = vld [vmem:[%s7051_s5 + $0x1c0] ss:$16 sps:$4 sm:$0xff]   ;;  %2586 = vmatprep.subr.bf16.mxu1 %v4882_v20 }
 0x1a9   :  { %v886_v31 = vadd.f32 %v885_v28, %v5806_v47  ;;  %v1037_v37 = vmax.f32 %v882_v25, 0.0 }
 0x1aa   :  { %v1040_v35 = vmax.f32 %v884_v12, 0.0 }
 0x1ab   :  { %v1041_v38 = vmax.f32 %v886_v31, 0.0  ;;  %2587 = vmatpush1.bf16.msra.mxu1 %v4880_v26 }
 0x1ac   :  { %v1156_v46 = vpack.c.bf16 %v1040_v35, %v1036_v33 }
 0x1ad   :  { %v1157_v43 = vpack.c.bf16 %v1041_v38, %v1037_v37  ;;  %v889_v44 = vpop.f32.mrb[76].mxu1 }
 0x1ae   :  { %v890_v14 = vadd.f32 %v889_v44, %v5801_v39  ;;  %v891_v48 = vpop.f32.mrb[77].mxu1 }
 0x1af   :  { %v892_v49 = vadd.f32 %v891_v48, %v5806_v47  ;;  %v893_v50 = vpop.f32.mrb[78].mxu1  ;;  %1851 = vmatprep.mubr.bf16.mxu0 %v1157_v43 }
 0x1b0   :  { %v894_v51 = vadd.f32 %v893_v50, %v5801_v39  ;;  %v895_v40 = vpop.f32.mrb[79].mxu1  ;;  %1852 = vmatmul.mubr.bf16.gmra.mrb[8].mxu0 %v1156_v46  ;;  %v1044_v57 = vmax.f32 %v890_v14, 0.0 }
 0x1b1   :  { %v896_v55 = vadd.f32 %v895_v40, %v5806_v47  ;;  %v1045_v60 = vmax.f32 %v892_v49, 0.0 }
 0x1b2   :  { %v1048_v58 = vmax.f32 %v894_v51, 0.0 }
 0x1b3   :  { %v1049_v62 = vmax.f32 %v896_v55, 0.0 }
 0x1b4   :  { %v1160_v63 = vpack.c.bf16 %v1048_v58, %v1044_v57 }
 0x1b5   :  { %v1161_v1 = vpack.c.bf16 %v1049_v62, %v1045_v60  ;;  %v899_v2 = vpop.f32.mrb[80].mxu1 }
 0x1b6   :  { %v900_v4 = vadd.f32 %v899_v2, %v5801_v39  ;;  %v901_v5 = vpop.f32.mrb[81].mxu1 }
 0x1b7   :  { %v902_v8 = vadd.f32 %v901_v5, %v5806_v47  ;;  %v903_v13 = vpop.f32.mrb[82].mxu1  ;;  %1861 = vmatprep.mubr.bf16.mxu0 %v1161_v1 }
 0x1b8   :  { %v904_v9 = vadd.f32 %v903_v13, %v5801_v39  ;;  %v905_v52 = vpop.f32.mrb[83].mxu1  ;;  %1862 = vmatmul.mubr.bf16.gmra.mrb[12].mxu0 %v1160_v63  ;;  %v1052_v61 = vmax.f32 %v900_v4, 0.0 }
 0x1b9   :  { %v906_v59 = vadd.f32 %v905_v52, %v5806_v47  ;;  %v1053_v7 = vmax.f32 %v902_v8, 0.0 }
 0x1ba   :  { %v1056_v6 = vmax.f32 %v904_v9, 0.0 }
 0x1bb   :  { %v1057_v15 = vmax.f32 %v906_v59, 0.0 }
 0x1bc   :  { %v1164_v16 = vpack.c.bf16 %v1056_v6, %v1052_v61 }
 0x1bd   :  { %v1165_v18 = vpack.c.bf16 %v1057_v15, %v1053_v7  ;;  %v909_v19 = vpop.f32.mrb[84].mxu1 }
 0x1be   :  { %v910_v21 = vadd.f32 %v909_v19, %v5801_v39  ;;  %v911_v22 = vpop.f32.mrb[85].mxu1 }
 0x1bf   :  { %v912_v23 = vadd.f32 %v911_v22, %v5806_v47  ;;  %v913_v24 = vpop.f32.mrb[86].mxu1  ;;  %1871 = vmatprep.mubr.bf16.mxu0 %v1165_v18 }
 0x1c0   :  { %v914_v11 = vadd.f32 %v913_v24, %v5801_v39  ;;  %v915_v25 = vpop.f32.mrb[87].mxu1  ;;  %1872 = vmatmul.mubr.bf16.gmra.mrb[16].mxu0 %v1164_v16  ;;  %v1060_v28 = vmax.f32 %v910_v21, 0.0 }
 0x1c1   :  { %v916_v12 = vadd.f32 %v915_v25, %v5806_v47  ;;  %v1061_v31 = vmax.f32 %v912_v23, 0.0 }
 0x1c2   :  { %v1064_v30 = vmax.f32 %v914_v11, 0.0 }
 0x1c3   :  { %v1065_v32 = vmax.f32 %v916_v12, 0.0 }
 0x1c4   :  { %v1168_v33 = vpack.c.bf16 %v1064_v30, %v1060_v28 }
 0x1c5   :  { %v1169_v35 = vpack.c.bf16 %v1065_v32, %v1061_v31  ;;  %v919_v37 = vpop.f32.mrb[88].mxu1 }
 0x1c6   :  { %v920_v38 = vadd.f32 %v919_v37, %v5801_v39  ;;  %v921_v46 = vpop.f32.mrb[89].mxu1 }
 0x1c7   :  { %v922_v42 = vadd.f32 %v921_v46, %v5806_v47  ;;  %v923_v43 = vpop.f32.mrb[90].mxu1  ;;  %1881 = vmatprep.mubr.bf16.mxu0 %v1169_v35 }
 0x1c8   :  { %v924_v44 = vadd.f32 %v923_v43, %v5801_v39  ;;  %v925_v45 = vpop.f32.mrb[91].mxu1  ;;  %1882 = vmatmul.mubr.bf16.gmra.mrb[20].mxu0 %v1168_v33  ;;  %v1068_v48 = vmax.f32 %v920_v38, 0.0 }
 0x1c9   :  { %v926_v14 = vadd.f32 %v925_v45, %v5806_v47  ;;  %v1069_v50 = vmax.f32 %v922_v42, 0.0 }
 0x1ca   :  { %v1072_v49 = vmax.f32 %v924_v44, 0.0 }
 0x1cb   :  { %v1073_v51 = vmax.f32 %v926_v14, 0.0 }
 0x1cc   :  { %v1172_v40 = vpack.c.bf16 %v1072_v49, %v1068_v48 }
 0x1cd   :  { %v1173_v54 = vpack.c.bf16 %v1073_v51, %v1069_v50  ;;  %v929_v55 = vpop.f32.mrb[92].mxu1 }
 0x1ce   :  { %v930_v56 = vadd.f32 %v929_v55, %v5801_v39  ;;  %v931_v57 = vpop.f32.mrb[93].mxu1 }
 0x1cf   :  { %v932_v58 = vadd.f32 %v931_v57, %v5806_v47  ;;  %v933_v60 = vpop.f32.mrb[94].mxu1  ;;  %1891 = vmatprep.mubr.bf16.mxu0 %v1173_v54 }
 0x1d0   :  { %v934_v62 = vadd.f32 %v933_v60, %v5801_v39  ;;  %v935_v63 = vpop.f32.mrb[95].mxu1  ;;  %1892 = vmatmul.mubr.bf16.gmra.mrb[24].mxu0 %v1172_v40  ;;  %v1076_v1 = vmax.f32 %v930_v56, 0.0 }
 0x1d1   :  { %v936_v0 = vadd.f32 %v935_v63, %v5806_v47  ;;  %v1077_v3 = vmax.f32 %v932_v58, 0.0 }
 0x1d2   :  { %v1080_v2 = vmax.f32 %v934_v62, 0.0 }
 0x1d3   :  { %v1081_v4 = vmax.f32 %v936_v0, 0.0 }
 0x1d4   :  { %v1176_v5 = vpack.c.bf16 %v1080_v2, %v1076_v1 }
 0x1d5   :  { %v1177_v8 = vpack.c.bf16 %v1081_v4, %v1077_v3  ;;  %v939_v13 = vpop.f32.mrb[96].mxu1 }
 0x1d6   :  { %v940_v9 = vadd.f32 %v939_v13, %v5801_v39  ;;  %v941_v52 = vpop.f32.mrb[97].mxu1 }
 0x1d7   :  { %v942_v53 = vadd.f32 %v941_v52, %v5806_v47  ;;  %v943_v59 = vpop.f32.mrb[98].mxu1  ;;  %1901 = vmatprep.mubr.bf16.mxu0 %v1177_v8 }
 0x1d8   :  { %v944_v10 = vadd.f32 %v943_v59, %v5801_v39  ;;  %v945_v61 = vpop.f32.mrb[99].mxu1  ;;  %1902 = vmatmul.mubr.bf16.gmra.mrb[28].mxu0 %v1176_v5  ;;  %v1084_v7 = vmax.f32 %v940_v9, 0.0 }
 0x1d9   :  { %v946_v6 = vadd.f32 %v945_v61, %v5806_v47  ;;  %v1085_v16 = vmax.f32 %v942_v53, 0.0  ;;  %v4885_v61 = vld [vmem:[%s7051_s5 + $0x1e4] ss:$16 sps:$4 sm:$0xff]  }
 0x1da   :  { %v1088_v15 = vmax.f32 %v944_v10, 0.0  ;;  %2588 = vmatprep.subr.bf16.mxu1 %v4885_v61  ;;  %v4934_v61 = vld [vmem:[%s7052_s7 + $0x20] ss:$8 sps:$4 sm:$0xff]  }
 0x1db   :  { %v1089_v17 = vmax.f32 %v946_v6, 0.0 }
 0x1dc   :  { %v1180_v18 = vpack.c.bf16 %v1088_v15, %v1084_v7  ;;  %v4883_v7 = vld [vmem:[%s7051_s5 + $0x1e0] ss:$16 sps:$4 sm:$0xff]  }
 0x1dd   :  { %v1181_v19 = vpack.c.bf16 %v1089_v17, %v1085_v16  ;;  %v949_v20 = vpop.f32.mrb[100].mxu1  ;;  %2589 = vmatpush1.bf16.msra.mxu1 %v4883_v7 }
 0x1de   :  { %v950_v21 = vadd.f32 %v949_v20, %v5801_v39  ;;  %v951_v22 = vpop.f32.mrb[101].mxu1 }
 0x1df   :  { %v952_v23 = vadd.f32 %v951_v22, %v5806_v47  ;;  %v953_v24 = vpop.f32.mrb[102].mxu1  ;;  %1911 = vmatprep.mubr.bf16.mxu0 %v1181_v19 }
 0x1e0   :  { %v954_v11 = vadd.f32 %v953_v24, %v5801_v39  ;;  %v955_v25 = vpop.f32.mrb[103].mxu1  ;;  %1912 = vmatmul.mubr.bf16.gmra.mrb[32].mxu0 %v1180_v18  ;;  %v1092_v12 = vmax.f32 %v950_v21, 0.0 }
 0x1e1   :  { %v956_v26 = vadd.f32 %v955_v25, %v5806_v47  ;;  %v1093_v30 = vmax.f32 %v952_v23, 0.0 }
 0x1e2   :  { %v1096_v28 = vmax.f32 %v954_v11, 0.0 }
 0x1e3   :  { %v1097_v31 = vmax.f32 %v956_v26, 0.0 }
 0x1e4   :  { %v1184_v32 = vpack.c.bf16 %v1096_v28, %v1092_v12 }
 0x1e5   :  { %v1185_v33 = vpack.c.bf16 %v1097_v31, %v1093_v30  ;;  %v959_v35 = vpop.f32.mrb[104].mxu1 }
 0x1e6   :  { %v960_v37 = vadd.f32 %v959_v35, %v5801_v39  ;;  %v961_v38 = vpop.f32.mrb[105].mxu1 }
 0x1e7   :  { %v962_v46 = vadd.f32 %v961_v38, %v5806_v47  ;;  %v963_v42 = vpop.f32.mrb[106].mxu1  ;;  %1921 = vmatprep.mubr.bf16.mxu0 %v1185_v33  ;;  %v4888_v33 = vld [vmem:[%s7051_s5 + $0xc] ss:$16 sps:$4 sm:$0xff]  }
 0x1e8   :  { %v964_v43 = vadd.f32 %v963_v42, %v5801_v39  ;;  %v965_v44 = vpop.f32.mrb[107].mxu1  ;;  %1922 = vmatmul.mubr.bf16.gmra.mrb[36].mxu0 %v1184_v32  ;;  %v1100_v14 = vmax.f32 %v960_v37, 0.0  ;;  %2751 = vmatprep.subr.bf16.mxu1 %v4888_v33 }
 0x1e9   :  { %v966_v45 = vadd.f32 %v965_v44, %v5806_v47  ;;  %v1101_v49 = vmax.f32 %v962_v46, 0.0 }
 0x1ea   :  { %v1104_v48 = vmax.f32 %v964_v43, 0.0 }
 0x1eb   :  { %v1105_v50 = vmax.f32 %v966_v45, 0.0 }
 0x1ec   :  { %v1188_v51 = vpack.c.bf16 %v1104_v48, %v1100_v14 }
 0x1ed   :  { %v1189_v40 = vpack.c.bf16 %v1105_v50, %v1101_v49  ;;  %v969_v54 = vpop.f32.mrb[108].mxu1 }
 0x1ee   :  { %v970_v55 = vadd.f32 %v969_v54, %v5801_v39  ;;  %v971_v56 = vpop.f32.mrb[109].mxu1 }
 0x1ef   :  { %v972_v57 = vadd.f32 %v971_v56, %v5806_v47  ;;  %v973_v58 = vpop.f32.mrb[110].mxu1  ;;  %1931 = vmatprep.mubr.bf16.mxu0 %v1189_v40 }
 0x1f0   :  { %v974_v60 = vadd.f32 %v973_v58, %v5801_v39  ;;  %v975_v62 = vpop.f32.mrb[111].mxu1  ;;  %1932 = vmatmul.mubr.bf16.gmra.mrb[40].mxu0 %v1188_v51  ;;  %v1108_v0 = vmax.f32 %v970_v55, 0.0 }
 0x1f1   :  { %v976_v63 = vadd.f32 %v975_v62, %v5806_v47  ;;  %v1109_v2 = vmax.f32 %v972_v57, 0.0 }
 0x1f2   :  { %v1112_v1 = vmax.f32 %v974_v60, 0.0 }
 0x1f3   :  { %v1113_v3 = vmax.f32 %v976_v63, 0.0 }
 0x1f4   :  { %v1192_v4 = vpack.c.bf16 %v1112_v1, %v1108_v0 }
 0x1f5   :  { %v1193_v5 = vpack.c.bf16 %v1113_v3, %v1109_v2  ;;  %v979_v8 = vpop.f32.mrb[112].mxu1 }
 0x1f6   :  { %v980_v13 = vadd.f32 %v979_v8, %v5801_v39  ;;  %v981_v9 = vpop.f32.mrb[113].mxu1 }
 0x1f7   :  { %v982_v52 = vadd.f32 %v981_v9, %v5806_v47  ;;  %v983_v53 = vpop.f32.mrb[114].mxu1  ;;  %1941 = vmatprep.mubr.bf16.mxu0 %v1193_v5  ;;  %v4922_v9 = vld [vmem:[%s7052_s7] ss:$8 sps:$4 sm:$0xff]  }
 0x1f8   :  { %v984_v59 = vadd.f32 %v983_v53, %v5801_v39  ;;  %v985_v10 = vpop.f32.mrb[115].mxu1  ;;  %1942 = vmatmul.mubr.bf16.gmra.mrb[44].mxu0 %v1192_v4  ;;  %v1116_v15 = vmax.f32 %v980_v13, 0.0  ;;  %v1274_v53 = vld [vmem:[%s7053_s4] sm:$0x3] }
 0x1f9   :  { %v986_v6 = vadd.f32 %v985_v10, %v5806_v47  ;;  %v1117_v17 = vmax.f32 %v982_v52, 0.0  ;;  %v4930_v52 = vld [vmem:[%s7052_s7 + $0x14] ss:$8 sps:$4 sm:$0xff]   ;;  %v5972_v10 = vrot.slane %v1274_v53, %v5600_v41 }
 0x1fa   :  { %v1120_v16 = vmax.f32 %v984_v59, 0.0  ;;  %v5969_v59 = vrot.slane %v1274_v53, %v5592_v36  ;;  %v4900_v53 = vld [vmem:[%s7051_s5 + $0x8c] ss:$16 sps:$4 sm:$0xff]  }
 0x1fb   :  { %v1121_v18 = vmax.f32 %v986_v6, 0.0  ;;  %v4936_v6 = vld [vmem:[%s7052_s7 + $0x24] ss:$8 sps:$4 sm:$0xff]  }
 0x1fc   :  { %v1196_v19 = vpack.c.bf16 %v1120_v16, %v1116_v15 }
 0x1fd   :  { %v1197_v20 = vpack.c.bf16 %v1121_v18, %v1117_v17  ;;  %v989_v21 = vpop.f32.mrb[116].mxu1  ;;  %v4940_v17 = vld [vmem:[%s7052_s7 + $0x30] ss:$8 sps:$4 sm:$0xff]   ;;  %v4942_v18 = vld [vmem:[%s7052_s7 + $0x34] ss:$8 sps:$4 sm:$0xff]  }
 0x1fe   :  { %v990_v22 = vadd.f32 %v989_v21, %v5801_v39  ;;  %v991_v23 = vpop.f32.mrb[117].mxu1 }
 0x1ff   :  { %v992_v24 = vadd.f32 %v991_v23, %v5806_v47  ;;  %v993_v11 = vpop.f32.mrb[118].mxu1  ;;  %1951 = vmatprep.mubr.bf16.mxu0 %v1197_v20 }
 0x200   :  { %v994_v25 = vadd.f32 %v993_v11, %v5801_v39  ;;  %v995_v26 = vpop.f32.mrb[119].mxu1  ;;  %1952 = vmatmul.mubr.bf16.gmra.mrb[48].mxu0 %v1196_v19  ;;  %v1124_v28 = vmax.f32 %v990_v22, 0.0 }
 0x201   :  { %v996_v12 = vadd.f32 %v995_v26, %v5806_v47  ;;  %v1125_v31 = vmax.f32 %v992_v24, 0.0  ;;  %v4948_v26 = vld [vmem:[%s7052_s7 + $0x44] ss:$8 sps:$4 sm:$0xff]  }
 0x202   :  { %v1128_v30 = vmax.f32 %v994_v25, 0.0  ;;  %v4946_v25 = vld [vmem:[%s7052_s7 + $0x40] ss:$8 sps:$4 sm:$0xff]  }
 0x203   :  { %v1129_v32 = vmax.f32 %v996_v12, 0.0 }
 0x204   :  { %v1200_v35 = vpack.c.bf16 %v1128_v30, %v1124_v28  ;;  %v4886_v30 = vld [vmem:[%s7051_s5 + $0x8] ss:$16 sps:$4 sm:$0xff]  }
 0x205   :  { %v1201_v37 = vpack.c.bf16 %v1129_v32, %v1125_v31  ;;  %v999_v38 = vpop.f32.mrb[120].mxu1  ;;  %v4891_v32 = vld [vmem:[%s7051_s5 + $0x2c] ss:$16 sps:$4 sm:$0xff]  }
 0x206   :  { %v1000_v46 = vadd.f32 %v999_v38, %v5801_v39  ;;  %v1001_v42 = vpop.f32.mrb[121].mxu1 }
 0x207   :  { %v1002_v43 = vadd.f32 %v1001_v42, %v5806_v47  ;;  %v1003_v44 = vpop.f32.mrb[122].mxu1  ;;  %1961 = vmatprep.mubr.bf16.mxu0 %v1201_v37 }
 0x208   :  { %v1004_v45 = vadd.f32 %v1003_v44, %v5801_v39  ;;  %v1005_v14 = vpop.f32.mrb[123].mxu1  ;;  %1962 = vmatmul.mubr.bf16.gmra.mrb[52].mxu0 %v1200_v35  ;;  %v1132_v49 = vmax.f32 %v1000_v46, 0.0 }
 0x209   :  { %v1006_v48 = vadd.f32 %v1005_v14, %v5806_v47  ;;  %v1133_v51 = vmax.f32 %v1002_v43, 0.0  ;;  %v4889_v14 = vld [vmem:[%s7051_s5 + $0x28] ss:$16 sps:$4 sm:$0xff]  }
 0x20a   :  { %v1136_v50 = vmax.f32 %v1004_v45, 0.0 }
 0x20b   :  { %v1137_v40 = vmax.f32 %v1006_v48, 0.0 }
 0x20c   :  { %v1204_v54 = vpack.c.bf16 %v1136_v50, %v1132_v49  ;;  %v4949_v50 = vld [vmem:[%s7052_s7 + $0x50] ss:$8 sps:$4 sm:$0xff]  }
 0x20d   :  { %v1205_v55 = vpack.c.bf16 %v1137_v40, %v1133_v51  ;;  %v1009_v56 = vpop.f32.mrb[124].mxu1  ;;  %v4951_v51 = vld [vmem:[%s7052_s7 + $0x54] ss:$8 sps:$4 sm:$0xff]  }
 0x20e   :  { %v1010_v57 = vadd.f32 %v1009_v56, %v5801_v39  ;;  %v1011_v58 = vpop.f32.mrb[125].mxu1 }
 0x20f   :  { %v1012_v60 = vadd.f32 %v1011_v58, %v5806_v47  ;;  %v1013_v62 = vpop.f32.mrb[126].mxu1  ;;  %1971 = vmatprep.mubr.bf16.mxu0 %v1205_v55 }
 0x210   :  { %v1014_v63 = vadd.f32 %v1013_v62, %v5801_v39  ;;  %v1015_v0 = vpop.f32.mrb[127].mxu1  ;;  %1972 = vmatmul.mubr.bf16.gmra.mrb[56].mxu0 %v1204_v54  ;;  %v1140_v2 = vmax.f32 %v1010_v57, 0.0  ;;  %v4924_v39 = vld [vmem:[%s7052_s7 + $0x4] ss:$8 sps:$4 sm:$0xff]  }
 0x211   :  { %v1016_v1 = vadd.f32 %v1015_v0, %v5806_v47  ;;  %v1141_v4 = vmax.f32 %v1012_v60, 0.0  ;;  %3532 = vmatprep.subr.bf16.mxu0 %v4924_v39  ;;  %v4928_v47 = vld [vmem:[%s7052_s7 + $0x10] ss:$8 sps:$4 sm:$0xff]   ;;  %v4894_v54 = vld [vmem:[%s7051_s5 + $0x4c] ss:$16 sps:$4 sm:$0xff]  }
 0x212   :  { %v1144_v3 = vmax.f32 %v1014_v63, 0.0  ;;  %3533 = vmatpush1.bf16.msra.mxu0 %v4922_v9  ;;  %v4892_v60 = vld [vmem:[%s7051_s5 + $0x48] ss:$16 sps:$4 sm:$0xff]   ;;  %v4897_v0 = vld [vmem:[%s7051_s5 + $0x6c] ss:$16 sps:$4 sm:$0xff]  }
 0x213   :  { %v1145_v5 = vmax.f32 %v1016_v1, 0.0  ;;  %3534 = vmatprep.subr.bf16.mxu0 %v4930_v52  ;;  %v4952_v39 = vld [vmem:[%s7052_s7 + $0x60] ss:$8 sps:$4 sm:$0xff]  }
 0x214   :  { %v1208_v8 = vpack.c.bf16 %v1144_v3, %v1140_v2 }
 0x215   :  { %v1209_v13 = vpack.c.bf16 %v1145_v5, %v1141_v4 }
 0x216   :  { %3535 = vmatpush1.bf16.msra.mxu0 %v4928_v47  ;;  %v4954_v47 = vld [vmem:[%s7052_s7 + $0x64] ss:$8 sps:$4 sm:$0xff]  }
 0x217   :  { %1981 = vmatprep.mubr.bf16.mxu0 %v1209_v13  ;;  %3536 = vmatprep.subr.bf16.mxu0 %v4936_v6 }
 0x218   :  { %1982 = vmatmul.mubr.bf16.gmra.mrb[60].mxu0 %v1208_v8  ;;  %v4895_v8 = vld [vmem:[%s7051_s5 + $0x68] ss:$16 sps:$4 sm:$0xff]  }
 0x21a   :  { %3537 = vmatpush1.bf16.msra.mxu0 %v4934_v61 }
 0x21b   :  { %3538 = vmatprep.subr.bf16.mxu0 %v4942_v18 }
 0x21e   :  { %3539 = vmatpush1.bf16.msra.mxu0 %v4940_v17 }
 0x21f   :  { %3540 = vmatprep.subr.bf16.mxu0 %v4948_v26 }
 0x222   :  { %3541 = vmatpush1.bf16.msra.mxu0 %v4946_v25 }
 0x223   :  { %3542 = vmatprep.subr.bf16.mxu0 %v4951_v51 }
 0x226   :  { %3543 = vmatpush1.bf16.msra.mxu0 %v4949_v50 }
 0x227   :  { %3544 = vmatprep.subr.bf16.mxu0 %v4954_v47 }
 0x22a   :  { %3545 = vmatpush1.bf16.msra.mxu0 %v4952_v39 }
 0x273   :  { %v1833_v7 = vpop.f32.mrb[0].mxu0 }
 0x274   :  { %v4342_v15 = vadd.f32 %v1833_v7, %v5969_v59  ;;  %v1835_v16 = vpop.f32.mrb[1].mxu0 }
 0x275   :  { %v4343_v19 = vadd.f32 %v1835_v16, %v5972_v10  ;;  %v1837_v20 = vpop.f32.mrb[2].mxu0  ;;  %v4898_v16 = vld [vmem:[%s7051_s5 + $0x88] ss:$16 sps:$4 sm:$0xff]  }
 0x276   :  { %v1992_v21 = vmax.f32 %v4342_v15, 0.0  ;;  %v4344_v22 = vadd.f32 %v1837_v20, %v5969_v59  ;;  %v1839_v23 = vpop.f32.mrb[3].mxu0 }
 0x277   :  { %v1993_v24 = vmax.f32 %v4343_v19, 0.0  ;;  %v4345_v11 = vadd.f32 %v1839_v23, %v5972_v10  ;;  %v4903_v19 = vld [vmem:[%s7051_s5 + $0xac] ss:$16 sps:$4 sm:$0xff]  }
 0x278   :  { %2056 = vst [vmem:[%s7054_s10] sm:$0xff] %v1992_v21  ;;  %v1994_v12 = vmax.f32 %v4344_v22, 0.0 }
 0x279   :  { %2057 = vst [vmem:[%s7054_s10 + $0x8] sm:$0xff] %v1993_v24  ;;  %v1995_v28 = vmax.f32 %v4345_v11, 0.0  ;;  %v4901_v11 = vld [vmem:[%s7051_s5 + $0xa8] ss:$16 sps:$4 sm:$0xff]  }
 0x27a   :  { %2058 = vst [vmem:[%s7054_s10 + $0x10] sm:$0xff] %v1994_v12  ;;  %v6008_v31 = vpack.c.bf16 %v1994_v12, %v1992_v21  ;;  %v4955_v12 = vld [vmem:[%s7052_s7 + $0x70] ss:$8 sps:$4 sm:$0xff]  }
 0x27b   :  { %2059 = vst [vmem:[%s7054_s10 + $0x18] sm:$0xff] %v1995_v28  ;;  %v6016_v33 = vpack.c.bf16 %v1995_v28, %v1993_v24  ;;  %v1843_v35 = vpop.f32.mrb[4].mxu0  ;;  %v4957_v28 = vld [vmem:[%s7052_s7 + $0x74] ss:$8 sps:$4 sm:$0xff]  }
 0x27c   :  { %v4346_v37 = vadd.f32 %v1843_v35, %v5969_v59  ;;  %v1845_v38 = vpop.f32.mrb[5].mxu0  ;;  %3546 = vmatprep.subr.bf16.mxu0 %v4957_v28 }
 0x27d   :  { %v4347_v46 = vadd.f32 %v1845_v38, %v5972_v10  ;;  %v1847_v42 = vpop.f32.mrb[6].mxu0  ;;  %2590 = vmatprep.mubr.bf16.mxu1 %v6016_v33  ;;  %3547 = vmatpush1.bf16.msra.mxu0 %v4955_v12  ;;  %v4921_v12 = vld [vmem:[%s7051_s5 + $0x16c] ss:$16 sps:$4 sm:$0xff]  }
 0x27e   :  { %v1996_v43 = vmax.f32 %v4346_v37, 0.0  ;;  %v4348_v44 = vadd.f32 %v1847_v42, %v5969_v59  ;;  %v1849_v45 = vpop.f32.mrb[7].mxu0  ;;  %2591 = vmatmul.mubr.bf16.vlgmr.msra.gmra.mrb[128].mxu1 %v6008_v31  ;;  %v4904_v42 = vld [vmem:[%s7051_s5 + $0xc8] ss:$16 sps:$4 sm:$0xff]  }
 0x27f   :  { %v1997_v48 = vmax.f32 %v4347_v46, 0.0  ;;  %v4349_v49 = vadd.f32 %v1849_v45, %v5972_v10  ;;  %2752 = vmatpush1.bf16.msra.mxu1 %v4886_v30  ;;  %v4909_v45 = vld [vmem:[%s7051_s5 + $0xec] ss:$16 sps:$4 sm:$0xff]  }
 0x280   :  { %2060 = vst [vmem:[%s7054_s10 + $0x20] sm:$0xff] %v1996_v43  ;;  %v1998_v40 = vmax.f32 %v4348_v44, 0.0  ;;  %2753 = vmatprep.subr.bf16.mxu1 %v4891_v32  ;;  %v4906_v32 = vld [vmem:[%s7051_s5 + $0xcc] ss:$16 sps:$4 sm:$0xff]  }
 0x281   :  { %2061 = vst [vmem:[%s7054_s10 + $0x28] sm:$0xff] %v1997_v48  ;;  %v1999_v55 = vmax.f32 %v4349_v49, 0.0 }
 0x282   :  { %2062 = vst [vmem:[%s7054_s10 + $0x30] sm:$0xff] %v1998_v40  ;;  %v6045_v56 = vpack.c.bf16 %v1998_v40, %v1996_v43  ;;  %v4907_v40 = vld [vmem:[%s7051_s5 + $0xe8] ss:$16 sps:$4 sm:$0xff]  }
 0x283   :  { %2063 = vst [vmem:[%s7054_s10 + $0x38] sm:$0xff] %v1999_v55  ;;  %v6050_v57 = vpack.c.bf16 %v1999_v55, %v1997_v48  ;;  %v1853_v58 = vpop.f32.mrb[8].mxu0  ;;  %2754 = vmatpush1.bf16.msra.mxu1 %v4889_v14 }
 0x284   :  { %v4350_v62 = vadd.f32 %v1853_v58, %v5969_v59  ;;  %v1855_v63 = vpop.f32.mrb[9].mxu0  ;;  %2755 = vmatprep.subr.bf16.mxu1 %v4894_v54  ;;  %v4958_v58 = vld [vmem:[%s7052_s7 + $0x80] ss:$8 sps:$4 sm:$0xff]  }
 0x285   :  { %v4351_v1 = vadd.f32 %v1855_v63, %v5972_v10  ;;  %v1857_v2 = vpop.f32.mrb[10].mxu0  ;;  %2600 = vmatprep.mubr.bf16.mxu1 %v6050_v57  ;;  %v4912_v63 = vld [vmem:[%s7051_s5 + $0x10c] ss:$16 sps:$4 sm:$0xff]  }
 0x286   :  { %v2000_v3 = vmax.f32 %v4350_v62, 0.0  ;;  %v4352_v4 = vadd.f32 %v1857_v2, %v5969_v59  ;;  %v1859_v5 = vpop.f32.mrb[11].mxu0  ;;  %2601 = vmatmul.mubr.bf16.gmra.mrb[132].mxu1 %v6045_v56 }
 0x287   :  { %v2001_v13 = vmax.f32 %v4351_v1, 0.0  ;;  %v4353_v9 = vadd.f32 %v1859_v5, %v5972_v10  ;;  %2756 = vmatpush1.bf16.msra.mxu1 %v4892_v60  ;;  %v4960_v60 = vld [vmem:[%s7052_s7 + $0x84] ss:$8 sps:$4 sm:$0xff]  }
 0x288   :  { %2064 = vst [vmem:[%s7054_s10 + $0x40] sm:$0xff] %v2000_v3  ;;  %v2002_v52 = vmax.f32 %v4352_v4, 0.0  ;;  %2757 = vmatprep.subr.bf16.mxu1 %v4897_v0  ;;  %3548 = vmatprep.subr.bf16.mxu0 %v4960_v60  ;;  %v4910_v4 = vld [vmem:[%s7051_s5 + $0x108] ss:$16 sps:$4 sm:$0xff]  }
 0x289   :  { %2065 = vst [vmem:[%s7054_s10 + $0x48] sm:$0xff] %v2001_v13  ;;  %v2003_v61 = vmax.f32 %v4353_v9, 0.0  ;;  %3549 = vmatpush1.bf16.msra.mxu0 %v4958_v58 }
 0x28a   :  { %2066 = vst [vmem:[%s7054_s10 + $0x50] sm:$0xff] %v2002_v52  ;;  %v6085_v6 = vpack.c.bf16 %v2002_v52, %v2000_v3 }
 0x28b   :  { %2067 = vst [vmem:[%s7054_s10 + $0x58] sm:$0xff] %v2003_v61  ;;  %v6090_v7 = vpack.c.bf16 %v2003_v61, %v2001_v13  ;;  %v1863_v15 = vpop.f32.mrb[12].mxu0  ;;  %2758 = vmatpush1.bf16.msra.mxu1 %v4895_v8  ;;  %v4915_v13 = vld [vmem:[%s7051_s5 + $0x12c] ss:$16 sps:$4 sm:$0xff]   ;;  %v4913_v61 = vld [vmem:[%s7051_s5 + $0x128] ss:$16 sps:$4 sm:$0xff]  }
 0x28c   :  { %v4354_v17 = vadd.f32 %v1863_v15, %v5969_v59  ;;  %v1865_v18 = vpop.f32.mrb[13].mxu0  ;;  %2759 = vmatprep.subr.bf16.mxu1 %v4900_v53 }
 0x28d   :  { %v4355_v20 = vadd.f32 %v1865_v18, %v5972_v10  ;;  %v1867_v21 = vpop.f32.mrb[14].mxu0  ;;  %2610 = vmatprep.mubr.bf16.mxu1 %v6090_v7  ;;  %v4963_v18 = vld [vmem:[%s7052_s7 + $0x94] ss:$8 sps:$4 sm:$0xff]  }
 0x28e   :  { %v2004_v22 = vmax.f32 %v4354_v17, 0.0  ;;  %v4356_v23 = vadd.f32 %v1867_v21, %v5969_v59  ;;  %v1869_v24 = vpop.f32.mrb[15].mxu0  ;;  %2611 = vmatmul.mubr.bf16.gmra.mrb[136].mxu1 %v6085_v6  ;;  %v4961_v17 = vld [vmem:[%s7052_s7 + $0x90] ss:$8 sps:$4 sm:$0xff]   ;;  %3550 = vmatprep.subr.bf16.mxu0 %v4963_v18 }
 0x28f   :  { %v2005_v25 = vmax.f32 %v4355_v20, 0.0  ;;  %v4357_v26 = vadd.f32 %v1869_v24, %v5972_v10  ;;  %2760 = vmatpush1.bf16.msra.mxu1 %v4898_v16  ;;  %v4918_v20 = vld [vmem:[%s7051_s5 + $0x14c] ss:$16 sps:$4 sm:$0xff]   ;;  %3551 = vmatpush1.bf16.msra.mxu0 %v4961_v17  ;;  %v4937_v18 = vld [vmem:[%s7051_s5 + $0x1c8] ss:$16 sps:$4 sm:$0xff]  }
 0x290   :  { %2068 = vst [vmem:[%s7054_s10 + $0x60] sm:$0xff] %v2004_v22  ;;  %v2006_v30 = vmax.f32 %v4356_v23, 0.0  ;;  %2761 = vmatprep.subr.bf16.mxu1 %v4903_v19 }
 0x291   :  { %2069 = vst [vmem:[%s7054_s10 + $0x68] sm:$0xff] %v2005_v25  ;;  %v2007_v35 = vmax.f32 %v4357_v26, 0.0 }
 0x292   :  { %2070 = vst [vmem:[%s7054_s10 + $0x70] sm:$0xff] %v2006_v30  ;;  %v6125_v37 = vpack.c.bf16 %v2006_v30, %v2004_v22 }
 0x293   :  { %2071 = vst [vmem:[%s7054_s10 + $0x78] sm:$0xff] %v2007_v35  ;;  %v6130_v38 = vpack.c.bf16 %v2007_v35, %v2005_v25  ;;  %v1873_v46 = vpop.f32.mrb[16].mxu0  ;;  %2762 = vmatpush1.bf16.msra.mxu1 %v4901_v11  ;;  %v4916_v11 = vld [vmem:[%s7051_s5 + $0x148] ss:$16 sps:$4 sm:$0xff]  }
 0x294   :  { %v4358_v43 = vadd.f32 %v1873_v46, %v5969_v59  ;;  %v1875_v44 = vpop.f32.mrb[17].mxu0  ;;  %2763 = vmatprep.subr.bf16.mxu1 %v4906_v32 }
 0x295   :  { %v4359_v14 = vadd.f32 %v1875_v44, %v5972_v10  ;;  %v1877_v48 = vpop.f32.mrb[18].mxu0  ;;  %2620 = vmatprep.mubr.bf16.mxu1 %v6130_v38 }
 0x296   :  { %v2008_v49 = vmax.f32 %v4358_v43, 0.0  ;;  %v4360_v50 = vadd.f32 %v1877_v48, %v5969_v59  ;;  %v1879_v51 = vpop.f32.mrb[19].mxu0  ;;  %2621 = vmatmul.mubr.bf16.gmra.mrb[140].mxu1 %v6125_v37 }
 0x297   :  { %v2009_v54 = vmax.f32 %v4359_v14, 0.0  ;;  %v4361_v55 = vadd.f32 %v1879_v51, %v5972_v10  ;;  %2764 = vmatpush1.bf16.msra.mxu1 %v4904_v42  ;;  %v4919_v42 = vld [vmem:[%s7051_s5 + $0x168] ss:$16 sps:$4 sm:$0xff]   ;;  %v4966_v14 = vld [vmem:[%s7052_s7 + $0xa4] ss:$8 sps:$4 sm:$0xff]  }
 0x298   :  { %2072 = vst [vmem:[%s7054_s10 + $0x80] sm:$0xff] %v2008_v49  ;;  %v2010_v62 = vmax.f32 %v4360_v50, 0.0  ;;  %2765 = vmatprep.subr.bf16.mxu1 %v4909_v45  ;;  %v4964_v45 = vld [vmem:[%s7052_s7 + $0xa0] ss:$8 sps:$4 sm:$0xff]   ;;  %3552 = vmatprep.subr.bf16.mxu0 %v4966_v14 }
 0x299   :  { %2073 = vst [vmem:[%s7054_s10 + $0x88] sm:$0xff] %v2009_v54  ;;  %v2011_v0 = vmax.f32 %v4361_v55, 0.0  ;;  %3553 = vmatpush1.bf16.msra.mxu0 %v4964_v45  ;;  %v4925_v55 = vld [vmem:[%s7051_s5 + $0x188] ss:$16 sps:$4 sm:$0xff]  }
 0x29a   :  { %2074 = vst [vmem:[%s7054_s10 + $0x90] sm:$0xff] %v2010_v62  ;;  %v6165_v1 = vpack.c.bf16 %v2010_v62, %v2008_v49  ;;  %v4927_v49 = vld [vmem:[%s7051_s5 + $0x18c] ss:$16 sps:$4 sm:$0xff]  }
 0x29b   :  { %2075 = vst [vmem:[%s7054_s10 + $0x98] sm:$0xff] %v2011_v0  ;;  %v6170_v2 = vpack.c.bf16 %v2011_v0, %v2009_v54  ;;  %v1883_v3 = vpop.f32.mrb[20].mxu0  ;;  %2766 = vmatpush1.bf16.msra.mxu1 %v4907_v40  ;;  %v4933_v62 = vld [vmem:[%s7051_s5 + $0x1ac] ss:$16 sps:$4 sm:$0xff]  }
 0x29c   :  { %v4362_v5 = vadd.f32 %v1883_v3, %v5969_v59  ;;  %v1885_v8 = vpop.f32.mrb[21].mxu0  ;;  %2767 = vmatprep.subr.bf16.mxu1 %v4912_v63 }
 0x29d   :  { %v4363_v9 = vadd.f32 %v1885_v8, %v5972_v10  ;;  %v1887_v39 = vpop.f32.mrb[22].mxu0  ;;  %2630 = vmatprep.mubr.bf16.mxu1 %v6170_v2  ;;  %v4931_v8 = vld [vmem:[%s7051_s5 + $0x1a8] ss:$16 sps:$4 sm:$0xff]  }
 0x29e   :  { %v2012_v47 = vmax.f32 %v4362_v5, 0.0  ;;  %v4364_v52 = vadd.f32 %v1887_v39, %v5969_v59  ;;  %v1889_v53 = vpop.f32.mrb[23].mxu0  ;;  %2631 = vmatmul.mubr.bf16.gmra.mrb[144].mxu1 %v6165_v1  ;;  %v4967_v39 = vld [vmem:[%s7052_s7 + $0xb0] ss:$8 sps:$4 sm:$0xff]  }
 0x29f   :  { %v2013_v15 = vmax.f32 %v4363_v9, 0.0  ;;  %v4365_v16 = vadd.f32 %v1889_v53, %v5972_v10  ;;  %2768 = vmatpush1.bf16.msra.mxu1 %v4910_v4  ;;  %v4939_v53 = vld [vmem:[%s7051_s5 + $0x1cc] ss:$16 sps:$4 sm:$0xff]  }
 0x2a0   :  { %2076 = vst [vmem:[%s7054_s10 + $0xa0] sm:$0xff] %v2012_v47  ;;  %v2014_v19 = vmax.f32 %v4364_v52, 0.0  ;;  %2769 = vmatprep.subr.bf16.mxu1 %v4915_v13 }
 0x2a1   :  { %2077 = vst [vmem:[%s7054_s10 + $0xa8] sm:$0xff] %v2013_v15  ;;  %v2015_v21 = vmax.f32 %v4365_v16, 0.0 }
 0x2a2   :  { %2078 = vst [vmem:[%s7054_s10 + $0xb0] sm:$0xff] %v2014_v19  ;;  %v6205_v22 = vpack.c.bf16 %v2014_v19, %v2012_v47  ;;  %v4969_v47 = vld [vmem:[%s7052_s7 + $0xb4] ss:$8 sps:$4 sm:$0xff]  }
 0x2a3   :  { %2079 = vst [vmem:[%s7054_s10 + $0xb8] sm:$0xff] %v2015_v21  ;;  %v6210_v23 = vpack.c.bf16 %v2015_v21, %v2013_v15  ;;  %v1893_v24 = vpop.f32.mrb[24].mxu0  ;;  %2770 = vmatpush1.bf16.msra.mxu1 %v4913_v61  ;;  %3554 = vmatprep.subr.bf16.mxu0 %v4969_v47  ;;  %v4945_v21 = vld [vmem:[%s7051_s5 + $0x1ec] ss:$16 sps:$4 sm:$0xff]  }
 0x2a4   :  { %v4366_v25 = vadd.f32 %v1893_v24, %v5969_v59  ;;  %v1895_v26 = vpop.f32.mrb[25].mxu0  ;;  %2771 = vmatprep.subr.bf16.mxu1 %v4918_v20  ;;  %3555 = vmatpush1.bf16.msra.mxu0 %v4967_v39 }
 0x2a5   :  { %v4367_v28 = vadd.f32 %v1895_v26, %v5972_v10  ;;  %v1897_v30 = vpop.f32.mrb[26].mxu0  ;;  %2640 = vmatprep.mubr.bf16.mxu1 %v6210_v23 }
 0x2a6   :  { %v2016_v32 = vmax.f32 %v4366_v25, 0.0  ;;  %v4368_v35 = vadd.f32 %v1897_v30, %v5969_v59  ;;  %v1899_v46 = vpop.f32.mrb[27].mxu0  ;;  %2641 = vmatmul.mubr.bf16.gmra.mrb[148].mxu1 %v6205_v22 }
 0x2a7   :  { %v2017_v43 = vmax.f32 %v4367_v28, 0.0  ;;  %v4369_v44 = vadd.f32 %v1899_v46, %v5972_v10  ;;  %2772 = vmatpush1.bf16.msra.mxu1 %v4916_v11  ;;  %v4943_v28 = vld [vmem:[%s7051_s5 + $0x1e8] ss:$16 sps:$4 sm:$0xff]   ;;  %v4972_v46 = vld [vmem:[%s7052_s7 + $0xc4] ss:$8 sps:$4 sm:$0xff]  }
 0x2a8   :  { %2080 = vst [vmem:[%s7054_s10 + $0xc0] sm:$0xff] %v2016_v32  ;;  %v2018_v48 = vmax.f32 %v4368_v35, 0.0  ;;  %2773 = vmatprep.subr.bf16.mxu1 %v4921_v12  ;;  %v4970_v35 = vld [vmem:[%s7052_s7 + $0xc0] ss:$8 sps:$4 sm:$0xff]   ;;  %3556 = vmatprep.subr.bf16.mxu0 %v4972_v46 }
 0x2a9   :  { %2081 = vst [vmem:[%s7054_s10 + $0xc8] sm:$0xff] %v2017_v43  ;;  %v2019_v50 = vmax.f32 %v4369_v44, 0.0  ;;  %3557 = vmatpush1.bf16.msra.mxu0 %v4970_v35 }
 0x2aa   :  { %2082 = vst [vmem:[%s7054_s10 + $0xd0] sm:$0xff] %v2018_v48  ;;  %v6245_v51 = vpack.c.bf16 %v2018_v48, %v2016_v32 }
 0x2ab   :  { %2083 = vst [vmem:[%s7054_s10 + $0xd8] sm:$0xff] %v2019_v50  ;;  %v6250_v40 = vpack.c.bf16 %v2019_v50, %v2017_v43  ;;  %v1903_v54 = vpop.f32.mrb[28].mxu0  ;;  %2774 = vmatpush1.bf16.msra.mxu1 %v4919_v42 }
 0x2ac   :  { %v4370_v58 = vadd.f32 %v1903_v54, %v5969_v59  ;;  %v1905_v60 = vpop.f32.mrb[29].mxu0  ;;  %2775 = vmatprep.subr.bf16.mxu1 %v4927_v49 }
 0x2ad   :  { %v4371_v63 = vadd.f32 %v1905_v60, %v5972_v10  ;;  %v1907_v0 = vpop.f32.mrb[30].mxu0  ;;  %2650 = vmatprep.mubr.bf16.mxu1 %v6250_v40 }
 0x2ae   :  { %v2020_v3 = vmax.f32 %v4370_v58, 0.0  ;;  %v4372_v4 = vadd.f32 %v1907_v0, %v5969_v59  ;;  %v1909_v5 = vpop.f32.mrb[31].mxu0  ;;  %2651 = vmatmul.mubr.bf16.gmra.mrb[152].mxu1 %v6245_v51  ;;  %v4973_v0 = vld [vmem:[%s7052_s7 + $0xd0] ss:$8 sps:$4 sm:$0xff]  }
 0x2af   :  { %v2021_v13 = vmax.f32 %v4371_v63, 0.0  ;;  %v4373_v9 = vadd.f32 %v1909_v5, %v5972_v10  ;;  %2776 = vmatpush1.bf16.msra.mxu1 %v4925_v55 }
 0x2b0   :  { %2084 = vst [vmem:[%s7054_s10 + $0xe0] sm:$0xff] %v2020_v3  ;;  %v2022_v52 = vmax.f32 %v4372_v4, 0.0  ;;  %2777 = vmatprep.subr.bf16.mxu1 %v4933_v62 }
 0x2b1   :  { %2085 = vst [vmem:[%s7054_s10 + $0xe8] sm:$0xff] %v2021_v13  ;;  %v2023_v61 = vmax.f32 %v4373_v9, 0.0 }
 0x2b2   :  { %2086 = vst [vmem:[%s7054_s10 + $0xf0] sm:$0xff] %v2022_v52  ;;  %v6285_v15 = vpack.c.bf16 %v2022_v52, %v2020_v3  ;;  %v4975_v3 = vld [vmem:[%s7052_s7 + $0xd4] ss:$8 sps:$4 sm:$0xff]  }
 0x2b3   :  { %2087 = vst [vmem:[%s7054_s10 + $0xf8] sm:$0xff] %v2023_v61  ;;  %v6290_v16 = vpack.c.bf16 %v2023_v61, %v2021_v13  ;;  %v1913_v17 = vpop.f32.mrb[32].mxu0  ;;  %2778 = vmatpush1.bf16.msra.mxu1 %v4931_v8  ;;  %3558 = vmatprep.subr.bf16.mxu0 %v4975_v3 }
 0x2b4   :  { %v4374_v19 = vadd.f32 %v1913_v17, %v5969_v59  ;;  %v1915_v20 = vpop.f32.mrb[33].mxu0  ;;  %2779 = vmatprep.subr.bf16.mxu1 %v4939_v53  ;;  %3559 = vmatpush1.bf16.msra.mxu0 %v4973_v0 }
 0x2b5   :  { %v4375_v24 = vadd.f32 %v1915_v20, %v5972_v10  ;;  %v1917_v11 = vpop.f32.mrb[34].mxu0  ;;  %2660 = vmatprep.mubr.bf16.mxu1 %v6290_v16 }
 0x2b6   :  { %v2024_v25 = vmax.f32 %v4374_v19, 0.0  ;;  %v4376_v26 = vadd.f32 %v1917_v11, %v5969_v59  ;;  %v1919_v12 = vpop.f32.mrb[35].mxu0  ;;  %2661 = vmatmul.mubr.bf16.gmra.mrb[156].mxu1 %v6285_v15 }
 0x2b7   :  { %v2025_v30 = vmax.f32 %v4375_v24, 0.0  ;;  %v4377_v32 = vadd.f32 %v1919_v12, %v5972_v10  ;;  %2780 = vmatpush1.bf16.msra.mxu1 %v4937_v18  ;;  %v4978_v24 = vld [vmem:[%s7052_s7 + $0xe4] ss:$8 sps:$4 sm:$0xff]  }
 0x2b8   :  { %2088 = vst [vmem:[%s7054_s10 + $0x100] sm:$0xff] %v2024_v25  ;;  %v2026_v42 = vmax.f32 %v4376_v26, 0.0  ;;  %2781 = vmatprep.subr.bf16.mxu1 %v4945_v21  ;;  %v4976_v21 = vld [vmem:[%s7052_s7 + $0xe0] ss:$8 sps:$4 sm:$0xff]   ;;  %3560 = vmatprep.subr.bf16.mxu0 %v4978_v24 }
 0x2b9   :  { %2089 = vst [vmem:[%s7054_s10 + $0x108] sm:$0xff] %v2025_v30  ;;  %v2027_v43 = vmax.f32 %v4377_v32, 0.0  ;;  %3561 = vmatpush1.bf16.msra.mxu0 %v4976_v21 }
 0x2ba   :  { %2090 = vst [vmem:[%s7054_s10 + $0x110] sm:$0xff] %v2026_v42  ;;  %v6322_v44 = vpack.c.bf16 %v2026_v42, %v2024_v25 }
 0x2bb   :  { %2091 = vst [vmem:[%s7054_s10 + $0x118] sm:$0xff] %v2027_v43  ;;  %v6327_v45 = vpack.c.bf16 %v2027_v43, %v2025_v30  ;;  %v1923_v14 = vpop.f32.mrb[36].mxu0  ;;  %2782 = vmatpush1.bf16.msra.mxu1 %v4943_v28 }
 0x2bc   :  { %v4378_v48 = vadd.f32 %v1923_v14, %v5969_v59  ;;  %v1925_v49 = vpop.f32.mrb[37].mxu0 }
 0x2bd   :  { %v4379_v50 = vadd.f32 %v1925_v49, %v5972_v10  ;;  %v1927_v54 = vpop.f32.mrb[38].mxu0  ;;  %2670 = vmatprep.mubr.bf16.mxu1 %v6327_v45 }
 0x2be   :  { %v2028_v55 = vmax.f32 %v4378_v48, 0.0  ;;  %v4380_v58 = vadd.f32 %v1927_v54, %v5969_v59  ;;  %v1929_v60 = vpop.f32.mrb[39].mxu0  ;;  %2671 = vmatmul.mubr.bf16.gmra.mrb[160].mxu1 %v6322_v44 }
 0x2bf   :  { %v2029_v62 = vmax.f32 %v4379_v50, 0.0  ;;  %v4381_v63 = vadd.f32 %v1929_v60, %v5972_v10 }
 0x2c0   :  { %2092 = vst [vmem:[%s7054_s10 + $0x120] sm:$0xff] %v2028_v55  ;;  %v2030_v4 = vmax.f32 %v4380_v58, 0.0 }
 0x2c1   :  { %2093 = vst [vmem:[%s7054_s10 + $0x128] sm:$0xff] %v2029_v62  ;;  %v2031_v5 = vmax.f32 %v4381_v63, 0.0 }
 0x2c2   :  { %2094 = vst [vmem:[%s7054_s10 + $0x130] sm:$0xff] %v2030_v4  ;;  %v6350_v8 = vpack.c.bf16 %v2030_v4, %v2028_v55 }
 0x2c3   :  { %2095 = vst [vmem:[%s7054_s10 + $0x138] sm:$0xff] %v2031_v5  ;;  %v6355_v13 = vpack.c.bf16 %v2031_v5, %v2029_v62  ;;  %v1933_v9 = vpop.f32.mrb[40].mxu0 }
 0x2c4   :  { %v4382_v39 = vadd.f32 %v1933_v9, %v5969_v59  ;;  %v1935_v47 = vpop.f32.mrb[41].mxu0 }
 0x2c5   :  { %v4383_v52 = vadd.f32 %v1935_v47, %v5972_v10  ;;  %v1937_v53 = vpop.f32.mrb[42].mxu0  ;;  %2680 = vmatprep.mubr.bf16.mxu1 %v6355_v13 }
 0x2c6   :  { %v2032_v61 = vmax.f32 %v4382_v39, 0.0  ;;  %v4384_v17 = vadd.f32 %v1937_v53, %v5969_v59  ;;  %v1939_v18 = vpop.f32.mrb[43].mxu0  ;;  %2681 = vmatmul.mubr.bf16.gmra.mrb[164].mxu1 %v6350_v8  ;;  %v4981_v39 = vld [vmem:[%s7052_s7 + $0xf4] ss:$8 sps:$4 sm:$0xff]   ;;  %v4979_v53 = vld [vmem:[%s7052_s7 + $0xf0] ss:$8 sps:$4 sm:$0xff]  }
 0x2c7   :  { %v2033_v19 = vmax.f32 %v4383_v52, 0.0  ;;  %v4385_v20 = vadd.f32 %v1939_v18, %v5972_v10  ;;  %3562 = vmatprep.subr.bf16.mxu0 %v4981_v39 }
 0x2c8   :  { %2096 = vst [vmem:[%s7054_s10 + $0x140] sm:$0xff] %v2032_v61  ;;  %v2034_v11 = vmax.f32 %v4384_v17, 0.0  ;;  %3563 = vmatpush1.bf16.msra.mxu0 %v4979_v53 }
 0x2c9   :  { %2097 = vst [vmem:[%s7054_s10 + $0x148] sm:$0xff] %v2033_v19  ;;  %v2035_v25 = vmax.f32 %v4385_v20, 0.0 }
 0x2ca   :  { %2098 = vst [vmem:[%s7054_s10 + $0x150] sm:$0xff] %v2034_v11  ;;  %v6378_v26 = vpack.c.bf16 %v2034_v11, %v2032_v61 }
 0x2cb   :  { %2099 = vst [vmem:[%s7054_s10 + $0x158] sm:$0xff] %v2035_v25  ;;  %v6383_v12 = vpack.c.bf16 %v2035_v25, %v2033_v19  ;;  %v1943_v28 = vpop.f32.mrb[44].mxu0 }
 0x2cc   :  { %v4386_v30 = vadd.f32 %v1943_v28, %v5969_v59  ;;  %v1945_v32 = vpop.f32.mrb[45].mxu0 }
 0x2cd   :  { %v4387_v35 = vadd.f32 %v1945_v32, %v5972_v10  ;;  %v1947_v46 = vpop.f32.mrb[46].mxu0  ;;  %2690 = vmatprep.mubr.bf16.mxu1 %v6383_v12 }
 0x2ce   :  { %v2036_v42 = vmax.f32 %v4386_v30, 0.0  ;;  %v4388_v43 = vadd.f32 %v1947_v46, %v5969_v59  ;;  %v1949_v14 = vpop.f32.mrb[47].mxu0  ;;  %2691 = vmatmul.mubr.bf16.gmra.mrb[168].mxu1 %v6378_v26 }
 0x2cf   :  { %v2037_v48 = vmax.f32 %v4387_v35, 0.0  ;;  %v4389_v49 = vadd.f32 %v1949_v14, %v5972_v10  ;;  %v4984_v14 = vld [vmem:[%s7052_s7 + $0x104] ss:$8 sps:$4 sm:$0xff]  }
 0x2d0   :  { %2100 = vst [vmem:[%s7054_s10 + $0x160] sm:$0xff] %v2036_v42  ;;  %v2038_v50 = vmax.f32 %v4388_v43, 0.0  ;;  %3725 = vmatprep.subr.bf16.mxu0 %v4984_v14  ;;  %v4985_v14 = vld [vmem:[%s7052_s7 + $0x110] ss:$8 sps:$4 sm:$0xff]  }
 0x2d1   :  { %2101 = vst [vmem:[%s7054_s10 + $0x168] sm:$0xff] %v2037_v48  ;;  %v2039_v54 = vmax.f32 %v4389_v49, 0.0 }
 0x2d2   :  { %2102 = vst [vmem:[%s7054_s10 + $0x170] sm:$0xff] %v2038_v50  ;;  %v6400_v55 = vpack.c.bf16 %v2038_v50, %v2036_v42 }
 0x2d3   :  { %2103 = vst [vmem:[%s7054_s10 + $0x178] sm:$0xff] %v2039_v54  ;;  %v6405_v58 = vpack.c.bf16 %v2039_v54, %v2037_v48  ;;  %v1953_v60 = vpop.f32.mrb[48].mxu0 }
 0x2d4   :  { %v4390_v62 = vadd.f32 %v1953_v60, %v5969_v59  ;;  %v1955_v63 = vpop.f32.mrb[49].mxu0 }
 0x2d5   :  { %v4391_v0 = vadd.f32 %v1955_v63, %v5972_v10  ;;  %v1957_v3 = vpop.f32.mrb[50].mxu0  ;;  %2700 = vmatprep.mubr.bf16.mxu1 %v6405_v58 }
 0x2d6   :  { %v2040_v4 = vmax.f32 %v4390_v62, 0.0  ;;  %v4392_v5 = vadd.f32 %v1957_v3, %v5969_v59  ;;  %v1959_v9 = vpop.f32.mrb[51].mxu0  ;;  %2701 = vmatmul.mubr.bf16.gmra.mrb[172].mxu1 %v6400_v55 }
 0x2d7   :  { %v2041_v47 = vmax.f32 %v4391_v0, 0.0  ;;  %v4393_v52 = vadd.f32 %v1959_v9, %v5972_v10 }
 0x2d8   :  { %2104 = vst [vmem:[%s7054_s10 + $0x180] sm:$0xff] %v2040_v4  ;;  %v2042_v61 = vmax.f32 %v4392_v5, 0.0 }
 0x2d9   :  { %2105 = vst [vmem:[%s7054_s10 + $0x188] sm:$0xff] %v2041_v47  ;;  %v2043_v17 = vmax.f32 %v4393_v52, 0.0 }
 0x2da   :  { %2106 = vst [vmem:[%s7054_s10 + $0x190] sm:$0xff] %v2042_v61  ;;  %v6428_v18 = vpack.c.bf16 %v2042_v61, %v2040_v4 }
 0x2db   :  { %2107 = vst [vmem:[%s7054_s10 + $0x198] sm:$0xff] %v2043_v17  ;;  %v6433_v19 = vpack.c.bf16 %v2043_v17, %v2041_v47  ;;  %v1963_v20 = vpop.f32.mrb[52].mxu0 }
 0x2dc   :  { %v4394_v21 = vadd.f32 %v1963_v20, %v5969_v59  ;;  %v1965_v24 = vpop.f32.mrb[53].mxu0 }
 0x2dd   :  { %v4395_v11 = vadd.f32 %v1965_v24, %v5972_v10  ;;  %v1967_v25 = vpop.f32.mrb[54].mxu0  ;;  %2710 = vmatprep.mubr.bf16.mxu1 %v6433_v19 }
 0x2de   :  { %v2044_v28 = vmax.f32 %v4394_v21, 0.0  ;;  %v4396_v30 = vadd.f32 %v1967_v25, %v5969_v59  ;;  %v1969_v32 = vpop.f32.mrb[55].mxu0  ;;  %2711 = vmatmul.mubr.bf16.gmra.mrb[176].mxu1 %v6428_v18 }
 0x2df   :  { %v2045_v35 = vmax.f32 %v4395_v11, 0.0  ;;  %v4397_v46 = vadd.f32 %v1969_v32, %v5972_v10 }
 0x2e0   :  { %2108 = vst [vmem:[%s7054_s10 + $0x1a0] sm:$0xff] %v2044_v28  ;;  %v2046_v42 = vmax.f32 %v4396_v30, 0.0 }
 0x2e1   :  { %2109 = vst [vmem:[%s7054_s10 + $0x1a8] sm:$0xff] %v2045_v35  ;;  %v2047_v43 = vmax.f32 %v4397_v46, 0.0 }
 0x2e2   :  { %2110 = vst [vmem:[%s7054_s10 + $0x1b0] sm:$0xff] %v2046_v42  ;;  %v6453_v48 = vpack.c.bf16 %v2046_v42, %v2044_v28 }
 0x2e3   :  { %2111 = vst [vmem:[%s7054_s10 + $0x1b8] sm:$0xff] %v2047_v43  ;;  %v6458_v49 = vpack.c.bf16 %v2047_v43, %v2045_v35  ;;  %v1973_v50 = vpop.f32.mrb[56].mxu0 }
 0x2e4   :  { %v4398_v54 = vadd.f32 %v1973_v50, %v5969_v59  ;;  %v1975_v60 = vpop.f32.mrb[57].mxu0 }
 0x2e5   :  { %v4399_v62 = vadd.f32 %v1975_v60, %v5972_v10  ;;  %v1977_v63 = vpop.f32.mrb[58].mxu0  ;;  %2720 = vmatprep.mubr.bf16.mxu1 %v6458_v49  ;;  %v4990_v60 = vld [vmem:[%s7052_s7 + $0x124] ss:$8 sps:$4 sm:$0xff]  }
 0x2e6   :  { %v2048_v0 = vmax.f32 %v4398_v54, 0.0  ;;  %v4400_v3 = vadd.f32 %v1977_v63, %v5969_v59  ;;  %v1979_v4 = vpop.f32.mrb[59].mxu0  ;;  %2721 = vmatmul.mubr.bf16.gmra.mrb[180].mxu1 %v6453_v48 }
 0x2e7   :  { %v2049_v5 = vmax.f32 %v4399_v62, 0.0  ;;  %v4401_v9 = vadd.f32 %v1979_v4, %v5972_v10 }
 0x2e8   :  { %2112 = vst [vmem:[%s7054_s10 + $0x1c0] sm:$0xff] %v2048_v0  ;;  %v2050_v39 = vmax.f32 %v4400_v3, 0.0 }
 0x2e9   :  { %2113 = vst [vmem:[%s7054_s10 + $0x1c8] sm:$0xff] %v2049_v5  ;;  %v2051_v47 = vmax.f32 %v4401_v9, 0.0 }
 0x2ea   :  { %2114 = vst [vmem:[%s7054_s10 + $0x1d0] sm:$0xff] %v2050_v39  ;;  %v6475_v52 = vpack.c.bf16 %v2050_v39, %v2048_v0  ;;  %v4993_v39 = vld [vmem:[%s7052_s7 + $0x134] ss:$8 sps:$4 sm:$0xff]  }
 0x2eb   :  { %2115 = vst [vmem:[%s7054_s10 + $0x1d8] sm:$0xff] %v2051_v47  ;;  %v6480_v53 = vpack.c.bf16 %v2051_v47, %v2049_v5  ;;  %v1983_v61 = vpop.f32.mrb[60].mxu0  ;;  %v4988_v5 = vld [vmem:[%s7052_s7 + $0x120] ss:$8 sps:$4 sm:$0xff]  }
 0x2ec   :  { %v4402_v17 = vadd.f32 %v1983_v61, %v5969_v59  ;;  %v1985_v20 = vpop.f32.mrb[61].mxu0 }
 0x2ed   :  { %v4403_v21 = vadd.f32 %v1985_v20, %v5972_v10  ;;  %v1987_v24 = vpop.f32.mrb[62].mxu0  ;;  %2730 = vmatprep.mubr.bf16.mxu1 %v6480_v53 }
 0x2ee   :  { %v2052_v11 = vmax.f32 %v4402_v17, 0.0  ;;  %v4404_v25 = vadd.f32 %v1987_v24, %v5969_v59  ;;  %v1989_v28 = vpop.f32.mrb[63].mxu0  ;;  %2731 = vmatmul.mubr.bf16.gmra.mrb[184].mxu1 %v6475_v52 }
 0x2ef   :  { %v2053_v30 = vmax.f32 %v4403_v21, 0.0  ;;  %v4405_v32 = vadd.f32 %v1989_v28, %v5972_v10  ;;  %v4991_v21 = vld [vmem:[%s7052_s7 + $0x130] ss:$8 sps:$4 sm:$0xff]  }
 0x2f0   :  { %2116 = vst [vmem:[%s7054_s10 + $0x1e0] sm:$0xff] %v2052_v11  ;;  %v2054_v35 = vmax.f32 %v4404_v25, 0.0  ;;  %v4996_v25 = vld [vmem:[%s7052_s7 + $0x144] ss:$8 sps:$4 sm:$0xff]  }
 0x2f1   :  { %2117 = vst [vmem:[%s7054_s10 + $0x1e8] sm:$0xff] %v2053_v30  ;;  %v2055_v46 = vmax.f32 %v4405_v32, 0.0 }
 0x2f2   :  { %2118 = vst [vmem:[%s7054_s10 + $0x1f0] sm:$0xff] %v2054_v35  ;;  %v6497_v59 = vpack.c.bf16 %v2054_v35, %v2052_v11 }
 0x2f3   :  { %2119 = vst [vmem:[%s7054_s10 + $0x1f8] sm:$0xff] %v2055_v46  ;;  %v6502_v10 = vpack.c.bf16 %v2055_v46, %v2053_v30 }
 0x2f5   :  { %2740 = vmatprep.mubr.bf16.mxu1 %v6502_v10 }
 0x2f6   :  { %2741 = vmatmul.mubr.bf16.gmra.mrb[188].mxu1 %v6497_v59 }
 0x2f7   :  { %2783 = vmatprep.mubr.bf16.mxu1 %v6016_v33 }
 0x2fe   :  { %2784 = vmatmul.mubr.bf16.vlgmr.msra.gmra.mrb[192].mxu1 %v6008_v31  ;;  %v6530_v31 = vld [vmem:[%s7055_s6] sm:$0xf] }
 0x2ff   :  { %2793 = vmatprep.mubr.bf16.mxu1 %v6050_v57  ;;  %v6535_v33 = vrot.slane %v6530_v31, %v5592_v36 }
 0x306   :  { %2794 = vmatmul.mubr.bf16.gmra.mrb[196].mxu1 %v6045_v56  ;;  %v6540_v56 = vrot.slane %v6530_v31, %v5600_v41 }
 0x307   :  { %2803 = vmatprep.mubr.bf16.mxu1 %v6090_v7 }
 0x30e   :  { %2804 = vmatmul.mubr.bf16.gmra.mrb[200].mxu1 %v6085_v6 }
 0x30f   :  { %2813 = vmatprep.mubr.bf16.mxu1 %v6130_v38 }
 0x316   :  { %2814 = vmatmul.mubr.bf16.gmra.mrb[204].mxu1 %v6125_v37 }
 0x317   :  { %2823 = vmatprep.mubr.bf16.mxu1 %v6170_v2 }
 0x31e   :  { %2824 = vmatmul.mubr.bf16.gmra.mrb[208].mxu1 %v6165_v1 }
 0x31f   :  { %2833 = vmatprep.mubr.bf16.mxu1 %v6210_v23 }
 0x326   :  { %2834 = vmatmul.mubr.bf16.gmra.mrb[212].mxu1 %v6205_v22 }
 0x327   :  { %2843 = vmatprep.mubr.bf16.mxu1 %v6250_v40 }
 0x32e   :  { %2844 = vmatmul.mubr.bf16.gmra.mrb[216].mxu1 %v6245_v51 }
 0x32f   :  { %2853 = vmatprep.mubr.bf16.mxu1 %v6290_v16 }
 0x336   :  { %2854 = vmatmul.mubr.bf16.gmra.mrb[220].mxu1 %v6285_v15 }
 0x337   :  { %2863 = vmatprep.mubr.bf16.mxu1 %v6327_v45 }
 0x33e   :  { %2864 = vmatmul.mubr.bf16.gmra.mrb[224].mxu1 %v6322_v44 }
 0x33f   :  { %2873 = vmatprep.mubr.bf16.mxu1 %v6355_v13 }
 0x346   :  { %2874 = vmatmul.mubr.bf16.gmra.mrb[228].mxu1 %v6350_v8  ;;  %v4982_v8 = vld [vmem:[%s7052_s7 + $0x100] ss:$8 sps:$4 sm:$0xff]  }
 0x347   :  { %2883 = vmatprep.mubr.bf16.mxu1 %v6383_v12  ;;  %v4987_v12 = vld [vmem:[%s7052_s7 + $0x114] ss:$8 sps:$4 sm:$0xff]  }
 0x34e   :  { %2884 = vmatmul.mubr.bf16.gmra.mrb[232].mxu1 %v6378_v26 }
 0x34f   :  { %2893 = vmatprep.mubr.bf16.mxu1 %v6405_v58 }
 0x351   :  { %v2592_v57 = vpop.f32.mrb[128].mxu1 }
 0x352   :  { %v2593_v6 = vadd.f32 %v2592_v57, %v6535_v33  ;;  %v2594_v7 = vpop.f32.mrb[129].mxu1  ;;  %v4994_v57 = vld [vmem:[%s7052_s7 + $0x140] ss:$8 sps:$4 sm:$0xff]  }
 0x353   :  { %v2595_v37 = vadd.f32 %v2594_v7, %v6540_v56  ;;  %v2596_v38 = vpop.f32.mrb[130].mxu1  ;;  %v4999_v7 = vld [vmem:[%s7052_s7 + $0x154] ss:$8 sps:$4 sm:$0xff]  }
 0x354   :  { %v2597_v1 = vadd.f32 %v2596_v38, %v6535_v33  ;;  %v2598_v2 = vpop.f32.mrb[131].mxu1  ;;  %v2944_v23 = vmax.f32 %v2593_v6, 0.0 }
 0x355   :  { %v2599_v22 = vadd.f32 %v2598_v2, %v6540_v56  ;;  %v2945_v40 = vmax.f32 %v2595_v37, 0.0 }
 0x356   :  { %v2948_v51 = vmax.f32 %v2597_v1, 0.0  ;;  %2894 = vmatmul.mubr.bf16.gmra.mrb[236].mxu1 %v6400_v55 }
 0x357   :  { %v2949_v15 = vmax.f32 %v2599_v22, 0.0  ;;  %2903 = vmatprep.mubr.bf16.mxu1 %v6433_v19  ;;  %v4997_v22 = vld [vmem:[%s7052_s7 + $0x150] ss:$8 sps:$4 sm:$0xff]  }
 0x358   :  { %v3072_v16 = vpack.c.bf16 %v2948_v51, %v2944_v23 }
 0x359   :  { %v3073_v44 = vpack.c.bf16 %v2949_v15, %v2945_v40  ;;  %v2602_v45 = vpop.f32.mrb[132].mxu1  ;;  %v5002_v40 = vld [vmem:[%s7052_s7 + $0x164] ss:$8 sps:$4 sm:$0xff]  }
 0x35a   :  { %v2603_v13 = vadd.f32 %v2602_v45, %v6535_v33  ;;  %v2604_v26 = vpop.f32.mrb[133].mxu1 }
 0x35b   :  { %v2605_v55 = vadd.f32 %v2604_v26, %v6540_v56  ;;  %v2606_v58 = vpop.f32.mrb[134].mxu1  ;;  %3564 = vmatprep.mubr.bf16.mxu0 %v3073_v44 }
 0x35c   :  { %v2607_v19 = vadd.f32 %v2606_v58, %v6535_v33  ;;  %v2608_v42 = vpop.f32.mrb[135].mxu1  ;;  %3565 = vmatmul.mubr.bf16.vlgmr.msra.gmra.mrb[64].mxu0 %v3072_v16  ;;  %v2952_v50 = vmax.f32 %v2603_v13, 0.0  ;;  %v5000_v13 = vld [vmem:[%s7052_s7 + $0x160] ss:$8 sps:$4 sm:$0xff]  }
 0x35d   :  { %v2609_v43 = vadd.f32 %v2608_v42, %v6540_v56  ;;  %3726 = vmatpush1.bf16.msra.mxu0 %v4982_v8  ;;  %v2953_v62 = vmax.f32 %v2605_v55, 0.0 }
 0x35e   :  { %v2956_v54 = vmax.f32 %v2607_v19, 0.0  ;;  %2904 = vmatmul.mubr.bf16.gmra.mrb[240].mxu1 %v6428_v18  ;;  %3727 = vmatprep.subr.bf16.mxu0 %v4987_v12  ;;  %v5005_v12 = vld [vmem:[%s7052_s7 + $0x174] ss:$8 sps:$4 sm:$0xff]  }
 0x35f   :  { %v2957_v63 = vmax.f32 %v2609_v43, 0.0  ;;  %2913 = vmatprep.mubr.bf16.mxu1 %v6458_v49  ;;  %v5003_v43 = vld [vmem:[%s7052_s7 + $0x170] ss:$8 sps:$4 sm:$0xff]  }
 0x360   :  { %v3076_v0 = vpack.c.bf16 %v2956_v54, %v2952_v50  ;;  %v5008_v54 = vld [vmem:[%s7052_s7 + $0x184] ss:$8 sps:$4 sm:$0xff]  }
 0x361   :  { %v3077_v3 = vpack.c.bf16 %v2957_v63, %v2953_v62  ;;  %v2612_v4 = vpop.f32.mrb[136].mxu1  ;;  %3728 = vmatpush1.bf16.msra.mxu0 %v4985_v14 }
 0x362   :  { %v2613_v9 = vadd.f32 %v2612_v4, %v6535_v33  ;;  %v2614_v18 = vpop.f32.mrb[137].mxu1  ;;  %3729 = vmatprep.subr.bf16.mxu0 %v4990_v60  ;;  %v5006_v4 = vld [vmem:[%s7052_s7 + $0x180] ss:$8 sps:$4 sm:$0xff]  }
 0x363   :  { %v2615_v47 = vadd.f32 %v2614_v18, %v6540_v56  ;;  %v2616_v61 = vpop.f32.mrb[138].mxu1  ;;  %3574 = vmatprep.mubr.bf16.mxu0 %v3077_v3 }
 0x364   :  { %v2617_v49 = vadd.f32 %v2616_v61, %v6535_v33  ;;  %v2618_v17 = vpop.f32.mrb[139].mxu1  ;;  %3575 = vmatmul.mubr.bf16.gmra.mrb[68].mxu0 %v3076_v0  ;;  %v2960_v24 = vmax.f32 %v2613_v9, 0.0 }
 0x365   :  { %v2619_v20 = vadd.f32 %v2618_v17, %v6540_v56  ;;  %3730 = vmatpush1.bf16.msra.mxu0 %v4988_v5  ;;  %v2961_v28 = vmax.f32 %v2615_v47, 0.0  ;;  %v5009_v17 = vld [vmem:[%s7052_s7 + $0x190] ss:$8 sps:$4 sm:$0xff]  }
 0x366   :  { %v2964_v11 = vmax.f32 %v2617_v49, 0.0  ;;  %2914 = vmatmul.mubr.bf16.gmra.mrb[244].mxu1 %v6453_v48  ;;  %3731 = vmatprep.subr.bf16.mxu0 %v4993_v39 }
 0x367   :  { %v2965_v30 = vmax.f32 %v2619_v20, 0.0  ;;  %2923 = vmatprep.mubr.bf16.mxu1 %v6480_v53 }
 0x368   :  { %v3080_v32 = vpack.c.bf16 %v2964_v11, %v2960_v24  ;;  %v5014_v24 = vld [vmem:[%s7052_s7 + $0x1a4] ss:$8 sps:$4 sm:$0xff]  }
 0x369   :  { %v3081_v35 = vpack.c.bf16 %v2965_v30, %v2961_v28  ;;  %v2622_v46 = vpop.f32.mrb[140].mxu1  ;;  %3732 = vmatpush1.bf16.msra.mxu0 %v4991_v21 }
 0x36a   :  { %v2623_v6 = vadd.f32 %v2622_v46, %v6535_v33  ;;  %v2624_v48 = vpop.f32.mrb[141].mxu1  ;;  %3733 = vmatprep.subr.bf16.mxu0 %v4996_v25 }
 0x36b   :  { %v2625_v37 = vadd.f32 %v2624_v48, %v6540_v56  ;;  %v2626_v38 = vpop.f32.mrb[142].mxu1  ;;  %3584 = vmatprep.mubr.bf16.mxu0 %v3081_v35  ;;  %v5012_v35 = vld [vmem:[%s7052_s7 + $0x1a0] ss:$8 sps:$4 sm:$0xff]  }
 0x36c   :  { %v2627_v53 = vadd.f32 %v2626_v38, %v6535_v33  ;;  %v2628_v1 = vpop.f32.mrb[143].mxu1  ;;  %3585 = vmatmul.mubr.bf16.gmra.mrb[72].mxu0 %v3080_v32  ;;  %v2968_v23 = vmax.f32 %v2623_v6, 0.0  ;;  %v5017_v6 = vld [vmem:[%s7052_s7 + $0x1b4] ss:$8 sps:$4 sm:$0xff]  }
 0x36d   :  { %v2629_v2 = vadd.f32 %v2628_v1, %v6540_v56  ;;  %3734 = vmatpush1.bf16.msra.mxu0 %v4994_v57  ;;  %v2969_v15 = vmax.f32 %v2625_v37, 0.0  ;;  %v5015_v1 = vld [vmem:[%s7052_s7 + $0x1b0] ss:$8 sps:$4 sm:$0xff]  }
 0x36e   :  { %v2972_v51 = vmax.f32 %v2627_v53, 0.0  ;;  %2924 = vmatmul.mubr.bf16.gmra.mrb[248].mxu1 %v6475_v52  ;;  %3735 = vmatprep.subr.bf16.mxu0 %v4999_v7 }
 0x36f   :  { %v2973_v16 = vmax.f32 %v2629_v2, 0.0  ;;  %2933 = vmatprep.mubr.bf16.mxu1 %v6502_v10 }
 0x370   :  { %v3084_v44 = vpack.c.bf16 %v2972_v51, %v2968_v23  ;;  %v5020_v23 = vld [vmem:[%s7052_s7 + $0x1c4] ss:$8 sps:$4 sm:$0xff]  }
 0x371   :  { %v3085_v45 = vpack.c.bf16 %v2973_v16, %v2969_v15  ;;  %v2632_v8 = vpop.f32.mrb[144].mxu1  ;;  %3736 = vmatpush1.bf16.msra.mxu0 %v4997_v22 }
 0x372   :  { %v2633_v26 = vadd.f32 %v2632_v8, %v6535_v33  ;;  %v2634_v52 = vpop.f32.mrb[145].mxu1  ;;  %3737 = vmatprep.subr.bf16.mxu0 %v5002_v40 }
 0x373   :  { %v2635_v55 = vadd.f32 %v2634_v52, %v6540_v56  ;;  %v2636_v58 = vpop.f32.mrb[146].mxu1  ;;  %3594 = vmatprep.mubr.bf16.mxu0 %v3085_v45  ;;  %v5018_v45 = vld [vmem:[%s7052_s7 + $0x1c0] ss:$8 sps:$4 sm:$0xff]  }
 0x374   :  { %v2637_v10 = vadd.f32 %v2636_v58, %v6535_v33  ;;  %v2638_v19 = vpop.f32.mrb[147].mxu1  ;;  %3595 = vmatmul.mubr.bf16.gmra.mrb[76].mxu0 %v3084_v44  ;;  %v2976_v14 = vmax.f32 %v2633_v26, 0.0  ;;  %v5023_v26 = vld [vmem:[%s7052_s7 + $0x1d4] ss:$8 sps:$4 sm:$0xff]  }
 0x375   :  { %v2639_v42 = vadd.f32 %v2638_v19, %v6540_v56  ;;  %3738 = vmatpush1.bf16.msra.mxu0 %v5000_v13  ;;  %v2977_v60 = vmax.f32 %v2635_v55, 0.0  ;;  %v5021_v19 = vld [vmem:[%s7052_s7 + $0x1d0] ss:$8 sps:$4 sm:$0xff]  }
 0x376   :  { %v2980_v50 = vmax.f32 %v2637_v10, 0.0  ;;  %2934 = vmatmul.mubr.bf16.gmra.mrb[252].mxu1 %v6497_v59  ;;  %3739 = vmatprep.subr.bf16.mxu0 %v5005_v12  ;;  %v5011_v59 = vld [vmem:[%s7052_s7 + $0x194] ss:$8 sps:$4 sm:$0xff]  }
 0x377   :  { %v2981_v62 = vmax.f32 %v2639_v42, 0.0 }
 0x378   :  { %v3088_v63 = vpack.c.bf16 %v2980_v50, %v2976_v14  ;;  %v5026_v14 = vld [vmem:[%s7052_s7 + $0x1e4] ss:$8 sps:$4 sm:$0xff]  }
 0x379   :  { %v3089_v0 = vpack.c.bf16 %v2981_v62, %v2977_v60  ;;  %v2642_v3 = vpop.f32.mrb[148].mxu1  ;;  %3740 = vmatpush1.bf16.msra.mxu0 %v5003_v43 }
 0x37a   :  { %v2643_v5 = vadd.f32 %v2642_v3, %v6535_v33  ;;  %v2644_v9 = vpop.f32.mrb[149].mxu1  ;;  %3741 = vmatprep.subr.bf16.mxu0 %v5008_v54 }
 0x37b   :  { %v2645_v18 = vadd.f32 %v2644_v9, %v6540_v56  ;;  %v2646_v39 = vpop.f32.mrb[150].mxu1  ;;  %3604 = vmatprep.mubr.bf16.mxu0 %v3089_v0  ;;  %v5024_v0 = vld [vmem:[%s7052_s7 + $0x1e0] ss:$8 sps:$4 sm:$0xff]  }
 0x37c   :  { %v2647_v47 = vadd.f32 %v2646_v39, %v6535_v33  ;;  %v2648_v61 = vpop.f32.mrb[151].mxu1  ;;  %3605 = vmatmul.mubr.bf16.gmra.mrb[80].mxu0 %v3088_v63  ;;  %v2984_v20 = vmax.f32 %v2643_v5, 0.0  ;;  %v5029_v5 = vld [vmem:[%s7052_s7 + $0x1f4] ss:$8 sps:$4 sm:$0xff]  }
 0x37d   :  { %v2649_v49 = vadd.f32 %v2648_v61, %v6540_v56  ;;  %3742 = vmatpush1.bf16.msra.mxu0 %v5006_v4  ;;  %v2985_v11 = vmax.f32 %v2645_v18, 0.0  ;;  %v5027_v61 = vld [vmem:[%s7052_s7 + $0x1f0] ss:$8 sps:$4 sm:$0xff]  }
 0x37e   :  { %v2988_v21 = vmax.f32 %v2647_v47, 0.0  ;;  %3743 = vmatprep.subr.bf16.mxu0 %v5011_v59 }
 0x37f   :  { %v2989_v25 = vmax.f32 %v2649_v49, 0.0 }
 0x380   :  { %v3092_v28 = vpack.c.bf16 %v2988_v21, %v2984_v20 }
 0x381   :  { %v3093_v30 = vpack.c.bf16 %v2989_v25, %v2985_v11  ;;  %v2652_v32 = vpop.f32.mrb[152].mxu1  ;;  %3744 = vmatpush1.bf16.msra.mxu0 %v5009_v17 }
 0x382   :  { %v2653_v46 = vadd.f32 %v2652_v32, %v6535_v33  ;;  %v2654_v57 = vpop.f32.mrb[153].mxu1  ;;  %3745 = vmatprep.subr.bf16.mxu0 %v5014_v24 }
 0x383   :  { %v2655_v48 = vadd.f32 %v2654_v57, %v6540_v56  ;;  %v2656_v7 = vpop.f32.mrb[154].mxu1  ;;  %3614 = vmatprep.mubr.bf16.mxu0 %v3093_v30 }
 0x384   :  { %v2657_v37 = vadd.f32 %v2656_v7, %v6535_v33  ;;  %v2658_v38 = vpop.f32.mrb[155].mxu1  ;;  %3615 = vmatmul.mubr.bf16.gmra.mrb[84].mxu0 %v3092_v28  ;;  %v2992_v2 = vmax.f32 %v2653_v46, 0.0 }
 0x385   :  { %v2659_v53 = vadd.f32 %v2658_v38, %v6540_v56  ;;  %3746 = vmatpush1.bf16.msra.mxu0 %v5012_v35  ;;  %v2993_v51 = vmax.f32 %v2655_v48, 0.0 }
 0x386   :  { %v2996_v22 = vmax.f32 %v2657_v37, 0.0  ;;  %3747 = vmatprep.subr.bf16.mxu0 %v5017_v6 }
 0x387   :  { %v2997_v40 = vmax.f32 %v2659_v53, 0.0 }
 0x388   :  { %v3096_v15 = vpack.c.bf16 %v2996_v22, %v2992_v2 }
 0x389   :  { %v3097_v16 = vpack.c.bf16 %v2997_v40, %v2993_v51  ;;  %v2662_v44 = vpop.f32.mrb[156].mxu1  ;;  %3748 = vmatpush1.bf16.msra.mxu0 %v5015_v1 }
 0x38a   :  { %v2663_v8 = vadd.f32 %v2662_v44, %v6535_v33  ;;  %v2664_v13 = vpop.f32.mrb[157].mxu1  ;;  %3749 = vmatprep.subr.bf16.mxu0 %v5020_v23 }
 0x38b   :  { %v2665_v52 = vadd.f32 %v2664_v13, %v6540_v56  ;;  %v2666_v12 = vpop.f32.mrb[158].mxu1  ;;  %3624 = vmatprep.mubr.bf16.mxu0 %v3097_v16 }
 0x38c   :  { %v2667_v55 = vadd.f32 %v2666_v12, %v6535_v33  ;;  %v2668_v58 = vpop.f32.mrb[159].mxu1  ;;  %3625 = vmatmul.mubr.bf16.gmra.mrb[88].mxu0 %v3096_v15  ;;  %v3000_v42 = vmax.f32 %v2663_v8, 0.0 }
 0x38d   :  { %v2669_v10 = vadd.f32 %v2668_v58, %v6540_v56  ;;  %3750 = vmatpush1.bf16.msra.mxu0 %v5018_v45  ;;  %v3001_v50 = vmax.f32 %v2665_v52, 0.0 }
 0x38e   :  { %v3004_v43 = vmax.f32 %v2667_v55, 0.0  ;;  %3751 = vmatprep.subr.bf16.mxu0 %v5023_v26 }
 0x38f   :  { %v3005_v54 = vmax.f32 %v2669_v10, 0.0 }
 0x390   :  { %v3100_v60 = vpack.c.bf16 %v3004_v43, %v3000_v42 }
 0x391   :  { %v3101_v62 = vpack.c.bf16 %v3005_v54, %v3001_v50  ;;  %v2672_v63 = vpop.f32.mrb[160].mxu1  ;;  %3752 = vmatpush1.bf16.msra.mxu0 %v5021_v19 }
 0x392   :  { %v2673_v3 = vadd.f32 %v2672_v63, %v6535_v33  ;;  %v2674_v4 = vpop.f32.mrb[161].mxu1  ;;  %3753 = vmatprep.subr.bf16.mxu0 %v5026_v14 }
 0x393   :  { %v2675_v9 = vadd.f32 %v2674_v4, %v6540_v56  ;;  %v2676_v59 = vpop.f32.mrb[162].mxu1  ;;  %3634 = vmatprep.mubr.bf16.mxu0 %v3101_v62 }
 0x394   :  { %v2677_v18 = vadd.f32 %v2676_v59, %v6535_v33  ;;  %v2678_v39 = vpop.f32.mrb[163].mxu1  ;;  %3635 = vmatmul.mubr.bf16.gmra.mrb[92].mxu0 %v3100_v60  ;;  %v3008_v49 = vmax.f32 %v2673_v3, 0.0 }
 0x395   :  { %v2679_v47 = vadd.f32 %v2678_v39, %v6540_v56  ;;  %3754 = vmatpush1.bf16.msra.mxu0 %v5024_v0  ;;  %v3009_v20 = vmax.f32 %v2675_v9, 0.0 }
 0x396   :  { %v3012_v17 = vmax.f32 %v2677_v18, 0.0  ;;  %3755 = vmatprep.subr.bf16.mxu0 %v5029_v5 }
 0x397   :  { %v3013_v21 = vmax.f32 %v2679_v47, 0.0 }
 0x398   :  { %v3104_v24 = vpack.c.bf16 %v3012_v17, %v3008_v49 }
 0x399   :  { %v3105_v11 = vpack.c.bf16 %v3013_v21, %v3009_v20  ;;  %v2682_v25 = vpop.f32.mrb[164].mxu1  ;;  %3756 = vmatpush1.bf16.msra.mxu0 %v5027_v61 }
 0x39a   :  { %v2683_v28 = vadd.f32 %v2682_v25, %v6535_v33  ;;  %v2684_v30 = vpop.f32.mrb[165].mxu1 }
 0x39b   :  { %v2685_v32 = vadd.f32 %v2684_v30, %v6540_v56  ;;  %v2686_v35 = vpop.f32.mrb[166].mxu1  ;;  %3644 = vmatprep.mubr.bf16.mxu0 %v3105_v11 }
 0x39c   :  { %v2687_v46 = vadd.f32 %v2686_v35, %v6535_v33  ;;  %v2688_v57 = vpop.f32.mrb[167].mxu1  ;;  %3645 = vmatmul.mubr.bf16.gmra.mrb[96].mxu0 %v3104_v24  ;;  %v3016_v48 = vmax.f32 %v2683_v28, 0.0 }
 0x39d   :  { %v2689_v6 = vadd.f32 %v2688_v57, %v6540_v56  ;;  %v3017_v37 = vmax.f32 %v2685_v32, 0.0 }
 0x39e   :  { %v3020_v7 = vmax.f32 %v2687_v46, 0.0 }
 0x39f   :  { %v3021_v38 = vmax.f32 %v2689_v6, 0.0 }
 0x3a0   :  { %v3108_v53 = vpack.c.bf16 %v3020_v7, %v3016_v48 }
 0x3a1   :  { %v3109_v1 = vpack.c.bf16 %v3021_v38, %v3017_v37  ;;  %v2692_v2 = vpop.f32.mrb[168].mxu1 }
 0x3a2   :  { %v2693_v22 = vadd.f32 %v2692_v2, %v6535_v33  ;;  %v2694_v23 = vpop.f32.mrb[169].mxu1 }
 0x3a3   :  { %v2695_v51 = vadd.f32 %v2694_v23, %v6540_v56  ;;  %v2696_v40 = vpop.f32.mrb[170].mxu1  ;;  %3654 = vmatprep.mubr.bf16.mxu0 %v3109_v1 }
 0x3a4   :  { %v2697_v15 = vadd.f32 %v2696_v40, %v6535_v33  ;;  %v2698_v16 = vpop.f32.mrb[171].mxu1  ;;  %3655 = vmatmul.mubr.bf16.gmra.mrb[100].mxu0 %v3108_v53  ;;  %v3024_v45 = vmax.f32 %v2693_v22, 0.0 }
 0x3a5   :  { %v2699_v44 = vadd.f32 %v2698_v16, %v6540_v56  ;;  %v3025_v13 = vmax.f32 %v2695_v51, 0.0 }
 0x3a6   :  { %v3028_v8 = vmax.f32 %v2697_v15, 0.0 }
 0x3a7   :  { %v3029_v26 = vmax.f32 %v2699_v44, 0.0 }
 0x3a8   :  { %v3112_v52 = vpack.c.bf16 %v3028_v8, %v3024_v45 }
 0x3a9   :  { %v3113_v12 = vpack.c.bf16 %v3029_v26, %v3025_v13  ;;  %v2702_v55 = vpop.f32.mrb[172].mxu1 }
 0x3aa   :  { %v2703_v58 = vadd.f32 %v2702_v55, %v6535_v33  ;;  %v2704_v10 = vpop.f32.mrb[173].mxu1 }
 0x3ab   :  { %v2705_v19 = vadd.f32 %v2704_v10, %v6540_v56  ;;  %v2706_v42 = vpop.f32.mrb[174].mxu1  ;;  %3664 = vmatprep.mubr.bf16.mxu0 %v3113_v12 }
 0x3ac   :  { %v2707_v43 = vadd.f32 %v2706_v42, %v6535_v33  ;;  %v2708_v14 = vpop.f32.mrb[175].mxu1  ;;  %3665 = vmatmul.mubr.bf16.gmra.mrb[104].mxu0 %v3112_v52  ;;  %v3032_v54 = vmax.f32 %v2703_v58, 0.0 }
 0x3ad   :  { %v2709_v50 = vadd.f32 %v2708_v14, %v6540_v56  ;;  %v3033_v62 = vmax.f32 %v2705_v19, 0.0 }
 0x3ae   :  { %v3036_v60 = vmax.f32 %v2707_v43, 0.0 }
 0x3af   :  { %v3037_v63 = vmax.f32 %v2709_v50, 0.0 }
 0x3b0   :  { %v3116_v0 = vpack.c.bf16 %v3036_v60, %v3032_v54 }
 0x3b1   :  { %v3117_v3 = vpack.c.bf16 %v3037_v63, %v3033_v62  ;;  %v2712_v4 = vpop.f32.mrb[176].mxu1  ;;  %v6711_v62 = vrot.slane %v6530_v31, %v142_v27 }
 0x3b2   :  { %v2713_v5 = vadd.f32 %v2712_v4, %v6535_v33  ;;  %v2714_v9 = vpop.f32.mrb[177].mxu1 }
 0x3b3   :  { %v2715_v59 = vadd.f32 %v2714_v9, %v6540_v56  ;;  %v2716_v18 = vpop.f32.mrb[178].mxu1  ;;  %3674 = vmatprep.mubr.bf16.mxu0 %v3117_v3  ;;  %v6716_v3 = vrot.slane %v6530_v31, %v146_v29 }
 0x3b4   :  { %v2717_v39 = vadd.f32 %v2716_v18, %v6535_v33  ;;  %v2718_v47 = vpop.f32.mrb[179].mxu1  ;;  %3675 = vmatmul.mubr.bf16.gmra.mrb[108].mxu0 %v3116_v0  ;;  %v3040_v49 = vmax.f32 %v2713_v5, 0.0 }
 0x3b5   :  { %v2719_v61 = vadd.f32 %v2718_v47, %v6540_v56  ;;  %v3041_v20 = vmax.f32 %v2715_v59, 0.0 }
 0x3b6   :  { %v3044_v17 = vmax.f32 %v2717_v39, 0.0 }
 0x3b7   :  { %v3045_v21 = vmax.f32 %v2719_v61, 0.0 }
 0x3b8   :  { %v3120_v24 = vpack.c.bf16 %v3044_v17, %v3040_v49 }
 0x3b9   :  { %v3121_v11 = vpack.c.bf16 %v3045_v21, %v3041_v20  ;;  %v2722_v25 = vpop.f32.mrb[180].mxu1 }
 0x3ba   :  { %v2723_v28 = vadd.f32 %v2722_v25, %v6535_v33  ;;  %v2724_v30 = vpop.f32.mrb[181].mxu1 }
 0x3bb   :  { %v2725_v32 = vadd.f32 %v2724_v30, %v6540_v56  ;;  %v2726_v35 = vpop.f32.mrb[182].mxu1  ;;  %3684 = vmatprep.mubr.bf16.mxu0 %v3121_v11 }
 0x3bc   :  { %v2727_v46 = vadd.f32 %v2726_v35, %v6535_v33  ;;  %v2728_v57 = vpop.f32.mrb[183].mxu1  ;;  %3685 = vmatmul.mubr.bf16.gmra.mrb[112].mxu0 %v3120_v24  ;;  %v3048_v48 = vmax.f32 %v2723_v28, 0.0 }
 0x3bd   :  { %v2729_v6 = vadd.f32 %v2728_v57, %v6540_v56  ;;  %v3049_v37 = vmax.f32 %v2725_v32, 0.0 }
 0x3be   :  { %v3052_v7 = vmax.f32 %v2727_v46, 0.0 }
 0x3bf   :  { %v3053_v38 = vmax.f32 %v2729_v6, 0.0 }
 0x3c0   :  { %v3124_v53 = vpack.c.bf16 %v3052_v7, %v3048_v48 }
 0x3c1   :  { %v3125_v1 = vpack.c.bf16 %v3053_v38, %v3049_v37  ;;  %v2732_v2 = vpop.f32.mrb[184].mxu1 }
 0x3c2   :  { %v2733_v22 = vadd.f32 %v2732_v2, %v6535_v33  ;;  %v2734_v23 = vpop.f32.mrb[185].mxu1 }
 0x3c3   :  { %v2735_v51 = vadd.f32 %v2734_v23, %v6540_v56  ;;  %v2736_v40 = vpop.f32.mrb[186].mxu1  ;;  %3694 = vmatprep.mubr.bf16.mxu0 %v3125_v1 }
 0x3c4   :  { %v2737_v15 = vadd.f32 %v2736_v40, %v6535_v33  ;;  %v2738_v16 = vpop.f32.mrb[187].mxu1  ;;  %3695 = vmatmul.mubr.bf16.gmra.mrb[116].mxu0 %v3124_v53  ;;  %v3056_v45 = vmax.f32 %v2733_v22, 0.0 }
 0x3c5   :  { %v2739_v44 = vadd.f32 %v2738_v16, %v6540_v56  ;;  %v3057_v13 = vmax.f32 %v2735_v51, 0.0 }
 0x3c6   :  { %v3060_v8 = vmax.f32 %v2737_v15, 0.0 }
 0x3c7   :  { %v3061_v26 = vmax.f32 %v2739_v44, 0.0 }
 0x3c8   :  { %v3128_v52 = vpack.c.bf16 %v3060_v8, %v3056_v45 }
 0x3c9   :  { %v3129_v12 = vpack.c.bf16 %v3061_v26, %v3057_v13  ;;  %v2742_v55 = vpop.f32.mrb[188].mxu1 }
 0x3ca   :  { %v2743_v58 = vadd.f32 %v2742_v55, %v6535_v33  ;;  %v2744_v10 = vpop.f32.mrb[189].mxu1 }
 0x3cb   :  { %v2745_v19 = vadd.f32 %v2744_v10, %v6540_v56  ;;  %v2746_v42 = vpop.f32.mrb[190].mxu1  ;;  %3704 = vmatprep.mubr.bf16.mxu0 %v3129_v12 }
 0x3cc   :  { %v2747_v43 = vadd.f32 %v2746_v42, %v6535_v33  ;;  %v2748_v14 = vpop.f32.mrb[191].mxu1  ;;  %3705 = vmatmul.mubr.bf16.gmra.mrb[120].mxu0 %v3128_v52  ;;  %v3064_v54 = vmax.f32 %v2743_v58, 0.0 }
 0x3cd   :  { %v2749_v50 = vadd.f32 %v2748_v14, %v6540_v56  ;;  %v3065_v63 = vmax.f32 %v2745_v19, 0.0 }
 0x3ce   :  { %v3068_v60 = vmax.f32 %v2747_v43, 0.0 }
 0x3cf   :  { %v3069_v0 = vmax.f32 %v2749_v50, 0.0 }
 0x3d0   :  { %v3132_v4 = vpack.c.bf16 %v3068_v60, %v3064_v54 }
 0x3d1   :  { %v3133_v33 = vpack.c.bf16 %v3069_v0, %v3065_v63  ;;  %v2785_v5 = vpop.f32.mrb[192].mxu1 }
 0x3d2   :  { %v2786_v9 = vadd.f32 %v2785_v5, %v6711_v62  ;;  %v2787_v56 = vpop.f32.mrb[193].mxu1 }
 0x3d3   :  { %v2788_v59 = vadd.f32 %v2787_v56, %v6716_v3  ;;  %v2789_v18 = vpop.f32.mrb[194].mxu1  ;;  %3714 = vmatprep.mubr.bf16.mxu0 %v3133_v33 }
 0x3d4   :  { %v2790_v27 = vadd.f32 %v2789_v18, %v6711_v62  ;;  %v2791_v39 = vpop.f32.mrb[195].mxu1  ;;  %3715 = vmatmul.mubr.bf16.gmra.mrb[124].mxu0 %v3132_v4  ;;  %v2946_v34 = vmax.f32 %v2786_v9, 0.0 }
 0x3d5   :  { %v2792_v47 = vadd.f32 %v2791_v39, %v6716_v3  ;;  %v2947_v29 = vmax.f32 %v2788_v59, 0.0 }
 0x3d6   :  { %v2950_v61 = vmax.f32 %v2790_v27, 0.0 }
 0x3d7   :  { %v2951_v31 = vmax.f32 %v2792_v47, 0.0 }
 0x3d8   :  { %v3074_v49 = vpack.c.bf16 %v2950_v61, %v2946_v34 }
 0x3d9   :  { %v3075_v17 = vpack.c.bf16 %v2951_v31, %v2947_v29  ;;  %v2795_v20 = vpop.f32.mrb[196].mxu1 }
 0x3da   :  { %v2796_v21 = vadd.f32 %v2795_v20, %v6711_v62  ;;  %v2797_v24 = vpop.f32.mrb[197].mxu1 }
 0x3db   :  { %v2798_v11 = vadd.f32 %v2797_v24, %v6716_v3  ;;  %v2799_v25 = vpop.f32.mrb[198].mxu1  ;;  %3757 = vmatprep.mubr.bf16.mxu0 %v3075_v17 }
 0x3dc   :  { %v2800_v28 = vadd.f32 %v2799_v25, %v6711_v62  ;;  %v2801_v30 = vpop.f32.mrb[199].mxu1  ;;  %3758 = vmatmul.mubr.bf16.vlgmr.msra.gmra.mrb[64].mxu0 %v3074_v49  ;;  %v2954_v35 = vmax.f32 %v2796_v21, 0.0 }
 0x3dd   :  { %v2802_v32 = vadd.f32 %v2801_v30, %v6716_v3  ;;  %v2955_v57 = vmax.f32 %v2798_v11, 0.0 }
 0x3de   :  { %v2958_v46 = vmax.f32 %v2800_v28, 0.0 }
 0x3df   :  { %v2959_v6 = vmax.f32 %v2802_v32, 0.0 }
 0x3e0   :  { %v3078_v48 = vpack.c.bf16 %v2958_v46, %v2954_v35 }
 0x3e1   :  { %v3079_v7 = vpack.c.bf16 %v2959_v6, %v2955_v57  ;;  %v2805_v37 = vpop.f32.mrb[200].mxu1 }
 0x3e2   :  { %v2806_v38 = vadd.f32 %v2805_v37, %v6711_v62  ;;  %v2807_v53 = vpop.f32.mrb[201].mxu1 }
 0x3e3   :  { %v2808_v1 = vadd.f32 %v2807_v53, %v6716_v3  ;;  %v2809_v2 = vpop.f32.mrb[202].mxu1  ;;  %3767 = vmatprep.mubr.bf16.mxu0 %v3079_v7 }
 0x3e4   :  { %v2810_v22 = vadd.f32 %v2809_v2, %v6711_v62  ;;  %v2811_v23 = vpop.f32.mrb[203].mxu1  ;;  %3768 = vmatmul.mubr.bf16.gmra.mrb[68].mxu0 %v3078_v48  ;;  %v2962_v40 = vmax.f32 %v2806_v38, 0.0 }
 0x3e5   :  { %v2812_v51 = vadd.f32 %v2811_v23, %v6716_v3  ;;  %v2963_v16 = vmax.f32 %v2808_v1, 0.0 }
 0x3e6   :  { %v2966_v15 = vmax.f32 %v2810_v22, 0.0 }
 0x3e7   :  { %v2967_v44 = vmax.f32 %v2812_v51, 0.0 }
 0x3e8   :  { %v3082_v45 = vpack.c.bf16 %v2966_v15, %v2962_v40 }
 0x3e9   :  { %v3083_v8 = vpack.c.bf16 %v2967_v44, %v2963_v16  ;;  %v2815_v13 = vpop.f32.mrb[204].mxu1 }
 0x3ea   :  { %v2816_v26 = vadd.f32 %v2815_v13, %v6711_v62  ;;  %v2817_v52 = vpop.f32.mrb[205].mxu1 }
 0x3eb   :  { %v2818_v12 = vadd.f32 %v2817_v52, %v6716_v3  ;;  %v2819_v55 = vpop.f32.mrb[206].mxu1  ;;  %3777 = vmatprep.mubr.bf16.mxu0 %v3083_v8 }
 0x3ec   :  { %v2820_v58 = vadd.f32 %v2819_v55, %v6711_v62  ;;  %v2821_v10 = vpop.f32.mrb[207].mxu1  ;;  %3778 = vmatmul.mubr.bf16.gmra.mrb[72].mxu0 %v3082_v45  ;;  %v2970_v42 = vmax.f32 %v2816_v26, 0.0 }
 0x3ed   :  { %v2822_v19 = vadd.f32 %v2821_v10, %v6716_v3  ;;  %v2971_v14 = vmax.f32 %v2818_v12, 0.0 }
 0x3ee   :  { %v2974_v43 = vmax.f32 %v2820_v58, 0.0 }
 0x3ef   :  { %v2975_v50 = vmax.f32 %v2822_v19, 0.0 }
 0x3f0   :  { %v3086_v54 = vpack.c.bf16 %v2974_v43, %v2970_v42 }
 0x3f1   :  { %v3087_v60 = vpack.c.bf16 %v2975_v50, %v2971_v14  ;;  %v2825_v63 = vpop.f32.mrb[208].mxu1 }
 0x3f2   :  { %v2826_v0 = vadd.f32 %v2825_v63, %v6711_v62  ;;  %v2827_v4 = vpop.f32.mrb[209].mxu1 }
 0x3f3   :  { %v2828_v33 = vadd.f32 %v2827_v4, %v6716_v3  ;;  %v2829_v5 = vpop.f32.mrb[210].mxu1  ;;  %3787 = vmatprep.mubr.bf16.mxu0 %v3087_v60 }
 0x3f4   :  { %v2830_v9 = vadd.f32 %v2829_v5, %v6711_v62  ;;  %v2831_v56 = vpop.f32.mrb[211].mxu1  ;;  %3788 = vmatmul.mubr.bf16.gmra.mrb[76].mxu0 %v3086_v54  ;;  %v2978_v18 = vmax.f32 %v2826_v0, 0.0 }
 0x3f5   :  { %v2832_v59 = vadd.f32 %v2831_v56, %v6716_v3  ;;  %v2979_v39 = vmax.f32 %v2828_v33, 0.0 }
 0x3f6   :  { %v2982_v27 = vmax.f32 %v2830_v9, 0.0 }
 0x3f7   :  { %v2983_v47 = vmax.f32 %v2832_v59, 0.0 }
 0x3f8   :  { %v3090_v34 = vpack.c.bf16 %v2982_v27, %v2978_v18 }
 0x3f9   :  { %v3091_v61 = vpack.c.bf16 %v2983_v47, %v2979_v39  ;;  %v2835_v29 = vpop.f32.mrb[212].mxu1 }
 0x3fa   :  { %v2836_v31 = vadd.f32 %v2835_v29, %v6711_v62  ;;  %v2837_v49 = vpop.f32.mrb[213].mxu1 }
 0x3fb   :  { %v2838_v17 = vadd.f32 %v2837_v49, %v6716_v3  ;;  %v2839_v20 = vpop.f32.mrb[214].mxu1  ;;  %3797 = vmatprep.mubr.bf16.mxu0 %v3091_v61 }
 0x3fc   :  { %v2840_v21 = vadd.f32 %v2839_v20, %v6711_v62  ;;  %v2841_v24 = vpop.f32.mrb[215].mxu1  ;;  %3798 = vmatmul.mubr.bf16.gmra.mrb[80].mxu0 %v3090_v34  ;;  %v2986_v25 = vmax.f32 %v2836_v31, 0.0 }
 0x3fd   :  { %v2842_v11 = vadd.f32 %v2841_v24, %v6716_v3  ;;  %v2987_v30 = vmax.f32 %v2838_v17, 0.0 }
 0x3fe   :  { %v2990_v28 = vmax.f32 %v2840_v21, 0.0 }
 0x3ff   :  { %v2991_v32 = vmax.f32 %v2842_v11, 0.0 }
 0x400   :  { %v3094_v35 = vpack.c.bf16 %v2990_v28, %v2986_v25 }
 0x401   :  { %v3095_v46 = vpack.c.bf16 %v2991_v32, %v2987_v30  ;;  %v2845_v57 = vpop.f32.mrb[216].mxu1 }
 0x402   :  { %v2846_v6 = vadd.f32 %v2845_v57, %v6711_v62  ;;  %v2847_v48 = vpop.f32.mrb[217].mxu1 }
 0x403   :  { %v2848_v7 = vadd.f32 %v2847_v48, %v6716_v3  ;;  %v2849_v37 = vpop.f32.mrb[218].mxu1  ;;  %3807 = vmatprep.mubr.bf16.mxu0 %v3095_v46 }
 0x404   :  { %v2850_v38 = vadd.f32 %v2849_v37, %v6711_v62  ;;  %v2851_v53 = vpop.f32.mrb[219].mxu1  ;;  %3808 = vmatmul.mubr.bf16.gmra.mrb[84].mxu0 %v3094_v35  ;;  %v2994_v2 = vmax.f32 %v2846_v6, 0.0 }
 0x405   :  { %v2852_v1 = vadd.f32 %v2851_v53, %v6716_v3  ;;  %v2995_v23 = vmax.f32 %v2848_v7, 0.0 }
 0x406   :  { %v2998_v22 = vmax.f32 %v2850_v38, 0.0 }
 0x407   :  { %v2999_v51 = vmax.f32 %v2852_v1, 0.0 }
 0x408   :  { %v3098_v40 = vpack.c.bf16 %v2998_v22, %v2994_v2 }
 0x409   :  { %v3099_v15 = vpack.c.bf16 %v2999_v51, %v2995_v23  ;;  %v2855_v16 = vpop.f32.mrb[220].mxu1 }
 0x40a   :  { %v2856_v44 = vadd.f32 %v2855_v16, %v6711_v62  ;;  %v2857_v45 = vpop.f32.mrb[221].mxu1 }
 0x40b   :  { %v2858_v8 = vadd.f32 %v2857_v45, %v6716_v3  ;;  %v2859_v13 = vpop.f32.mrb[222].mxu1  ;;  %3817 = vmatprep.mubr.bf16.mxu0 %v3099_v15 }
 0x40c   :  { %v2860_v26 = vadd.f32 %v2859_v13, %v6711_v62  ;;  %v2861_v52 = vpop.f32.mrb[223].mxu1  ;;  %3818 = vmatmul.mubr.bf16.gmra.mrb[88].mxu0 %v3098_v40  ;;  %v3002_v55 = vmax.f32 %v2856_v44, 0.0 }
 0x40d   :  { %v2862_v12 = vadd.f32 %v2861_v52, %v6716_v3  ;;  %v3003_v10 = vmax.f32 %v2858_v8, 0.0 }
 0x40e   :  { %v3006_v58 = vmax.f32 %v2860_v26, 0.0 }
 0x40f   :  { %v3007_v19 = vmax.f32 %v2862_v12, 0.0 }
 0x410   :  { %v3102_v42 = vpack.c.bf16 %v3006_v58, %v3002_v55 }
 0x411   :  { %v3103_v43 = vpack.c.bf16 %v3007_v19, %v3003_v10  ;;  %v2865_v14 = vpop.f32.mrb[224].mxu1 }
 0x412   :  { %v2866_v50 = vadd.f32 %v2865_v14, %v6711_v62  ;;  %v2867_v54 = vpop.f32.mrb[225].mxu1 }
 0x413   :  { %v2868_v60 = vadd.f32 %v2867_v54, %v6716_v3  ;;  %v2869_v63 = vpop.f32.mrb[226].mxu1  ;;  %3827 = vmatprep.mubr.bf16.mxu0 %v3103_v43 }
 0x414   :  { %v2870_v0 = vadd.f32 %v2869_v63, %v6711_v62  ;;  %v2871_v4 = vpop.f32.mrb[227].mxu1  ;;  %3828 = vmatmul.mubr.bf16.gmra.mrb[92].mxu0 %v3102_v42  ;;  %v3010_v5 = vmax.f32 %v2866_v50, 0.0 }
 0x415   :  { %v2872_v33 = vadd.f32 %v2871_v4, %v6716_v3  ;;  %v3011_v56 = vmax.f32 %v2868_v60, 0.0 }
 0x416   :  { %v3014_v9 = vmax.f32 %v2870_v0, 0.0 }
 0x417   :  { %v3015_v59 = vmax.f32 %v2872_v33, 0.0 }
 0x418   :  { %v3106_v18 = vpack.c.bf16 %v3014_v9, %v3010_v5 }
 0x419   :  { %v3107_v27 = vpack.c.bf16 %v3015_v59, %v3011_v56  ;;  %v2875_v39 = vpop.f32.mrb[228].mxu1 }
 0x41a   :  { %v2876_v47 = vadd.f32 %v2875_v39, %v6711_v62  ;;  %v2877_v34 = vpop.f32.mrb[229].mxu1 }
 0x41b   :  { %v2878_v61 = vadd.f32 %v2877_v34, %v6716_v3  ;;  %v2879_v29 = vpop.f32.mrb[230].mxu1  ;;  %3837 = vmatprep.mubr.bf16.mxu0 %v3107_v27 }
 0x41c   :  { %v2880_v31 = vadd.f32 %v2879_v29, %v6711_v62  ;;  %v2881_v49 = vpop.f32.mrb[231].mxu1  ;;  %3838 = vmatmul.mubr.bf16.gmra.mrb[96].mxu0 %v3106_v18  ;;  %v3018_v20 = vmax.f32 %v2876_v47, 0.0 }
 0x41d   :  { %v2882_v17 = vadd.f32 %v2881_v49, %v6716_v3  ;;  %v3019_v24 = vmax.f32 %v2878_v61, 0.0 }
 0x41e   :  { %v3022_v21 = vmax.f32 %v2880_v31, 0.0 }
 0x41f   :  { %v3023_v11 = vmax.f32 %v2882_v17, 0.0 }
 0x420   :  { %v3110_v25 = vpack.c.bf16 %v3022_v21, %v3018_v20 }
 0x421   :  { %v3111_v28 = vpack.c.bf16 %v3023_v11, %v3019_v24  ;;  %v2885_v30 = vpop.f32.mrb[232].mxu1 }
 0x422   :  { %v2886_v32 = vadd.f32 %v2885_v30, %v6711_v62  ;;  %v2887_v35 = vpop.f32.mrb[233].mxu1 }
 0x423   :  { %v2888_v46 = vadd.f32 %v2887_v35, %v6716_v3  ;;  %v2889_v57 = vpop.f32.mrb[234].mxu1  ;;  %3847 = vmatprep.mubr.bf16.mxu0 %v3111_v28 }
 0x424   :  { %v2890_v6 = vadd.f32 %v2889_v57, %v6711_v62  ;;  %v2891_v48 = vpop.f32.mrb[235].mxu1  ;;  %3848 = vmatmul.mubr.bf16.gmra.mrb[100].mxu0 %v3110_v25  ;;  %v3026_v37 = vmax.f32 %v2886_v32, 0.0 }
 0x425   :  { %v2892_v7 = vadd.f32 %v2891_v48, %v6716_v3  ;;  %v3027_v53 = vmax.f32 %v2888_v46, 0.0 }
 0x426   :  { %v3030_v38 = vmax.f32 %v2890_v6, 0.0 }
 0x427   :  { %v3031_v1 = vmax.f32 %v2892_v7, 0.0 }
 0x428   :  { %v3114_v2 = vpack.c.bf16 %v3030_v38, %v3026_v37 }
 0x429   :  { %v3115_v22 = vpack.c.bf16 %v3031_v1, %v3027_v53  ;;  %v2895_v23 = vpop.f32.mrb[236].mxu1 }
 0x42a   :  { %v2896_v51 = vadd.f32 %v2895_v23, %v6711_v62  ;;  %v2897_v40 = vpop.f32.mrb[237].mxu1 }
 0x42b   :  { %v2898_v15 = vadd.f32 %v2897_v40, %v6716_v3  ;;  %v2899_v16 = vpop.f32.mrb[238].mxu1  ;;  %3857 = vmatprep.mubr.bf16.mxu0 %v3115_v22 }
 0x42c   :  { %v2900_v44 = vadd.f32 %v2899_v16, %v6711_v62  ;;  %v2901_v45 = vpop.f32.mrb[239].mxu1  ;;  %3858 = vmatmul.mubr.bf16.gmra.mrb[104].mxu0 %v3114_v2  ;;  %v3034_v13 = vmax.f32 %v2896_v51, 0.0 }
 0x42d   :  { %v2902_v8 = vadd.f32 %v2901_v45, %v6716_v3  ;;  %v3035_v52 = vmax.f32 %v2898_v15, 0.0 }
 0x42e   :  { %v3038_v26 = vmax.f32 %v2900_v44, 0.0 }
 0x42f   :  { %v3039_v12 = vmax.f32 %v2902_v8, 0.0 }
 0x430   :  { %v3118_v55 = vpack.c.bf16 %v3038_v26, %v3034_v13 }
 0x431   :  { %v3119_v58 = vpack.c.bf16 %v3039_v12, %v3035_v52  ;;  %v2905_v10 = vpop.f32.mrb[240].mxu1  ;;  %v3200_v52 = vld [vmem:[%s7056_s8] sm:$0x3] }
 0x432   :  { %v2906_v19 = vadd.f32 %v2905_v10, %v6711_v62  ;;  %v2907_v42 = vpop.f32.mrb[241].mxu1  ;;  %v6786_v12 = vrot.slane %v3200_v52, %v5592_v36 }
 0x433   :  { %v2908_v43 = vadd.f32 %v2907_v42, %v6716_v3  ;;  %v2909_v14 = vpop.f32.mrb[242].mxu1  ;;  %3867 = vmatprep.mubr.bf16.mxu0 %v3119_v58 }
 0x434   :  { %v2910_v50 = vadd.f32 %v2909_v14, %v6711_v62  ;;  %v2911_v54 = vpop.f32.mrb[243].mxu1  ;;  %3868 = vmatmul.mubr.bf16.gmra.mrb[108].mxu0 %v3118_v55  ;;  %v3042_v63 = vmax.f32 %v2906_v19, 0.0 }
 0x435   :  { %v2912_v60 = vadd.f32 %v2911_v54, %v6716_v3  ;;  %v3043_v4 = vmax.f32 %v2908_v43, 0.0 }
 0x436   :  { %v3046_v0 = vmax.f32 %v2910_v50, 0.0 }
 0x437   :  { %v3047_v33 = vmax.f32 %v2912_v60, 0.0 }
 0x438   :  { %v3122_v5 = vpack.c.bf16 %v3046_v0, %v3042_v63 }
 0x439   :  { %v3123_v9 = vpack.c.bf16 %v3047_v33, %v3043_v4  ;;  %v2915_v56 = vpop.f32.mrb[244].mxu1 }
 0x43a   :  { %v2916_v59 = vadd.f32 %v2915_v56, %v6711_v62  ;;  %v2917_v18 = vpop.f32.mrb[245].mxu1 }
 0x43b   :  { %v2918_v27 = vadd.f32 %v2917_v18, %v6716_v3  ;;  %v2919_v39 = vpop.f32.mrb[246].mxu1  ;;  %3877 = vmatprep.mubr.bf16.mxu0 %v3123_v9 }
 0x43c   :  { %v2920_v47 = vadd.f32 %v2919_v39, %v6711_v62  ;;  %v2921_v34 = vpop.f32.mrb[247].mxu1  ;;  %3878 = vmatmul.mubr.bf16.gmra.mrb[112].mxu0 %v3122_v5  ;;  %v3050_v29 = vmax.f32 %v2916_v59, 0.0 }
 0x43d   :  { %v2922_v61 = vadd.f32 %v2921_v34, %v6716_v3  ;;  %v3051_v49 = vmax.f32 %v2918_v27, 0.0 }
 0x43e   :  { %v3054_v31 = vmax.f32 %v2920_v47, 0.0 }
 0x43f   :  { %v3055_v17 = vmax.f32 %v2922_v61, 0.0 }
 0x440   :  { %v3126_v20 = vpack.c.bf16 %v3054_v31, %v3050_v29 }
 0x441   :  { %v3127_v21 = vpack.c.bf16 %v3055_v17, %v3051_v49  ;;  %v2925_v24 = vpop.f32.mrb[248].mxu1 }
 0x442   :  { %v2926_v11 = vadd.f32 %v2925_v24, %v6711_v62  ;;  %v2927_v25 = vpop.f32.mrb[249].mxu1 }
 0x443   :  { %v2928_v28 = vadd.f32 %v2927_v25, %v6716_v3  ;;  %v2929_v30 = vpop.f32.mrb[250].mxu1  ;;  %3887 = vmatprep.mubr.bf16.mxu0 %v3127_v21 }
 0x444   :  { %v2930_v32 = vadd.f32 %v2929_v30, %v6711_v62  ;;  %v2931_v35 = vpop.f32.mrb[251].mxu1  ;;  %3888 = vmatmul.mubr.bf16.gmra.mrb[116].mxu0 %v3126_v20  ;;  %v3058_v57 = vmax.f32 %v2926_v11, 0.0 }
 0x445   :  { %v2932_v46 = vadd.f32 %v2931_v35, %v6716_v3  ;;  %v3059_v48 = vmax.f32 %v2928_v28, 0.0 }
 0x446   :  { %v3062_v6 = vmax.f32 %v2930_v32, 0.0 }
 0x447   :  { %v3063_v7 = vmax.f32 %v2932_v46, 0.0 }
 0x448   :  { %v3130_v37 = vpack.c.bf16 %v3062_v6, %v3058_v57 }
 0x449   :  { %v3131_v38 = vpack.c.bf16 %v3063_v7, %v3059_v48  ;;  %v2935_v53 = vpop.f32.mrb[252].mxu1 }
 0x44a   :  { %v2936_v1 = vadd.f32 %v2935_v53, %v6711_v62  ;;  %v2937_v2 = vpop.f32.mrb[253].mxu1 }
 0x44b   :  { %v2938_v22 = vadd.f32 %v2937_v2, %v6716_v3  ;;  %v2939_v23 = vpop.f32.mrb[254].mxu1  ;;  %3897 = vmatprep.mubr.bf16.mxu0 %v3131_v38 }
 0x44c   :  { %v2940_v51 = vadd.f32 %v2939_v23, %v6711_v62  ;;  %v2941_v40 = vpop.f32.mrb[255].mxu1  ;;  %3898 = vmatmul.mubr.bf16.gmra.mrb[120].mxu0 %v3130_v37  ;;  %v3066_v16 = vmax.f32 %v2936_v1, 0.0  ;;  %v6789_v62 = vrot.slane %v3200_v52, %v5600_v41 }
 0x44d   :  { %v2942_v15 = vadd.f32 %v2941_v40, %v6716_v3  ;;  %v3067_v45 = vmax.f32 %v2938_v22, 0.0 }
 0x44e   :  { %v3070_v44 = vmax.f32 %v2940_v51, 0.0 }
 0x44f   :  { %v3071_v8 = vmax.f32 %v2942_v15, 0.0 }
 0x450   :  { %v3134_v13 = vpack.c.bf16 %v3070_v44, %v3066_v16 }
 0x451   :  { %v3135_v26 = vpack.c.bf16 %v3071_v8, %v3067_v45 }
 0x453   :  { %3907 = vmatprep.mubr.bf16.mxu0 %v3135_v26 }
 0x454   :  { %3908 = vmatmul.mubr.bf16.gmra.mrb[124].mxu0 %v3134_v13 }
 0x4af   :  { %v3759_v55 = vpop.f32.mrb[64].mxu0 }
 0x4b0   :  { %v4406_v3 = vadd.f32 %v3759_v55, %v6786_v12  ;;  %v3761_v58 = vpop.f32.mrb[65].mxu0 }
 0x4b1   :  { %v4407_v10 = vadd.f32 %v3761_v58, %v6789_v62  ;;  %v3763_v19 = vpop.f32.mrb[66].mxu0 }
 0x4b2   :  { %v3918_v42 = vmax.f32 %v4406_v3, 0.0  ;;  %v4408_v43 = vadd.f32 %v3763_v19, %v6786_v12  ;;  %v3765_v14 = vpop.f32.mrb[67].mxu0 }
 0x4b3   :  { %v3919_v50 = vmax.f32 %v4407_v10, 0.0  ;;  %v4409_v54 = vadd.f32 %v3765_v14, %v6789_v62 }
 0x4b4   :  { %3982 = vst [vmem:[%s7057_s9] sm:$0xff] %v3918_v42  ;;  %v3920_v36 = vmax.f32 %v4408_v43, 0.0 }
 0x4b5   :  { %3983 = vst [vmem:[%s7057_s9 + $0x8] sm:$0xff] %v3919_v50  ;;  %v3921_v41 = vmax.f32 %v4409_v54, 0.0 }
 0x4b6   :  { %3984 = vst [vmem:[%s7057_s9 + $0x10] sm:$0xff] %v3920_v36 }
 0x4b7   :  { %3985 = vst [vmem:[%s7057_s9 + $0x18] sm:$0xff] %v3921_v41  ;;  %v3769_v60 = vpop.f32.mrb[68].mxu0 }
 0x4b8   :  { %v4410_v63 = vadd.f32 %v3769_v60, %v6786_v12  ;;  %v3771_v0 = vpop.f32.mrb[69].mxu0 }
 0x4b9   :  { %v4411_v4 = vadd.f32 %v3771_v0, %v6789_v62  ;;  %v3773_v33 = vpop.f32.mrb[70].mxu0 }
 0x4ba   :  { %v3922_v5 = vmax.f32 %v4410_v63, 0.0  ;;  %v4412_v9 = vadd.f32 %v3773_v33, %v6786_v12  ;;  %v3775_v56 = vpop.f32.mrb[71].mxu0 }
 0x4bb   :  { %v3923_v59 = vmax.f32 %v4411_v4, 0.0  ;;  %v4413_v18 = vadd.f32 %v3775_v56, %v6789_v62 }
 0x4bc   :  { %3986 = vst [vmem:[%s7057_s9 + $0x20] sm:$0xff] %v3922_v5  ;;  %v3924_v27 = vmax.f32 %v4412_v9, 0.0 }
 0x4bd   :  { %3987 = vst [vmem:[%s7057_s9 + $0x28] sm:$0xff] %v3923_v59  ;;  %v3925_v39 = vmax.f32 %v4413_v18, 0.0 }
 0x4be   :  { %3988 = vst [vmem:[%s7057_s9 + $0x30] sm:$0xff] %v3924_v27 }
 0x4bf   :  { %3989 = vst [vmem:[%s7057_s9 + $0x38] sm:$0xff] %v3925_v39  ;;  %v3779_v47 = vpop.f32.mrb[72].mxu0 }
 0x4c0   :  { %v4414_v34 = vadd.f32 %v3779_v47, %v6786_v12  ;;  %v3781_v61 = vpop.f32.mrb[73].mxu0 }
 0x4c1   :  { %v4415_v29 = vadd.f32 %v3781_v61, %v6789_v62  ;;  %v3783_v31 = vpop.f32.mrb[74].mxu0 }
 0x4c2   :  { %v3926_v49 = vmax.f32 %v4414_v34, 0.0  ;;  %v4416_v17 = vadd.f32 %v3783_v31, %v6786_v12  ;;  %v3785_v20 = vpop.f32.mrb[75].mxu0 }
 0x4c3   :  { %v3927_v21 = vmax.f32 %v4415_v29, 0.0  ;;  %v4417_v24 = vadd.f32 %v3785_v20, %v6789_v62 }
 0x4c4   :  { %3990 = vst [vmem:[%s7057_s9 + $0x40] sm:$0xff] %v3926_v49  ;;  %v3928_v11 = vmax.f32 %v4416_v17, 0.0 }
 0x4c5   :  { %3991 = vst [vmem:[%s7057_s9 + $0x48] sm:$0xff] %v3927_v21  ;;  %v3929_v25 = vmax.f32 %v4417_v24, 0.0 }
 0x4c6   :  { %3992 = vst [vmem:[%s7057_s9 + $0x50] sm:$0xff] %v3928_v11 }
 0x4c7   :  { %3993 = vst [vmem:[%s7057_s9 + $0x58] sm:$0xff] %v3929_v25  ;;  %v3789_v28 = vpop.f32.mrb[76].mxu0 }
 0x4c8   :  { %v4418_v30 = vadd.f32 %v3789_v28, %v6786_v12  ;;  %v3791_v32 = vpop.f32.mrb[77].mxu0 }
 0x4c9   :  { %v4419_v35 = vadd.f32 %v3791_v32, %v6789_v62  ;;  %v3793_v46 = vpop.f32.mrb[78].mxu0 }
 0x4ca   :  { %v3930_v57 = vmax.f32 %v4418_v30, 0.0  ;;  %v4420_v6 = vadd.f32 %v3793_v46, %v6786_v12  ;;  %v3795_v48 = vpop.f32.mrb[79].mxu0 }
 0x4cb   :  { %v3931_v7 = vmax.f32 %v4419_v35, 0.0  ;;  %v4421_v37 = vadd.f32 %v3795_v48, %v6789_v62 }
 0x4cc   :  { %3994 = vst [vmem:[%s7057_s9 + $0x60] sm:$0xff] %v3930_v57  ;;  %v3932_v38 = vmax.f32 %v4420_v6, 0.0 }
 0x4cd   :  { %3995 = vst [vmem:[%s7057_s9 + $0x68] sm:$0xff] %v3931_v7  ;;  %v3933_v53 = vmax.f32 %v4421_v37, 0.0 }
 0x4ce   :  { %3996 = vst [vmem:[%s7057_s9 + $0x70] sm:$0xff] %v3932_v38 }
 0x4cf   :  { %3997 = vst [vmem:[%s7057_s9 + $0x78] sm:$0xff] %v3933_v53  ;;  %v3799_v1 = vpop.f32.mrb[80].mxu0 }
 0x4d0   :  { %v4422_v2 = vadd.f32 %v3799_v1, %v6786_v12  ;;  %v3801_v22 = vpop.f32.mrb[81].mxu0 }
 0x4d1   :  { %v4423_v23 = vadd.f32 %v3801_v22, %v6789_v62  ;;  %v3803_v51 = vpop.f32.mrb[82].mxu0 }
 0x4d2   :  { %v3934_v40 = vmax.f32 %v4422_v2, 0.0  ;;  %v4424_v15 = vadd.f32 %v3803_v51, %v6786_v12  ;;  %v3805_v16 = vpop.f32.mrb[83].mxu0 }
 0x4d3   :  { %v3935_v44 = vmax.f32 %v4423_v23, 0.0  ;;  %v4425_v45 = vadd.f32 %v3805_v16, %v6789_v62 }
 0x4d4   :  { %3998 = vst [vmem:[%s7057_s9 + $0x80] sm:$0xff] %v3934_v40  ;;  %v3936_v8 = vmax.f32 %v4424_v15, 0.0 }
 0x4d5   :  { %3999 = vst [vmem:[%s7057_s9 + $0x88] sm:$0xff] %v3935_v44  ;;  %v3937_v13 = vmax.f32 %v4425_v45, 0.0 }
 0x4d6   :  { %4000 = vst [vmem:[%s7057_s9 + $0x90] sm:$0xff] %v3936_v8 }
 0x4d7   :  { %4001 = vst [vmem:[%s7057_s9 + $0x98] sm:$0xff] %v3937_v13  ;;  %v3809_v26 = vpop.f32.mrb[84].mxu0 }
 0x4d8   :  { %v4426_v52 = vadd.f32 %v3809_v26, %v6786_v12  ;;  %v3811_v55 = vpop.f32.mrb[85].mxu0 }
 0x4d9   :  { %v4427_v3 = vadd.f32 %v3811_v55, %v6789_v62  ;;  %v3813_v58 = vpop.f32.mrb[86].mxu0 }
 0x4da   :  { %v3938_v10 = vmax.f32 %v4426_v52, 0.0  ;;  %v4428_v19 = vadd.f32 %v3813_v58, %v6786_v12  ;;  %v3815_v42 = vpop.f32.mrb[87].mxu0 }
 0x4db   :  { %v3939_v43 = vmax.f32 %v4427_v3, 0.0  ;;  %v4429_v14 = vadd.f32 %v3815_v42, %v6789_v62 }
 0x4dc   :  { %4002 = vst [vmem:[%s7057_s9 + $0xa0] sm:$0xff] %v3938_v10  ;;  %v3940_v50 = vmax.f32 %v4428_v19, 0.0 }
 0x4dd   :  { %4003 = vst [vmem:[%s7057_s9 + $0xa8] sm:$0xff] %v3939_v43  ;;  %v3941_v54 = vmax.f32 %v4429_v14, 0.0 }
 0x4de   :  { %4004 = vst [vmem:[%s7057_s9 + $0xb0] sm:$0xff] %v3940_v50 }
 0x4df   :  { %4005 = vst [vmem:[%s7057_s9 + $0xb8] sm:$0xff] %v3941_v54  ;;  %v3819_v36 = vpop.f32.mrb[88].mxu0 }
 0x4e0   :  { %v4430_v41 = vadd.f32 %v3819_v36, %v6786_v12  ;;  %v3821_v60 = vpop.f32.mrb[89].mxu0 }
 0x4e1   :  { %v4431_v63 = vadd.f32 %v3821_v60, %v6789_v62  ;;  %v3823_v0 = vpop.f32.mrb[90].mxu0 }
 0x4e2   :  { %v3942_v4 = vmax.f32 %v4430_v41, 0.0  ;;  %v4432_v33 = vadd.f32 %v3823_v0, %v6786_v12  ;;  %v3825_v5 = vpop.f32.mrb[91].mxu0 }
 0x4e3   :  { %v3943_v9 = vmax.f32 %v4431_v63, 0.0  ;;  %v4433_v56 = vadd.f32 %v3825_v5, %v6789_v62 }
 0x4e4   :  { %4006 = vst [vmem:[%s7057_s9 + $0xc0] sm:$0xff] %v3942_v4  ;;  %v3944_v59 = vmax.f32 %v4432_v33, 0.0 }
 0x4e5   :  { %4007 = vst [vmem:[%s7057_s9 + $0xc8] sm:$0xff] %v3943_v9  ;;  %v3945_v18 = vmax.f32 %v4433_v56, 0.0 }
 0x4e6   :  { %4008 = vst [vmem:[%s7057_s9 + $0xd0] sm:$0xff] %v3944_v59 }
 0x4e7   :  { %4009 = vst [vmem:[%s7057_s9 + $0xd8] sm:$0xff] %v3945_v18  ;;  %v3829_v27 = vpop.f32.mrb[92].mxu0 }
 0x4e8   :  { %v4434_v39 = vadd.f32 %v3829_v27, %v6786_v12  ;;  %v3831_v47 = vpop.f32.mrb[93].mxu0 }
 0x4e9   :  { %v4435_v34 = vadd.f32 %v3831_v47, %v6789_v62  ;;  %v3833_v61 = vpop.f32.mrb[94].mxu0 }
 0x4ea   :  { %v3946_v29 = vmax.f32 %v4434_v39, 0.0  ;;  %v4436_v31 = vadd.f32 %v3833_v61, %v6786_v12  ;;  %v3835_v49 = vpop.f32.mrb[95].mxu0 }
 0x4eb   :  { %v3947_v17 = vmax.f32 %v4435_v34, 0.0  ;;  %v4437_v20 = vadd.f32 %v3835_v49, %v6789_v62 }
 0x4ec   :  { %4010 = vst [vmem:[%s7057_s9 + $0xe0] sm:$0xff] %v3946_v29  ;;  %v3948_v21 = vmax.f32 %v4436_v31, 0.0 }
 0x4ed   :  { %4011 = vst [vmem:[%s7057_s9 + $0xe8] sm:$0xff] %v3947_v17  ;;  %v3949_v24 = vmax.f32 %v4437_v20, 0.0 }
 0x4ee   :  { %4012 = vst [vmem:[%s7057_s9 + $0xf0] sm:$0xff] %v3948_v21 }
 0x4ef   :  { %4013 = vst [vmem:[%s7057_s9 + $0xf8] sm:$0xff] %v3949_v24  ;;  %v3839_v11 = vpop.f32.mrb[96].mxu0 }
 0x4f0   :  { %v4438_v25 = vadd.f32 %v3839_v11, %v6786_v12  ;;  %v3841_v28 = vpop.f32.mrb[97].mxu0 }
 0x4f1   :  { %v4439_v30 = vadd.f32 %v3841_v28, %v6789_v62  ;;  %v3843_v32 = vpop.f32.mrb[98].mxu0 }
 0x4f2   :  { %v3950_v35 = vmax.f32 %v4438_v25, 0.0  ;;  %v4440_v46 = vadd.f32 %v3843_v32, %v6786_v12  ;;  %v3845_v57 = vpop.f32.mrb[99].mxu0 }
 0x4f3   :  { %v3951_v6 = vmax.f32 %v4439_v30, 0.0  ;;  %v4441_v48 = vadd.f32 %v3845_v57, %v6789_v62 }
 0x4f4   :  { %4014 = vst [vmem:[%s7057_s9 + $0x100] sm:$0xff] %v3950_v35  ;;  %v3952_v7 = vmax.f32 %v4440_v46, 0.0 }
 0x4f5   :  { %4015 = vst [vmem:[%s7057_s9 + $0x108] sm:$0xff] %v3951_v6  ;;  %v3953_v37 = vmax.f32 %v4441_v48, 0.0 }
 0x4f6   :  { %4016 = vst [vmem:[%s7057_s9 + $0x110] sm:$0xff] %v3952_v7 }
 0x4f7   :  { %4017 = vst [vmem:[%s7057_s9 + $0x118] sm:$0xff] %v3953_v37  ;;  %v3849_v38 = vpop.f32.mrb[100].mxu0 }
 0x4f8   :  { %v4442_v53 = vadd.f32 %v3849_v38, %v6786_v12  ;;  %v3851_v1 = vpop.f32.mrb[101].mxu0 }
 0x4f9   :  { %v4443_v2 = vadd.f32 %v3851_v1, %v6789_v62  ;;  %v3853_v22 = vpop.f32.mrb[102].mxu0 }
 0x4fa   :  { %v3954_v23 = vmax.f32 %v4442_v53, 0.0  ;;  %v4444_v51 = vadd.f32 %v3853_v22, %v6786_v12  ;;  %v3855_v40 = vpop.f32.mrb[103].mxu0 }
 0x4fb   :  { %v3955_v15 = vmax.f32 %v4443_v2, 0.0  ;;  %v4445_v16 = vadd.f32 %v3855_v40, %v6789_v62 }
 0x4fc   :  { %4018 = vst [vmem:[%s7057_s9 + $0x120] sm:$0xff] %v3954_v23  ;;  %v3956_v44 = vmax.f32 %v4444_v51, 0.0 }
 0x4fd   :  { %4019 = vst [vmem:[%s7057_s9 + $0x128] sm:$0xff] %v3955_v15  ;;  %v3957_v45 = vmax.f32 %v4445_v16, 0.0 }
 0x4fe   :  { %4020 = vst [vmem:[%s7057_s9 + $0x130] sm:$0xff] %v3956_v44 }
 0x4ff   :  { %4021 = vst [vmem:[%s7057_s9 + $0x138] sm:$0xff] %v3957_v45  ;;  %v3859_v8 = vpop.f32.mrb[104].mxu0 }
 0x500   :  { %v4446_v13 = vadd.f32 %v3859_v8, %v6786_v12  ;;  %v3861_v26 = vpop.f32.mrb[105].mxu0 }
 0x501   :  { %v4447_v52 = vadd.f32 %v3861_v26, %v6789_v62  ;;  %v3863_v55 = vpop.f32.mrb[106].mxu0 }
 0x502   :  { %v3958_v3 = vmax.f32 %v4446_v13, 0.0  ;;  %v4448_v58 = vadd.f32 %v3863_v55, %v6786_v12  ;;  %v3865_v10 = vpop.f32.mrb[107].mxu0 }
 0x503   :  { %v3959_v19 = vmax.f32 %v4447_v52, 0.0  ;;  %v4449_v42 = vadd.f32 %v3865_v10, %v6789_v62 }
 0x504   :  { %4022 = vst [vmem:[%s7057_s9 + $0x140] sm:$0xff] %v3958_v3  ;;  %v3960_v43 = vmax.f32 %v4448_v58, 0.0 }
 0x505   :  { %4023 = vst [vmem:[%s7057_s9 + $0x148] sm:$0xff] %v3959_v19  ;;  %v3961_v14 = vmax.f32 %v4449_v42, 0.0 }
 0x506   :  { %4024 = vst [vmem:[%s7057_s9 + $0x150] sm:$0xff] %v3960_v43 }
 0x507   :  { %4025 = vst [vmem:[%s7057_s9 + $0x158] sm:$0xff] %v3961_v14  ;;  %v3869_v50 = vpop.f32.mrb[108].mxu0 }
 0x508   :  { %v4450_v54 = vadd.f32 %v3869_v50, %v6786_v12  ;;  %v3871_v36 = vpop.f32.mrb[109].mxu0 }
 0x509   :  { %v4451_v41 = vadd.f32 %v3871_v36, %v6789_v62  ;;  %v3873_v60 = vpop.f32.mrb[110].mxu0 }
 0x50a   :  { %v3962_v63 = vmax.f32 %v4450_v54, 0.0  ;;  %v4452_v0 = vadd.f32 %v3873_v60, %v6786_v12  ;;  %v3875_v4 = vpop.f32.mrb[111].mxu0 }
 0x50b   :  { %v3963_v33 = vmax.f32 %v4451_v41, 0.0  ;;  %v4453_v5 = vadd.f32 %v3875_v4, %v6789_v62 }
 0x50c   :  { %4026 = vst [vmem:[%s7057_s9 + $0x160] sm:$0xff] %v3962_v63  ;;  %v3964_v9 = vmax.f32 %v4452_v0, 0.0 }
 0x50d   :  { %4027 = vst [vmem:[%s7057_s9 + $0x168] sm:$0xff] %v3963_v33  ;;  %v3965_v56 = vmax.f32 %v4453_v5, 0.0 }
 0x50e   :  { %4028 = vst [vmem:[%s7057_s9 + $0x170] sm:$0xff] %v3964_v9 }
 0x50f   :  { %4029 = vst [vmem:[%s7057_s9 + $0x178] sm:$0xff] %v3965_v56  ;;  %v3879_v59 = vpop.f32.mrb[112].mxu0 }
 0x510   :  { %v4454_v18 = vadd.f32 %v3879_v59, %v6786_v12  ;;  %v3881_v27 = vpop.f32.mrb[113].mxu0 }
 0x511   :  { %v4455_v39 = vadd.f32 %v3881_v27, %v6789_v62  ;;  %v3883_v47 = vpop.f32.mrb[114].mxu0 }
 0x512   :  { %v3966_v34 = vmax.f32 %v4454_v18, 0.0  ;;  %v4456_v61 = vadd.f32 %v3883_v47, %v6786_v12  ;;  %v3885_v29 = vpop.f32.mrb[115].mxu0 }
 0x513   :  { %v3967_v31 = vmax.f32 %v4455_v39, 0.0  ;;  %v4457_v49 = vadd.f32 %v3885_v29, %v6789_v62 }
 0x514   :  { %4030 = vst [vmem:[%s7057_s9 + $0x180] sm:$0xff] %v3966_v34  ;;  %v3968_v17 = vmax.f32 %v4456_v61, 0.0 }
 0x515   :  { %4031 = vst [vmem:[%s7057_s9 + $0x188] sm:$0xff] %v3967_v31  ;;  %v3969_v20 = vmax.f32 %v4457_v49, 0.0 }
 0x516   :  { %4032 = vst [vmem:[%s7057_s9 + $0x190] sm:$0xff] %v3968_v17 }
 0x517   :  { %4033 = vst [vmem:[%s7057_s9 + $0x198] sm:$0xff] %v3969_v20  ;;  %v3889_v21 = vpop.f32.mrb[116].mxu0 }
 0x518   :  { %v4458_v24 = vadd.f32 %v3889_v21, %v6786_v12  ;;  %v3891_v11 = vpop.f32.mrb[117].mxu0 }
 0x519   :  { %v4459_v25 = vadd.f32 %v3891_v11, %v6789_v62  ;;  %v3893_v28 = vpop.f32.mrb[118].mxu0 }
 0x51a   :  { %v3970_v30 = vmax.f32 %v4458_v24, 0.0  ;;  %v4460_v32 = vadd.f32 %v3893_v28, %v6786_v12  ;;  %v3895_v35 = vpop.f32.mrb[119].mxu0 }
 0x51b   :  { %v3971_v46 = vmax.f32 %v4459_v25, 0.0  ;;  %v4461_v57 = vadd.f32 %v3895_v35, %v6789_v62 }
 0x51c   :  { %4034 = vst [vmem:[%s7057_s9 + $0x1a0] sm:$0xff] %v3970_v30  ;;  %v3972_v6 = vmax.f32 %v4460_v32, 0.0 }
 0x51d   :  { %4035 = vst [vmem:[%s7057_s9 + $0x1a8] sm:$0xff] %v3971_v46  ;;  %v3973_v48 = vmax.f32 %v4461_v57, 0.0 }
 0x51e   :  { %4036 = vst [vmem:[%s7057_s9 + $0x1b0] sm:$0xff] %v3972_v6 }
 0x51f   :  { %4037 = vst [vmem:[%s7057_s9 + $0x1b8] sm:$0xff] %v3973_v48  ;;  %v3899_v7 = vpop.f32.mrb[120].mxu0 }
 0x520   :  { %v4462_v37 = vadd.f32 %v3899_v7, %v6786_v12  ;;  %v3901_v38 = vpop.f32.mrb[121].mxu0 }
 0x521   :  { %v4463_v53 = vadd.f32 %v3901_v38, %v6789_v62  ;;  %v3903_v1 = vpop.f32.mrb[122].mxu0 }
 0x522   :  { %v3974_v2 = vmax.f32 %v4462_v37, 0.0  ;;  %v4464_v22 = vadd.f32 %v3903_v1, %v6786_v12  ;;  %v3905_v23 = vpop.f32.mrb[123].mxu0 }
 0x523   :  { %v3975_v51 = vmax.f32 %v4463_v53, 0.0  ;;  %v4465_v40 = vadd.f32 %v3905_v23, %v6789_v62 }
 0x524   :  { %4038 = vst [vmem:[%s7057_s9 + $0x1c0] sm:$0xff] %v3974_v2  ;;  %v3976_v15 = vmax.f32 %v4464_v22, 0.0 }
 0x525   :  { %4039 = vst [vmem:[%s7057_s9 + $0x1c8] sm:$0xff] %v3975_v51  ;;  %v3977_v16 = vmax.f32 %v4465_v40, 0.0 }
 0x526   :  { %4040 = vst [vmem:[%s7057_s9 + $0x1d0] sm:$0xff] %v3976_v15 }
 0x527   :  { %4041 = vst [vmem:[%s7057_s9 + $0x1d8] sm:$0xff] %v3977_v16  ;;  %v3909_v44 = vpop.f32.mrb[124].mxu0 }
 0x528   :  { %v4466_v45 = vadd.f32 %v3909_v44, %v6786_v12  ;;  %v3911_v8 = vpop.f32.mrb[125].mxu0 }
 0x529   :  { %v4467_v13 = vadd.f32 %v3911_v8, %v6789_v62  ;;  %v3913_v26 = vpop.f32.mrb[126].mxu0 }
 0x52a   :  { %v3978_v52 = vmax.f32 %v4466_v45, 0.0  ;;  %v4468_v55 = vadd.f32 %v3913_v26, %v6786_v12  ;;  %v3915_v3 = vpop.f32.mrb[127].mxu0 }
 0x52b   :  { %v3979_v58 = vmax.f32 %v4467_v13, 0.0  ;;  %v4469_v10 = vadd.f32 %v3915_v3, %v6789_v62 }
 0x52c   :  { %4042 = vst [vmem:[%s7057_s9 + $0x1e0] sm:$0xff] %v3978_v52  ;;  %v3980_v19 = vmax.f32 %v4468_v55, 0.0 }
 0x52d   :  { %4043 = vst [vmem:[%s7057_s9 + $0x1e8] sm:$0xff] %v3979_v58  ;;  %v3981_v42 = vmax.f32 %v4469_v10, 0.0 }
 0x52e   :  { %4044 = vst [vmem:[%s7057_s9 + $0x1f0] sm:$0xff] %v3980_v19 }
 0x52f   :  { %4045 = vst [vmem:[%s7057_s9 + $0x1f8] sm:$0xff] %v3981_v42 }

</bundles_post_ra>
